<compile_context>
chip_gen: v7x
topology: tpu7x:2x2x1
jax: 0.10.0
libtpu: 0.0.40
codegen_flags: <defaults>
</compile_context>

<pallas_src>
import jax
import jax.numpy as jnp
from jax.experimental import pallas as pl
from jax.experimental.pallas import tpu as pltpu


def _round_up(x, m):
    return (x + m - 1) // m * m


# Whole array resident in VMEM (layers are tiny; no tiling needed).
_VMEM_SPEC = pl.BlockSpec(memory_space=pltpu.MemorySpace.VMEM)


# ---------------------------------------------------------------------------
# Kernel 1: out = relu((patches @ w) * scale + bias)           (single conv)
# ---------------------------------------------------------------------------
def _conv_bn_relu_kernel(p_ref, w_ref, s_ref, b_ref, o_ref):
    acc = jnp.dot(p_ref[...], w_ref[...], preferred_element_type=jnp.float32)
    y = acc * s_ref[...] + b_ref[...]
    o_ref[...] = jnp.maximum(y, 0.0).astype(o_ref.dtype)


def conv_bn_relu(patches, w, scale, bias, out_dtype):
    M = patches.shape[0]
    cout = w.shape[1]
    return pl.pallas_call(
        _conv_bn_relu_kernel,
        out_shape=jax.ShapeDtypeStruct((M, cout), out_dtype),
        in_specs=[_VMEM_SPEC] * 4,
        out_specs=_VMEM_SPEC,
    )(patches, w, scale, bias)


# ---------------------------------------------------------------------------
# Kernel 2: fused (3x3 conv + BN + ReLU) -> (1x1 conv + BN + ReLU).
#   h   = relu((patches @ wa) * sa + ba)     # 3x3 conv as im2col matmul
#   out = relu((h @ wb) * sb + bb)           # 1x1 conv = plain matmul
# The intermediate h stays in VMEM/vregs (never round-trips to HBM).
# ---------------------------------------------------------------------------
def _pair_conv_bn_relu_kernel(p_ref, wa_ref, sa_ref, ba_ref,
                              wb_ref, sb_ref, bb_ref, o_ref):
    acc = jnp.dot(p_ref[...], wa_ref[...], preferred_element_type=jnp.float32)
    h = jnp.maximum(acc * sa_ref[...] + ba_ref[...], 0.0)
    acc2 = jnp.dot(h.astype(wb_ref.dtype), wb_ref[...],
                   preferred_element_type=jnp.float32)
    y = jnp.maximum(acc2 * sb_ref[...] + bb_ref[...], 0.0)
    o_ref[...] = y.astype(o_ref.dtype)


def conv_pair_bn_relu(patches, wa, sa, ba, wb, sb, bb, out_dtype):
    M = patches.shape[0]
    cout = wb.shape[1]
    return pl.pallas_call(
        _pair_conv_bn_relu_kernel,
        out_shape=jax.ShapeDtypeStruct((M, cout), out_dtype),
        in_specs=[_VMEM_SPEC] * 7,
        out_specs=_VMEM_SPEC,
    )(patches, wa, sa, ba, wb, sb, bb)


# ---------------------------------------------------------------------------
# Glue: im2col patch extraction (pure data movement, stays in plain JAX/XLA).
# Patch feature order is [kh, kw, C] to match the weight layout below.
# ---------------------------------------------------------------------------
def _im2col(x, kh, kw, stride, pad, k_rows):
    N, H, W, C = x.shape
    Ho = (H + 2 * pad - kh) // stride + 1
    Wo = (W + 2 * pad - kw) // stride + 1
    xp = jnp.pad(x, ((0, 0), (pad, pad), (pad, pad), (0, 0)))
    cols = []
    for i in range(kh):
        for j in range(kw):
            cols.append(xp[:, i:i + stride * Ho:stride,
                           j:j + stride * Wo:stride, :])
    patches = jnp.concatenate(cols, axis=-1).reshape(N * Ho * Wo, kh * kw * C)
    if patches.shape[1] < k_rows:           # match pre-padded weight rows
        patches = jnp.pad(patches, ((0, 0), (0, k_rows - patches.shape[1])))
    return patches, Ho, Wo


# ---------------------------------------------------------------------------
# MobileNetV1Prune topology (mirrors the nn.Sequential: dense convs, groups=1)
# ---------------------------------------------------------------------------
def layer_specs(cfg):
    chans = [3] + list(cfg) + [512]
    ksize = [3, 3, 1, 3, 1, 3, 1, 3, 1, 3, 1, 3, 1,
             3, 1, 3, 1, 3, 1, 3, 1, 3, 1, 3, 1]
    stride = [2, 1, 1, 2, 1, 1, 1, 2, 1, 1, 1, 2, 1,
              1, 1, 1, 1, 1, 1, 1, 1, 2, 1, 1, 1]
    return [(chans[i], chans[i + 1], ksize[i], stride[i]) for i in range(25)]


def init_params(key, specs):
    """Deterministic synthetic params.  Eval-mode BatchNorm is folded into a
    per-channel (scale, bias); weights are reshaped to (k*k*cin, cout),
    zero-padded to K % 8 == 0 and pre-cast to bf16 (done once, outside jit)."""
    eps = 1e-5
    params = []
    for (cin, cout, k, s) in specs:
        key, k1, k2, k3, k4, k5, k6 = jax.random.split(key, 7)
        fan_in = cin * k * k
        # weight laid out (kh, kw, cin, cout) to match im2col patch order
        w = jax.random.normal(k1, (k, k, cin, cout), jnp.float32) / jnp.sqrt(
            float(fan_in))
        b = 0.01 * jax.random.normal(k2, (cout,), jnp.float32)
        gamma = 1.0 + 0.1 * jax.random.normal(k3, (cout,), jnp.float32)
        beta = 0.1 * jax.random.normal(k4, (cout,), jnp.float32)
        running_mean = 0.1 * jax.random.normal(k5, (cout,), jnp.float32)
        running_var = 1.0 + 0.1 * jax.random.uniform(k6, (cout,), jnp.float32)
        scale = gamma / jnp.sqrt(running_var + eps)
        bias_eff = (b - running_mean) * scale + beta

        w2d = w.reshape(k * k * cin, cout)
        kp = _round_up(w2d.shape[0], 8)
        w2d = (jnp.zeros((kp, cout), jnp.float32)
               .at[:k * k * cin].set(w2d).astype(jnp.bfloat16))
        params.append((w2d, scale.reshape(1, cout), bias_eff.reshape(1, cout),
                       k, s))
    return params


def mobilenet_v1_prune_forward(x_nchw, params):
    # NCHW (PyTorch convention) -> NHWC; bf16 activations for the MXU.
    x = jnp.transpose(x_nchw, (0, 2, 3, 1)).astype(jnp.bfloat16)
    N = x.shape[0]

    # Layer 0: standalone 3x3 stride-2 conv + BN + ReLU.
    w0, s0, b0, k0, st0 = params[0]
    patches, Ho, Wo = _im2col(x, k0, k0, st0, 1, w0.shape[0])
    y = conv_bn_relu(patches, w0, s0, b0, jnp.bfloat16)
    x = y.reshape(N, Ho, Wo, -1)

    # Remaining 24 layers: fused (3x3 conv, 1x1 conv) pairs -> 12 kernels.
    n = len(params)
    for li in range(1, n, 2):
        wa, sa, ba, ka, sta = params[li]
        wb, sb, bb, kb, stb = params[li + 1]
        assert ka == 3 and kb == 1 and stb == 1
        patches, Ho, Wo = _im2col(x, ka, ka, sta, 1, wa.shape[0])
        last = (li + 1 == n - 1)
        out_dtype = jnp.float32 if last else jnp.bfloat16
        y = conv_pair_bn_relu(patches, wa, sa, ba, wb, sb, bb, out_dtype)
        x = y.reshape(N, Ho, Wo, -1)

    # back to NCHW to match the PyTorch module's output convention
    return jnp.transpose(x, (0, 3, 1, 2)).astype(jnp.float32)


if __name__ == "__main__":
    # small pruned cfg (the module accepts a custom cfg); final conv fixed 512
    cfg = [8, 8, 16, 16, 16, 16, 16, 16, 32, 32, 32, 32,
           32, 32, 32, 32, 32, 32, 32, 32, 32, 32, 32, 32]
    specs = layer_specs(cfg)

    root = jax.random.PRNGKey(0)
    pkey, xkey = jax.random.split(root)
    params = init_params(pkey, specs)

    # input: batch=2, 3 channels, 32x32 spatial (NCHW like PyTorch)
    x = jax.random.normal(xkey, (2, 3, 32, 32), jnp.float32)

    fwd = jax.jit(lambda inp: mobilenet_v1_prune_forward(inp, params))
    out = fwd(x)
    jax.block_until_ready(out)

    # 5 stride-2 convs: 32 -> 16 -> 8 -> 4 -> 2 -> 1; final channels = 512
    assert out.shape == (2, 512, 1, 1), out.shape
    assert jnp.all(jnp.isfinite(out))
    print("KERNEL_OK")
</pallas_src>

<mosaic_0001>
module attributes {stable_mosaic.version = 11 : i64} {
  func.func @_conv_bn_relu_kernel(%arg0: memref<512x32xbf16, #tpu.memory_space<vmem>>, %arg1: memref<32x8xbf16, #tpu.memory_space<vmem>>, %arg2: memref<1x8xf32, #tpu.memory_space<vmem>>, %arg3: memref<1x8xf32, #tpu.memory_space<vmem>>, %arg4: memref<512x8xbf16, #tpu.memory_space<vmem>>) attributes {dimension_semantics = [], scalar_prefetch = 0 : i64, scratch_operands = 0 : i64, tpu.core_type = #tpu.core_type<tc>} {
    %c0 = arith.constant 0 : index
    %c0_0 = arith.constant 0 : index
    %0 = vector.load %arg0[%c0, %c0_0] : memref<512x32xbf16, #tpu.memory_space<vmem>>, vector<512x32xbf16>
    %c0_1 = arith.constant 0 : index
    %c0_2 = arith.constant 0 : index
    %1 = vector.load %arg1[%c0_1, %c0_2] : memref<32x8xbf16, #tpu.memory_space<vmem>>, vector<32x8xbf16>
    %cst = arith.constant dense<0.000000e+00> : vector<512x8xf32>
    %2 = tpu.matmul %0, %1, %cst {dimension_numbers = #tpu.dot_dimension_numbers<[1], [0], [0], [1], [0, 0, 1, 1], [], []>} : vector<512x32xbf16>, vector<32x8xbf16>, vector<512x8xf32> -> vector<512x8xf32>
    %c0_3 = arith.constant 0 : index
    %c0_4 = arith.constant 0 : index
    %3 = vector.load %arg2[%c0_3, %c0_4] : memref<1x8xf32, #tpu.memory_space<vmem>>, vector<1x8xf32>
    %4 = vector.broadcast %3 : vector<1x8xf32> to vector<512x8xf32>
    %5 = arith.mulf %2, %4 : vector<512x8xf32>
    %c0_5 = arith.constant 0 : index
    %c0_6 = arith.constant 0 : index
    %6 = vector.load %arg3[%c0_5, %c0_6] : memref<1x8xf32, #tpu.memory_space<vmem>>, vector<1x8xf32>
    %7 = vector.broadcast %6 : vector<1x8xf32> to vector<512x8xf32>
    %8 = arith.addf %5, %7 : vector<512x8xf32>
    %cst_7 = arith.constant 0.000000e+00 : f32
    %9 = vector.broadcast %cst_7 : f32 to vector<512x8xf32>
    %10 = arith.maximumf %8, %9 : vector<512x8xf32>
    %11 = arith.truncf %10 : vector<512x8xf32> to vector<512x8xbf16>
    %c0_8 = arith.constant 0 : index
    %c0_9 = arith.constant 0 : index
    %12 = vector.load %arg4[%c0_8, %c0_9] : memref<512x8xbf16, #tpu.memory_space<vmem>>, vector<512x8xbf16>
    tpu.vector_store %arg4[%c0_8, %c0_9], %11 {strides = array<i32>} : memref<512x8xbf16, #tpu.memory_space<vmem>>, vector<512x8xbf16>,
    return
  }
}

module attributes {stable_mosaic.version = 11 : i64} {
  func.func @_pair_conv_bn_relu_kernel(%arg0: memref<512x72xbf16, #tpu.memory_space<vmem>>, %arg1: memref<72x8xbf16, #tpu.memory_space<vmem>>, %arg2: memref<1x8xf32, #tpu.memory_space<vmem>>, %arg3: memref<1x8xf32, #tpu.memory_space<vmem>>, %arg4: memref<8x16xbf16, #tpu.memory_space<vmem>>, %arg5: memref<1x16xf32, #tpu.memory_space<vmem>>, %arg6: memref<1x16xf32, #tpu.memory_space<vmem>>, %arg7: memref<512x16xbf16, #tpu.memory_space<vmem>>) attributes {dimension_semantics = [], scalar_prefetch = 0 : i64, scratch_operands = 0 : i64, tpu.core_type = #tpu.core_type<tc>} {
    %c0 = arith.constant 0 : index
    %c0_0 = arith.constant 0 : index
    %0 = vector.load %arg0[%c0, %c0_0] : memref<512x72xbf16, #tpu.memory_space<vmem>>, vector<512x72xbf16>
    %c0_1 = arith.constant 0 : index
    %c0_2 = arith.constant 0 : index
    %1 = vector.load %arg1[%c0_1, %c0_2] : memref<72x8xbf16, #tpu.memory_space<vmem>>, vector<72x8xbf16>
    %cst = arith.constant dense<0.000000e+00> : vector<512x8xf32>
    %2 = tpu.matmul %0, %1, %cst {dimension_numbers = #tpu.dot_dimension_numbers<[1], [0], [0], [1], [0, 0, 1, 1], [], []>} : vector<512x72xbf16>, vector<72x8xbf16>, vector<512x8xf32> -> vector<512x8xf32>
    %c0_3 = arith.constant 0 : index
    %c0_4 = arith.constant 0 : index
    %3 = vector.load %arg2[%c0_3, %c0_4] : memref<1x8xf32, #tpu.memory_space<vmem>>, vector<1x8xf32>
    %4 = vector.broadcast %3 : vector<1x8xf32> to vector<512x8xf32>
    %5 = arith.mulf %2, %4 : vector<512x8xf32>
    %c0_5 = arith.constant 0 : index
    %c0_6 = arith.constant 0 : index
    %6 = vector.load %arg3[%c0_5, %c0_6] : memref<1x8xf32, #tpu.memory_space<vmem>>, vector<1x8xf32>
    %7 = vector.broadcast %6 : vector<1x8xf32> to vector<512x8xf32>
    %8 = arith.addf %5, %7 : vector<512x8xf32>
    %cst_7 = arith.constant 0.000000e+00 : f32
    %9 = vector.broadcast %cst_7 : f32 to vector<512x8xf32>
    %10 = arith.maximumf %8, %9 : vector<512x8xf32>
    %11 = arith.truncf %10 : vector<512x8xf32> to vector<512x8xbf16>
    %c0_8 = arith.constant 0 : index
    %c0_9 = arith.constant 0 : index
    %12 = vector.load %arg4[%c0_8, %c0_9] : memref<8x16xbf16, #tpu.memory_space<vmem>>, vector<8x16xbf16>
    %cst_10 = arith.constant dense<0.000000e+00> : vector<512x16xf32>
    %13 = tpu.matmul %11, %12, %cst_10 {dimension_numbers = #tpu.dot_dimension_numbers<[1], [0], [0], [1], [0, 0, 1, 1], [], []>} : vector<512x8xbf16>, vector<8x16xbf16>, vector<512x16xf32> -> vector<512x16xf32>
    %c0_11 = arith.constant 0 : index
    %c0_12 = arith.constant 0 : index
    %14 = vector.load %arg5[%c0_11, %c0_12] : memref<1x16xf32, #tpu.memory_space<vmem>>, vector<1x16xf32>
    %15 = vector.broadcast %14 : vector<1x16xf32> to vector<512x16xf32>
    %16 = arith.mulf %13, %15 : vector<512x16xf32>
    %c0_13 = arith.constant 0 : index
    %c0_14 = arith.constant 0 : index
    %17 = vector.load %arg6[%c0_13, %c0_14] : memref<1x16xf32, #tpu.memory_space<vmem>>, vector<1x16xf32>
    %18 = vector.broadcast %17 : vector<1x16xf32> to vector<512x16xf32>
    %19 = arith.addf %16, %18 : vector<512x16xf32>
    %cst_15 = arith.constant 0.000000e+00 : f32
    %20 = vector.broadcast %cst_15 : f32 to vector<512x16xf32>
    %21 = arith.maximumf %19, %20 : vector<512x16xf32>
    %22 = arith.truncf %21 : vector<512x16xf32> to vector<512x16xbf16>
    %c0_16 = arith.constant 0 : index
    %c0_17 = arith.constant 0 : index
    %23 = vector.load %arg7[%c0_16, %c0_17] : memref<512x16xbf16, #tpu.memory_space<vmem>>, vector<512x16xbf16>
    tpu.vector_store %arg7[%c0_16, %c0_17], %22 {strides = array<i32>} : memref<512x16xbf16, #tpu.memory_space<vmem>>, vector<512x16xbf16>,
    return
  }
}

module attributes {stable_mosaic.version = 11 : i64} {
  func.func @_pair_conv_bn_relu_kernel(%arg0: memref<128x144xbf16, #tpu.memory_space<vmem>>, %arg1: memref<144x16xbf16, #tpu.memory_space<vmem>>, %arg2: memref<1x16xf32, #tpu.memory_space<vmem>>, %arg3: memref<1x16xf32, #tpu.memory_space<vmem>>, %arg4: memref<16x16xbf16, #tpu.memory_space<vmem>>, %arg5: memref<1x16xf32, #tpu.memory_space<vmem>>, %arg6: memref<1x16xf32, #tpu.memory_space<vmem>>, %arg7: memref<128x16xbf16, #tpu.memory_space<vmem>>) attributes {dimension_semantics = [], scalar_prefetch = 0 : i64, scratch_operands = 0 : i64, tpu.core_type = #tpu.core_type<tc>} {
    %c0 = arith.constant 0 : index
    %c0_0 = arith.constant 0 : index
    %0 = vector.load %arg0[%c0, %c0_0] : memref<128x144xbf16, #tpu.memory_space<vmem>>, vector<128x144xbf16>
    %c0_1 = arith.constant 0 : index
    %c0_2 = arith.constant 0 : index
    %1 = vector.load %arg1[%c0_1, %c0_2] : memref<144x16xbf16, #tpu.memory_space<vmem>>, vector<144x16xbf16>
    %cst = arith.constant dense<0.000000e+00> : vector<128x16xf32>
    %2 = tpu.matmul %0, %1, %cst {dimension_numbers = #tpu.dot_dimension_numbers<[1], [0], [0], [1], [0, 0, 1, 1], [], []>} : vector<128x144xbf16>, vector<144x16xbf16>, vector<128x16xf32> -> vector<128x16xf32>
    %c0_3 = arith.constant 0 : index
    %c0_4 = arith.constant 0 : index
    %3 = vector.load %arg2[%c0_3, %c0_4] : memref<1x16xf32, #tpu.memory_space<vmem>>, vector<1x16xf32>
    %4 = vector.broadcast %3 : vector<1x16xf32> to vector<128x16xf32>
    %5 = arith.mulf %2, %4 : vector<128x16xf32>
    %c0_5 = arith.constant 0 : index
    %c0_6 = arith.constant 0 : index
    %6 = vector.load %arg3[%c0_5, %c0_6] : memref<1x16xf32, #tpu.memory_space<vmem>>, vector<1x16xf32>
    %7 = vector.broadcast %6 : vector<1x16xf32> to vector<128x16xf32>
    %8 = arith.addf %5, %7 : vector<128x16xf32>
    %cst_7 = arith.constant 0.000000e+00 : f32
    %9 = vector.broadcast %cst_7 : f32 to vector<128x16xf32>
    %10 = arith.maximumf %8, %9 : vector<128x16xf32>
    %11 = arith.truncf %10 : vector<128x16xf32> to vector<128x16xbf16>
    %c0_8 = arith.constant 0 : index
    %c0_9 = arith.constant 0 : index
    %12 = vector.load %arg4[%c0_8, %c0_9] : memref<16x16xbf16, #tpu.memory_space<vmem>>, vector<16x16xbf16>
    %cst_10 = arith.constant dense<0.000000e+00> : vector<128x16xf32>
    %13 = tpu.matmul %11, %12, %cst_10 {dimension_numbers = #tpu.dot_dimension_numbers<[1], [0], [0], [1], [0, 0, 1, 1], [], []>} : vector<128x16xbf16>, vector<16x16xbf16>, vector<128x16xf32> -> vector<128x16xf32>
    %c0_11 = arith.constant 0 : index
    %c0_12 = arith.constant 0 : index
    %14 = vector.load %arg5[%c0_11, %c0_12] : memref<1x16xf32, #tpu.memory_space<vmem>>, vector<1x16xf32>
    %15 = vector.broadcast %14 : vector<1x16xf32> to vector<128x16xf32>
    %16 = arith.mulf %13, %15 : vector<128x16xf32>
    %c0_13 = arith.constant 0 : index
    %c0_14 = arith.constant 0 : index
    %17 = vector.load %arg6[%c0_13, %c0_14] : memref<1x16xf32, #tpu.memory_space<vmem>>, vector<1x16xf32>
    %18 = vector.broadcast %17 : vector<1x16xf32> to vector<128x16xf32>
    %19 = arith.addf %16, %18 : vector<128x16xf32>
    %cst_15 = arith.constant 0.000000e+00 : f32
    %20 = vector.broadcast %cst_15 : f32 to vector<128x16xf32>
    %21 = arith.maximumf %19, %20 : vector<128x16xf32>
    %22 = arith.truncf %21 : vector<128x16xf32> to vector<128x16xbf16>
    %c0_16 = arith.constant 0 : index
    %c0_17 = arith.constant 0 : index
    %23 = vector.load %arg7[%c0_16, %c0_17] : memref<128x16xbf16, #tpu.memory_space<vmem>>, vector<128x16xbf16>
    tpu.vector_store %arg7[%c0_16, %c0_17], %22 {strides = array<i32>} : memref<128x16xbf16, #tpu.memory_space<vmem>>, vector<128x16xbf16>,
    return
  }
}

module attributes {stable_mosaic.version = 11 : i64} {
  func.func @_pair_conv_bn_relu_kernel(%arg0: memref<32x144xbf16, #tpu.memory_space<vmem>>, %arg1: memref<144x16xbf16, #tpu.memory_space<vmem>>, %arg2: memref<1x16xf32, #tpu.memory_space<vmem>>, %arg3: memref<1x16xf32, #tpu.memory_space<vmem>>, %arg4: memref<16x32xbf16, #tpu.memory_space<vmem>>, %arg5: memref<1x32xf32, #tpu.memory_space<vmem>>, %arg6: memref<1x32xf32, #tpu.memory_space<vmem>>, %arg7: memref<32x32xbf16, #tpu.memory_space<vmem>>) attributes {dimension_semantics = [], scalar_prefetch = 0 : i64, scratch_operands = 0 : i64, tpu.core_type = #tpu.core_type<tc>} {
    %c0 = arith.constant 0 : index
    %c0_0 = arith.constant 0 : index
    %0 = vector.load %arg0[%c0, %c0_0] : memref<32x144xbf16, #tpu.memory_space<vmem>>, vector<32x144xbf16>
    %c0_1 = arith.constant 0 : index
    %c0_2 = arith.constant 0 : index
    %1 = vector.load %arg1[%c0_1, %c0_2] : memref<144x16xbf16, #tpu.memory_space<vmem>>, vector<144x16xbf16>
    %cst = arith.constant dense<0.000000e+00> : vector<32x16xf32>
    %2 = tpu.matmul %0, %1, %cst {dimension_numbers = #tpu.dot_dimension_numbers<[1], [0], [0], [1], [0, 0, 1, 1], [], []>} : vector<32x144xbf16>, vector<144x16xbf16>, vector<32x16xf32> -> vector<32x16xf32>
    %c0_3 = arith.constant 0 : index
    %c0_4 = arith.constant 0 : index
    %3 = vector.load %arg2[%c0_3, %c0_4] : memref<1x16xf32, #tpu.memory_space<vmem>>, vector<1x16xf32>
    %4 = vector.broadcast %3 : vector<1x16xf32> to vector<32x16xf32>
    %5 = arith.mulf %2, %4 : vector<32x16xf32>
    %c0_5 = arith.constant 0 : index
    %c0_6 = arith.constant 0 : index
    %6 = vector.load %arg3[%c0_5, %c0_6] : memref<1x16xf32, #tpu.memory_space<vmem>>, vector<1x16xf32>
    %7 = vector.broadcast %6 : vector<1x16xf32> to vector<32x16xf32>
    %8 = arith.addf %5, %7 : vector<32x16xf32>
    %cst_7 = arith.constant 0.000000e+00 : f32
    %9 = vector.broadcast %cst_7 : f32 to vector<32x16xf32>
    %10 = arith.maximumf %8, %9 : vector<32x16xf32>
    %11 = arith.truncf %10 : vector<32x16xf32> to vector<32x16xbf16>
    %c0_8 = arith.constant 0 : index
    %c0_9 = arith.constant 0 : index
    %12 = vector.load %arg4[%c0_8, %c0_9] : memref<16x32xbf16, #tpu.memory_space<vmem>>, vector<16x32xbf16>
    %cst_10 = arith.constant dense<0.000000e+00> : vector<32x32xf32>
    %13 = tpu.matmul %11, %12, %cst_10 {dimension_numbers = #tpu.dot_dimension_numbers<[1], [0], [0], [1], [0, 0, 1, 1], [], []>} : vector<32x16xbf16>, vector<16x32xbf16>, vector<32x32xf32> -> vector<32x32xf32>
    %c0_11 = arith.constant 0 : index
    %c0_12 = arith.constant 0 : index
    %14 = vector.load %arg5[%c0_11, %c0_12] : memref<1x32xf32, #tpu.memory_space<vmem>>, vector<1x32xf32>
    %15 = vector.broadcast %14 : vector<1x32xf32> to vector<32x32xf32>
    %16 = arith.mulf %13, %15 : vector<32x32xf32>
    %c0_13 = arith.constant 0 : index
    %c0_14 = arith.constant 0 : index
    %17 = vector.load %arg6[%c0_13, %c0_14] : memref<1x32xf32, #tpu.memory_space<vmem>>, vector<1x32xf32>
    %18 = vector.broadcast %17 : vector<1x32xf32> to vector<32x32xf32>
    %19 = arith.addf %16, %18 : vector<32x32xf32>
    %cst_15 = arith.constant 0.000000e+00 : f32
    %20 = vector.broadcast %cst_15 : f32 to vector<32x32xf32>
    %21 = arith.maximumf %19, %20 : vector<32x32xf32>
    %22 = arith.truncf %21 : vector<32x32xf32> to vector<32x32xbf16>
    %c0_16 = arith.constant 0 : index
    %c0_17 = arith.constant 0 : index
    %23 = vector.load %arg7[%c0_16, %c0_17] : memref<32x32xbf16, #tpu.memory_space<vmem>>, vector<32x32xbf16>
    tpu.vector_store %arg7[%c0_16, %c0_17], %22 {strides = array<i32>} : memref<32x32xbf16, #tpu.memory_space<vmem>>, vector<32x32xbf16>,
    return
  }
}

module attributes {stable_mosaic.version = 11 : i64} {
  func.func @_pair_conv_bn_relu_kernel(%arg0: memref<32x288xbf16, #tpu.memory_space<vmem>>, %arg1: memref<288x32xbf16, #tpu.memory_space<vmem>>, %arg2: memref<1x32xf32, #tpu.memory_space<vmem>>, %arg3: memref<1x32xf32, #tpu.memory_space<vmem>>, %arg4: memref<32x32xbf16, #tpu.memory_space<vmem>>, %arg5: memref<1x32xf32, #tpu.memory_space<vmem>>, %arg6: memref<1x32xf32, #tpu.memory_space<vmem>>, %arg7: memref<32x32xbf16, #tpu.memory_space<vmem>>) attributes {dimension_semantics = [], scalar_prefetch = 0 : i64, scratch_operands = 0 : i64, tpu.core_type = #tpu.core_type<tc>} {
    %c0 = arith.constant 0 : index
    %c0_0 = arith.constant 0 : index
    %0 = vector.load %arg0[%c0, %c0_0] : memref<32x288xbf16, #tpu.memory_space<vmem>>, vector<32x288xbf16>
    %c0_1 = arith.constant 0 : index
    %c0_2 = arith.constant 0 : index
    %1 = vector.load %arg1[%c0_1, %c0_2] : memref<288x32xbf16, #tpu.memory_space<vmem>>, vector<288x32xbf16>
    %cst = arith.constant dense<0.000000e+00> : vector<32x32xf32>
    %2 = tpu.matmul %0, %1, %cst {dimension_numbers = #tpu.dot_dimension_numbers<[1], [0], [0], [1], [0, 0, 1, 1], [], []>} : vector<32x288xbf16>, vector<288x32xbf16>, vector<32x32xf32> -> vector<32x32xf32>
    %c0_3 = arith.constant 0 : index
    %c0_4 = arith.constant 0 : index
    %3 = vector.load %arg2[%c0_3, %c0_4] : memref<1x32xf32, #tpu.memory_space<vmem>>, vector<1x32xf32>
    %4 = vector.broadcast %3 : vector<1x32xf32> to vector<32x32xf32>
    %5 = arith.mulf %2, %4 : vector<32x32xf32>
    %c0_5 = arith.constant 0 : index
    %c0_6 = arith.constant 0 : index
    %6 = vector.load %arg3[%c0_5, %c0_6] : memref<1x32xf32, #tpu.memory_space<vmem>>, vector<1x32xf32>
    %7 = vector.broadcast %6 : vector<1x32xf32> to vector<32x32xf32>
    %8 = arith.addf %5, %7 : vector<32x32xf32>
    %cst_7 = arith.constant 0.000000e+00 : f32
    %9 = vector.broadcast %cst_7 : f32 to vector<32x32xf32>
    %10 = arith.maximumf %8, %9 : vector<32x32xf32>
    %11 = arith.truncf %10 : vector<32x32xf32> to vector<32x32xbf16>
    %c0_8 = arith.constant 0 : index
    %c0_9 = arith.constant 0 : index
    %12 = vector.load %arg4[%c0_8, %c0_9] : memref<32x32xbf16, #tpu.memory_space<vmem>>, vector<32x32xbf16>
    %cst_10 = arith.constant dense<0.000000e+00> : vector<32x32xf32>
    %13 = tpu.matmul %11, %12, %cst_10 {dimension_numbers = #tpu.dot_dimension_numbers<[1], [0], [0], [1], [0, 0, 1, 1], [], []>} : vector<32x32xbf16>, vector<32x32xbf16>, vector<32x32xf32> -> vector<32x32xf32>
    %c0_11 = arith.constant 0 : index
    %c0_12 = arith.constant 0 : index
    %14 = vector.load %arg5[%c0_11, %c0_12] : memref<1x32xf32, #tpu.memory_space<vmem>>, vector<1x32xf32>
    %15 = vector.broadcast %14 : vector<1x32xf32> to vector<32x32xf32>
    %16 = arith.mulf %13, %15 : vector<32x32xf32>
    %c0_13 = arith.constant 0 : index
    %c0_14 = arith.constant 0 : index
    %17 = vector.load %arg6[%c0_13, %c0_14] : memref<1x32xf32, #tpu.memory_space<vmem>>, vector<1x32xf32>
    %18 = vector.broadcast %17 : vector<1x32xf32> to vector<32x32xf32>
    %19 = arith.addf %16, %18 : vector<32x32xf32>
    %cst_15 = arith.constant 0.000000e+00 : f32
    %20 = vector.broadcast %cst_15 : f32 to vector<32x32xf32>
    %21 = arith.maximumf %19, %20 : vector<32x32xf32>
    %22 = arith.truncf %21 : vector<32x32xf32> to vector<32x32xbf16>
    %c0_16 = arith.constant 0 : index
    %c0_17 = arith.constant 0 : index
    %23 = vector.load %arg7[%c0_16, %c0_17] : memref<32x32xbf16, #tpu.memory_space<vmem>>, vector<32x32xbf16>
    tpu.vector_store %arg7[%c0_16, %c0_17], %22 {strides = array<i32>} : memref<32x32xbf16, #tpu.memory_space<vmem>>, vector<32x32xbf16>,
    return
  }
}

module attributes {stable_mosaic.version = 11 : i64} {
  func.func @_pair_conv_bn_relu_kernel(%arg0: memref<8x288xbf16, #tpu.memory_space<vmem>>, %arg1: memref<288x32xbf16, #tpu.memory_space<vmem>>, %arg2: memref<1x32xf32, #tpu.memory_space<vmem>>, %arg3: memref<1x32xf32, #tpu.memory_space<vmem>>, %arg4: memref<32x32xbf16, #tpu.memory_space<vmem>>, %arg5: memref<1x32xf32, #tpu.memory_space<vmem>>, %arg6: memref<1x32xf32, #tpu.memory_space<vmem>>, %arg7: memref<8x32xbf16, #tpu.memory_space<vmem>>) attributes {dimension_semantics = [], scalar_prefetch = 0 : i64, scratch_operands = 0 : i64, tpu.core_type = #tpu.core_type<tc>} {
    %c0 = arith.constant 0 : index
    %c0_0 = arith.constant 0 : index
    %0 = vector.load %arg0[%c0, %c0_0] : memref<8x288xbf16, #tpu.memory_space<vmem>>, vector<8x288xbf16>
    %c0_1 = arith.constant 0 : index
    %c0_2 = arith.constant 0 : index
    %1 = vector.load %arg1[%c0_1, %c0_2] : memref<288x32xbf16, #tpu.memory_space<vmem>>, vector<288x32xbf16>
    %cst = arith.constant dense<0.000000e+00> : vector<8x32xf32>
    %2 = tpu.matmul %0, %1, %cst {dimension_numbers = #tpu.dot_dimension_numbers<[1], [0], [0], [1], [0, 0, 1, 1], [], []>} : vector<8x288xbf16>, vector<288x32xbf16>, vector<8x32xf32> -> vector<8x32xf32>
    %c0_3 = arith.constant 0 : index
    %c0_4 = arith.constant 0 : index
    %3 = vector.load %arg2[%c0_3, %c0_4] : memref<1x32xf32, #tpu.memory_space<vmem>>, vector<1x32xf32>
    %4 = vector.broadcast %3 : vector<1x32xf32> to vector<8x32xf32>
    %5 = arith.mulf %2, %4 : vector<8x32xf32>
    %c0_5 = arith.constant 0 : index
    %c0_6 = arith.constant 0 : index
    %6 = vector.load %arg3[%c0_5, %c0_6] : memref<1x32xf32, #tpu.memory_space<vmem>>, vector<1x32xf32>
    %7 = vector.broadcast %6 : vector<1x32xf32> to vector<8x32xf32>
    %8 = arith.addf %5, %7 : vector<8x32xf32>
    %cst_7 = arith.constant 0.000000e+00 : f32
    %9 = vector.broadcast %cst_7 : f32 to vector<8x32xf32>
    %10 = arith.maximumf %8, %9 : vector<8x32xf32>
    %11 = arith.truncf %10 : vector<8x32xf32> to vector<8x32xbf16>
    %c0_8 = arith.constant 0 : index
    %c0_9 = arith.constant 0 : index
    %12 = vector.load %arg4[%c0_8, %c0_9] : memref<32x32xbf16, #tpu.memory_space<vmem>>, vector<32x32xbf16>
    %cst_10 = arith.constant dense<0.000000e+00> : vector<8x32xf32>
    %13 = tpu.matmul %11, %12, %cst_10 {dimension_numbers = #tpu.dot_dimension_numbers<[1], [0], [0], [1], [0, 0, 1, 1], [], []>} : vector<8x32xbf16>, vector<32x32xbf16>, vector<8x32xf32> -> vector<8x32xf32>
    %c0_11 = arith.constant 0 : index
    %c0_12 = arith.constant 0 : index
    %14 = vector.load %arg5[%c0_11, %c0_12] : memref<1x32xf32, #tpu.memory_space<vmem>>, vector<1x32xf32>
    %15 = vector.broadcast %14 : vector<1x32xf32> to vector<8x32xf32>
    %16 = arith.mulf %13, %15 : vector<8x32xf32>
    %c0_13 = arith.constant 0 : index
    %c0_14 = arith.constant 0 : index
    %17 = vector.load %arg6[%c0_13, %c0_14] : memref<1x32xf32, #tpu.memory_space<vmem>>, vector<1x32xf32>
    %18 = vector.broadcast %17 : vector<1x32xf32> to vector<8x32xf32>
    %19 = arith.addf %16, %18 : vector<8x32xf32>
    %cst_15 = arith.constant 0.000000e+00 : f32
    %20 = vector.broadcast %cst_15 : f32 to vector<8x32xf32>
    %21 = arith.maximumf %19, %20 : vector<8x32xf32>
    %22 = arith.truncf %21 : vector<8x32xf32> to vector<8x32xbf16>
    %c0_16 = arith.constant 0 : index
    %c0_17 = arith.constant 0 : index
    %23 = vector.load %arg7[%c0_16, %c0_17] : memref<8x32xbf16, #tpu.memory_space<vmem>>, vector<8x32xbf16>
    tpu.vector_store %arg7[%c0_16, %c0_17], %22 {strides = array<i32>} : memref<8x32xbf16, #tpu.memory_space<vmem>>, vector<8x32xbf16>,
    return
  }
}

module attributes {stable_mosaic.version = 11 : i64} {
  func.func @_pair_conv_bn_relu_kernel(%arg0: memref<2x288xbf16, #tpu.memory_space<vmem>>, %arg1: memref<288x32xbf16, #tpu.memory_space<vmem>>, %arg2: memref<1x32xf32, #tpu.memory_space<vmem>>, %arg3: memref<1x32xf32, #tpu.memory_space<vmem>>, %arg4: memref<32x32xbf16, #tpu.memory_space<vmem>>, %arg5: memref<1x32xf32, #tpu.memory_space<vmem>>, %arg6: memref<1x32xf32, #tpu.memory_space<vmem>>, %arg7: memref<2x32xbf16, #tpu.memory_space<vmem>>) attributes {dimension_semantics = [], scalar_prefetch = 0 : i64, scratch_operands = 0 : i64, tpu.core_type = #tpu.core_type<tc>} {
    %c0 = arith.constant 0 : index
    %c0_0 = arith.constant 0 : index
    %0 = vector.load %arg0[%c0, %c0_0] : memref<2x288xbf16, #tpu.memory_space<vmem>>, vector<2x288xbf16>
    %c0_1 = arith.constant 0 : index
    %c0_2 = arith.constant 0 : index
    %1 = vector.load %arg1[%c0_1, %c0_2] : memref<288x32xbf16, #tpu.memory_space<vmem>>, vector<288x32xbf16>
    %cst = arith.constant dense<0.000000e+00> : vector<2x32xf32>
    %2 = tpu.matmul %0, %1, %cst {dimension_numbers = #tpu.dot_dimension_numbers<[1], [0], [0], [1], [0, 0, 1, 1], [], []>} : vector<2x288xbf16>, vector<288x32xbf16>, vector<2x32xf32> -> vector<2x32xf32>
    %c0_3 = arith.constant 0 : index
    %c0_4 = arith.constant 0 : index
    %3 = vector.load %arg2[%c0_3, %c0_4] : memref<1x32xf32, #tpu.memory_space<vmem>>, vector<1x32xf32>
    %4 = vector.broadcast %3 : vector<1x32xf32> to vector<2x32xf32>
    %5 = arith.mulf %2, %4 : vector<2x32xf32>
    %c0_5 = arith.constant 0 : index
    %c0_6 = arith.constant 0 : index
    %6 = vector.load %arg3[%c0_5, %c0_6] : memref<1x32xf32, #tpu.memory_space<vmem>>, vector<1x32xf32>
    %7 = vector.broadcast %6 : vector<1x32xf32> to vector<2x32xf32>
    %8 = arith.addf %5, %7 : vector<2x32xf32>
    %cst_7 = arith.constant 0.000000e+00 : f32
    %9 = vector.broadcast %cst_7 : f32 to vector<2x32xf32>
    %10 = arith.maximumf %8, %9 : vector<2x32xf32>
    %11 = arith.truncf %10 : vector<2x32xf32> to vector<2x32xbf16>
    %c0_8 = arith.constant 0 : index
    %c0_9 = arith.constant 0 : index
    %12 = vector.load %arg4[%c0_8, %c0_9] : memref<32x32xbf16, #tpu.memory_space<vmem>>, vector<32x32xbf16>
    %cst_10 = arith.constant dense<0.000000e+00> : vector<2x32xf32>
    %13 = tpu.matmul %11, %12, %cst_10 {dimension_numbers = #tpu.dot_dimension_numbers<[1], [0], [0], [1], [0, 0, 1, 1], [], []>} : vector<2x32xbf16>, vector<32x32xbf16>, vector<2x32xf32> -> vector<2x32xf32>
    %c0_11 = arith.constant 0 : index
    %c0_12 = arith.constant 0 : index
    %14 = vector.load %arg5[%c0_11, %c0_12] : memref<1x32xf32, #tpu.memory_space<vmem>>, vector<1x32xf32>
    %15 = vector.broadcast %14 : vector<1x32xf32> to vector<2x32xf32>
    %16 = arith.mulf %13, %15 : vector<2x32xf32>
    %c0_13 = arith.constant 0 : index
    %c0_14 = arith.constant 0 : index
    %17 = vector.load %arg6[%c0_13, %c0_14] : memref<1x32xf32, #tpu.memory_space<vmem>>, vector<1x32xf32>
    %18 = vector.broadcast %17 : vector<1x32xf32> to vector<2x32xf32>
    %19 = arith.addf %16, %18 : vector<2x32xf32>
    %cst_15 = arith.constant 0.000000e+00 : f32
    %20 = vector.broadcast %cst_15 : f32 to vector<2x32xf32>
    %21 = arith.maximumf %19, %20 : vector<2x32xf32>
    %22 = arith.truncf %21 : vector<2x32xf32> to vector<2x32xbf16>
    %c0_16 = arith.constant 0 : index
    %c0_17 = arith.constant 0 : index
    %23 = vector.load %arg7[%c0_16, %c0_17] : memref<2x32xbf16, #tpu.memory_space<vmem>>, vector<2x32xbf16>
    tpu.vector_store %arg7[%c0_16, %c0_17], %22 {strides = array<i32>} : memref<2x32xbf16, #tpu.memory_space<vmem>>, vector<2x32xbf16>,
    return
  }
}

module attributes {stable_mosaic.version = 11 : i64} {
  func.func @_pair_conv_bn_relu_kernel(%arg0: memref<2x288xbf16, #tpu.memory_space<vmem>>, %arg1: memref<288x32xbf16, #tpu.memory_space<vmem>>, %arg2: memref<1x32xf32, #tpu.memory_space<vmem>>, %arg3: memref<1x32xf32, #tpu.memory_space<vmem>>, %arg4: memref<32x512xbf16, #tpu.memory_space<vmem>>, %arg5: memref<1x512xf32, #tpu.memory_space<vmem>>, %arg6: memref<1x512xf32, #tpu.memory_space<vmem>>, %arg7: memref<2x512xf32, #tpu.memory_space<vmem>>) attributes {dimension_semantics = [], scalar_prefetch = 0 : i64, scratch_operands = 0 : i64, tpu.core_type = #tpu.core_type<tc>} {
    %c0 = arith.constant 0 : index
    %c0_0 = arith.constant 0 : index
    %0 = vector.load %arg0[%c0, %c0_0] : memref<2x288xbf16, #tpu.memory_space<vmem>>, vector<2x288xbf16>
    %c0_1 = arith.constant 0 : index
    %c0_2 = arith.constant 0 : index
    %1 = vector.load %arg1[%c0_1, %c0_2] : memref<288x32xbf16, #tpu.memory_space<vmem>>, vector<288x32xbf16>
    %cst = arith.constant dense<0.000000e+00> : vector<2x32xf32>
    %2 = tpu.matmul %0, %1, %cst {dimension_numbers = #tpu.dot_dimension_numbers<[1], [0], [0], [1], [0, 0, 1, 1], [], []>} : vector<2x288xbf16>, vector<288x32xbf16>, vector<2x32xf32> -> vector<2x32xf32>
    %c0_3 = arith.constant 0 : index
    %c0_4 = arith.constant 0 : index
    %3 = vector.load %arg2[%c0_3, %c0_4] : memref<1x32xf32, #tpu.memory_space<vmem>>, vector<1x32xf32>
    %4 = vector.broadcast %3 : vector<1x32xf32> to vector<2x32xf32>
    %5 = arith.mulf %2, %4 : vector<2x32xf32>
    %c0_5 = arith.constant 0 : index
    %c0_6 = arith.constant 0 : index
    %6 = vector.load %arg3[%c0_5, %c0_6] : memref<1x32xf32, #tpu.memory_space<vmem>>, vector<1x32xf32>
    %7 = vector.broadcast %6 : vector<1x32xf32> to vector<2x32xf32>
    %8 = arith.addf %5, %7 : vector<2x32xf32>
    %cst_7 = arith.constant 0.000000e+00 : f32
    %9 = vector.broadcast %cst_7 : f32 to vector<2x32xf32>
    %10 = arith.maximumf %8, %9 : vector<2x32xf32>
    %11 = arith.truncf %10 : vector<2x32xf32> to vector<2x32xbf16>
    %c0_8 = arith.constant 0 : index
    %c0_9 = arith.constant 0 : index
    %12 = vector.load %arg4[%c0_8, %c0_9] : memref<32x512xbf16, #tpu.memory_space<vmem>>, vector<32x512xbf16>
    %cst_10 = arith.constant dense<0.000000e+00> : vector<2x512xf32>
    %13 = tpu.matmul %11, %12, %cst_10 {dimension_numbers = #tpu.dot_dimension_numbers<[1], [0], [0], [1], [0, 0, 1, 1], [], []>} : vector<2x32xbf16>, vector<32x512xbf16>, vector<2x512xf32> -> vector<2x512xf32>
    %c0_11 = arith.constant 0 : index
    %c0_12 = arith.constant 0 : index
    %14 = vector.load %arg5[%c0_11, %c0_12] : memref<1x512xf32, #tpu.memory_space<vmem>>, vector<1x512xf32>
    %15 = vector.broadcast %14 : vector<1x512xf32> to vector<2x512xf32>
    %16 = arith.mulf %13, %15 : vector<2x512xf32>
    %c0_13 = arith.constant 0 : index
    %c0_14 = arith.constant 0 : index
    %17 = vector.load %arg6[%c0_13, %c0_14] : memref<1x512xf32, #tpu.memory_space<vmem>>, vector<1x512xf32>
    %18 = vector.broadcast %17 : vector<1x512xf32> to vector<2x512xf32>
    %19 = arith.addf %16, %18 : vector<2x512xf32>
    %cst_15 = arith.constant 0.000000e+00 : f32
    %20 = vector.broadcast %cst_15 : f32 to vector<2x512xf32>
    %21 = arith.maximumf %19, %20 : vector<2x512xf32>
    %c0_16 = arith.constant 0 : index
    %c0_17 = arith.constant 0 : index
    %22 = vector.load %arg7[%c0_16, %c0_17] : memref<2x512xf32, #tpu.memory_space<vmem>>, vector<2x512xf32>
    tpu.vector_store %arg7[%c0_16, %c0_17], %21 {strides = array<i32>} : memref<2x512xf32, #tpu.memory_space<vmem>>, vector<2x512xf32>,
    return
  }
}

</mosaic_0001>

<bundles_post_ra>
// kernel: _lambda_.13
= control target key start
LH: loop header
LB: loop body
LE: loop exit
PB: predicated region body
PF: predicated region fallthrough
CT: control target
= control target key end

     0   :  { %vm258_vm0 = vcmask 261120   ;;  %vm1106_vm1 = vcmask 60416   ;;  %s2064_s1 = inlined_call_operand.vmem [shape: bf16[32,8], index: 1, kind: input, shape index: {}]   ;;  %s2065_s0 = inlined_call_operand.vmem [shape: bf16[512,32], index: 0, kind: input, shape index: {}]   ;;  %s2066_s2 = inlined_call_operand.vmem [shape: f32[1,8], index: 2, kind: input, shape index: {}]   ;;  %s2067_s3 = inlined_call_operand.vmem [shape: f32[1,8], index: 3, kind: input, shape index: {}]   ;;  %s2068_s4 = inlined_call_operand.vmem [shape: bf16[512,8], index: 4, kind: output, shape index: {}]  }
   0x1   :  { %v1477_v0 = vld [vmem:[%s2064_s1] sm:$0xff]   ;;  %v1478_v1 = vld [vmem:[%s2064_s1 + $0x8] sm:$0xff]   ;;  %v1483_v6 = vld [vmem:[%s2065_s0 + $0x10] sm:$0xff]  }
   0x2   :  { %1405 = vmatprep.subr.bf16.mxu0 %v1477_v0  ;;  %1473 = vmatprep.subr.bf16.mxu1 %v1477_v0  ;;  %v1479_v2 = vld [vmem:[%s2065_s0] sm:$0xff]   ;;  %v1481_v4 = vld [vmem:[%s2065_s0 + $0x8] sm:$0xff]   ;;  %v1484_v7 = vld [vmem:[%s2065_s0 + $0x90] sm:$0xff]  }
   0x3   :  { %1406 = vmatpush3.bf16.msra.mxu0 %v1477_v0  ;;  %1475 = vmatpush3.bf16.msra.mxu1 %v1477_v0  ;;  %v1480_v3 = vld [vmem:[%s2065_s0 + $0x80] sm:$0xff]   ;;  %v1482_v5 = vld [vmem:[%s2065_s0 + $0x88] sm:$0xff]   ;;  %v1485_v8 = vld [vmem:[%s2065_s0 + $0x18] sm:$0xff]  }
   0x4   :  { %1407 = vmatprep.subr.bf16.mxu0 %v1478_v1  ;;  %1474 = vmatprep.subr.bf16.mxu1 %v1478_v1  ;;  %v1486_v9 = vld [vmem:[%s2065_s0 + $0x98] sm:$0xff]   ;;  %v1487_v10 = vld [vmem:[%s2065_s0 + $0x20] sm:$0xff]   ;;  %v1489_v12 = vld [vmem:[%s2065_s0 + $0x28] sm:$0xff]  }
   0x5   :  { %1409 = vmatprep.mubr.msk.bf16.mxu0 %vm258_vm0, %v1479_v2  ;;  %1441 = vmatprep.mubr.msk.bf16.mxu1 %vm258_vm0, %v1480_v3  ;;  %v1488_v11 = vld [vmem:[%s2065_s0 + $0xa0] sm:$0xff]   ;;  %v1490_v13 = vld [vmem:[%s2065_s0 + $0xa8] sm:$0xff]   ;;  %v1491_v14 = vld [vmem:[%s2065_s0 + $0x30] sm:$0xff]  }
   0x6   :  { %v1492_v15 = vld [vmem:[%s2065_s0 + $0xb0] sm:$0xff]   ;;  %v1493_v16 = vld [vmem:[%s2065_s0 + $0x38] sm:$0xff]   ;;  %v1495_v18 = vld [vmem:[%s2065_s0 + $0x40] sm:$0xff]  }
   0x7   :  { %1408 = vmatpush3.bf16.msra.mxu0 %v1478_v1  ;;  %1476 = vmatpush3.bf16.msra.mxu1 %v1478_v1  ;;  %v1494_v17 = vld [vmem:[%s2065_s0 + $0xb8] sm:$0xff]   ;;  %v1496_v19 = vld [vmem:[%s2065_s0 + $0xc0] sm:$0xff]   ;;  %v1497_v20 = vld [vmem:[%s2065_s0 + $0x48] sm:$0xff]  }
   0x8   :  { %v1498_v21 = vld [vmem:[%s2065_s0 + $0xc8] sm:$0xff]   ;;  %v1499_v22 = vld [vmem:[%s2065_s0 + $0x50] sm:$0xff]   ;;  %v1501_v24 = vld [vmem:[%s2065_s0 + $0x58] sm:$0xff]  }
   0x9   :  { %v1500_v23 = vld [vmem:[%s2065_s0 + $0xd0] sm:$0xff]   ;;  %v1502_v25 = vld [vmem:[%s2065_s0 + $0xd8] sm:$0xff]   ;;  %v1503_v26 = vld [vmem:[%s2065_s0 + $0x60] sm:$0xff]  }
   0xa   :  { %1410 = vmatmul.mubr.msk.bf16.vlgmr.msra.gmra.mrb[0].mxu0 %vm258_vm0, %v1481_v4  ;;  %1442 = vmatmul.mubr.msk.bf16.vlgmr.msra.gmra.mrb[0].mxu1 %vm258_vm0, %v1482_v5  ;;  %v1504_v27 = vld [vmem:[%s2065_s0 + $0xe0] sm:$0xff]   ;;  %v1505_v28 = vld [vmem:[%s2065_s0 + $0x68] sm:$0xff]   ;;  %v1507_v30 = vld [vmem:[%s2065_s0 + $0x70] sm:$0xff]  }
   0xb   :  { %1413 = vmatprep.mubr.msk.bf16.mxu0 %vm258_vm0, %v1483_v6  ;;  %1445 = vmatprep.mubr.msk.bf16.mxu1 %vm258_vm0, %v1484_v7  ;;  %v1506_v29 = vld [vmem:[%s2065_s0 + $0xe8] sm:$0xff]   ;;  %v1508_v31 = vld [vmem:[%s2065_s0 + $0xf0] sm:$0xff]   ;;  %v1509_v32 = vld [vmem:[%s2065_s0 + $0x78] sm:$0xff]  }
   0xc   :  { %v1510_v33 = vld [vmem:[%s2065_s0 + $0xf8] sm:$0xff]   ;;  %v1673_v34 = vld [vmem:[%s2066_s2] ss:$0 sm:$0xff] }
   0xd   :  { %v1678_v36 = vld [vmem:[%s2067_s3] ss:$0 sm:$0xff] }
  0x12   :  { %1414 = vmatmul.mubr.msk.bf16.gmra.mrb[4].mxu0 %vm258_vm0, %v1485_v8  ;;  %1446 = vmatmul.mubr.msk.bf16.gmra.mrb[4].mxu1 %vm258_vm0, %v1486_v9 }
  0x13   :  { %1417 = vmatprep.mubr.msk.bf16.mxu0 %vm258_vm0, %v1487_v10  ;;  %1449 = vmatprep.mubr.msk.bf16.mxu1 %vm258_vm0, %v1488_v11 }
  0x1a   :  { %1418 = vmatmul.mubr.msk.bf16.gmra.mrb[8].mxu0 %vm258_vm0, %v1489_v12  ;;  %1450 = vmatmul.mubr.msk.bf16.gmra.mrb[8].mxu1 %vm258_vm0, %v1490_v13 }
  0x1b   :  { %1421 = vmatprep.mubr.msk.bf16.mxu0 %vm258_vm0, %v1491_v14  ;;  %1453 = vmatprep.mubr.msk.bf16.mxu1 %vm258_vm0, %v1492_v15 }
  0x22   :  { %1422 = vmatmul.mubr.msk.bf16.gmra.mrb[12].mxu0 %vm258_vm0, %v1493_v16  ;;  %1454 = vmatmul.mubr.msk.bf16.gmra.mrb[12].mxu1 %vm258_vm0, %v1494_v17 }
  0x23   :  { %1425 = vmatprep.mubr.msk.bf16.mxu0 %vm258_vm0, %v1495_v18  ;;  %1457 = vmatprep.mubr.msk.bf16.mxu1 %vm258_vm0, %v1496_v19 }
  0x2a   :  { %1426 = vmatmul.mubr.msk.bf16.gmra.mrb[16].mxu0 %vm258_vm0, %v1497_v20  ;;  %1458 = vmatmul.mubr.msk.bf16.gmra.mrb[16].mxu1 %vm258_vm0, %v1498_v21 }
  0x2b   :  { %1429 = vmatprep.mubr.msk.bf16.mxu0 %vm258_vm0, %v1499_v22  ;;  %1461 = vmatprep.mubr.msk.bf16.mxu1 %vm258_vm0, %v1500_v23 }
  0x32   :  { %1430 = vmatmul.mubr.msk.bf16.gmra.mrb[20].mxu0 %vm258_vm0, %v1501_v24  ;;  %1462 = vmatmul.mubr.msk.bf16.gmra.mrb[20].mxu1 %vm258_vm0, %v1502_v25 }
  0x33   :  { %1433 = vmatprep.mubr.msk.bf16.mxu0 %vm258_vm0, %v1503_v26  ;;  %1465 = vmatprep.mubr.msk.bf16.mxu1 %vm258_vm0, %v1504_v27 }
  0x3a   :  { %1434 = vmatmul.mubr.msk.bf16.gmra.mrb[24].mxu0 %vm258_vm0, %v1505_v28  ;;  %1466 = vmatmul.mubr.msk.bf16.gmra.mrb[24].mxu1 %vm258_vm0, %v1506_v29 }
  0x3b   :  { %1437 = vmatprep.mubr.msk.bf16.mxu0 %vm258_vm0, %v1507_v30  ;;  %1469 = vmatprep.mubr.msk.bf16.mxu1 %vm258_vm0, %v1508_v31 }
  0x42   :  { %1438 = vmatmul.mubr.msk.bf16.gmra.mrb[28].mxu0 %vm258_vm0, %v1509_v32  ;;  %1470 = vmatmul.mubr.msk.bf16.gmra.mrb[28].mxu1 %vm258_vm0, %v1510_v33 }
  0xdd   :  { %v1411_v35 = vpop.f32.mrb[0].mxu0  ;;  %v1443_v37 = vpop.f32.mrb[0].mxu1 }
  0xde   :  { %v653_v38 = vmul.f32 %v1411_v35, %v1673_v34  ;;  %v685_v39 = vmul.f32 %v1443_v37, %v1673_v34  ;;  %v389_v40 = vpop.f32.mrb[1].mxu0  ;;  %v517_v41 = vpop.f32.mrb[1].mxu1 }
  0xdf   :  { %v651_v42 = vmul.f32 %v1673_v34, %v389_v40  ;;  %v683_v43 = vmul.f32 %v1673_v34, %v517_v41  ;;  %v1412_v44 = vpop.f32.mrb[2].mxu0  ;;  %v1444_v45 = vpop.f32.mrb[2].mxu1 }
  0xe0   :  { %v724_v46 = vadd.f32 %v1678_v36, %v653_v38  ;;  %v756_v47 = vadd.f32 %v1678_v36, %v685_v39  ;;  %v654_v48 = vmul.f32 %v1412_v44, %v1673_v34  ;;  %v686_v49 = vmul.f32 %v1444_v45, %v1673_v34  ;;  %v392_v50 = vpop.f32.mrb[3].mxu0  ;;  %v520_v51 = vpop.f32.mrb[3].mxu1 }
  0xe1   :  { %v722_v52 = vadd.f32 %v1678_v36, %v651_v42  ;;  %v754_v53 = vadd.f32 %v1678_v36, %v683_v43  ;;  %v652_v54 = vmul.f32 %v1673_v34, %v392_v50  ;;  %v684_v55 = vmul.f32 %v1673_v34, %v520_v51 }
  0xe2   :  { %v788_v56 = vmax.f32 %v724_v46, 0.0  ;;  %v820_v57 = vmax.f32 %v756_v47, 0.0  ;;  %v725_v58 = vadd.f32 %v1678_v36, %v654_v48  ;;  %v757_v59 = vadd.f32 %v1678_v36, %v686_v49 }
  0xe3   :  { %v786_v60 = vmax.f32 %v722_v52, 0.0  ;;  %v818_v61 = vmax.f32 %v754_v53, 0.0  ;;  %v723_v62 = vadd.f32 %v1678_v36, %v652_v54  ;;  %v755_v63 = vadd.f32 %v1678_v36, %v684_v55 }
  0xe4   :  { %v1309_v0 = vpack.c.bf16 %v788_v56, %v788_v56  ;;  %v1341_v1 = vpack.c.bf16 %v820_v57, %v820_v57  ;;  %v789_v2 = vmax.f32 %v725_v58, 0.0  ;;  %v821_v3 = vmax.f32 %v757_v59, 0.0 }
  0xe5   :  { %v1307_v4 = vpack.c.bf16 %v786_v60, %v786_v60  ;;  %v1339_v5 = vpack.c.bf16 %v818_v61, %v818_v61  ;;  %v787_v6 = vmax.f32 %v723_v62, 0.0  ;;  %v819_v7 = vmax.f32 %v755_v63, 0.0  ;;  %v1415_v8 = vpop.f32.mrb[4].mxu0  ;;  %v1447_v9 = vpop.f32.mrb[4].mxu1 }
  0xe6   :  { %1109 = vst.msk [vmem:[%s2068_s4 + $0x8] sm:$0xf] %vm1106_vm1, %v1309_v0  ;;  %1141 = vst.msk [vmem:[%s2068_s4 + $0x88] sm:$0xf] %vm1106_vm1, %v1341_v1  ;;  %v1310_v10 = vpack.c.bf16 %v789_v2, %v789_v2  ;;  %v1342_v11 = vpack.c.bf16 %v821_v3, %v821_v3  ;;  %v657_v12 = vmul.f32 %v1415_v8, %v1673_v34  ;;  %v405_v14 = vpop.f32.mrb[5].mxu0  ;;  %v533_v15 = vpop.f32.mrb[5].mxu1 }
  0xe7   :  { %v689_v13 = vmul.f32 %v1447_v9, %v1673_v34  ;;  %1107 = vst.msk [vmem:[%s2068_s4] sm:$0xf] %vm1106_vm1, %v1307_v4  ;;  %1139 = vst.msk [vmem:[%s2068_s4 + $0x80] sm:$0xf] %vm1106_vm1, %v1339_v5  ;;  %v1308_v16 = vpack.c.bf16 %v787_v6, %v787_v6  ;;  %v1340_v17 = vpack.c.bf16 %v819_v7, %v819_v7  ;;  %v1416_v20 = vpop.f32.mrb[6].mxu0  ;;  %v1448_v21 = vpop.f32.mrb[6].mxu1 }
  0xe8   :  { %v655_v18 = vmul.f32 %v1673_v34, %v405_v14  ;;  %v687_v19 = vmul.f32 %v1673_v34, %v533_v15  ;;  %1110 = vst.msk [vmem:[%s2068_s4 + $0xc] sm:$0xf] %vm1106_vm1, %v1310_v10  ;;  %1142 = vst.msk [vmem:[%s2068_s4 + $0x8c] sm:$0xf] %vm1106_vm1, %v1342_v11  ;;  %v728_v22 = vadd.f32 %v1678_v36, %v657_v12  ;;  %v408_v26 = vpop.f32.mrb[7].mxu0  ;;  %v536_v27 = vpop.f32.mrb[7].mxu1 }
  0xe9   :  { %v760_v23 = vadd.f32 %v1678_v36, %v689_v13  ;;  %v658_v24 = vmul.f32 %v1416_v20, %v1673_v34  ;;  %v690_v25 = vmul.f32 %v1448_v21, %v1673_v34  ;;  %1108 = vst.msk [vmem:[%s2068_s4 + $0x4] sm:$0xf] %vm1106_vm1, %v1308_v16  ;;  %1140 = vst.msk [vmem:[%s2068_s4 + $0x84] sm:$0xf] %vm1106_vm1, %v1340_v17 }
  0xea   :  { %v726_v28 = vadd.f32 %v1678_v36, %v655_v18  ;;  %v758_v29 = vadd.f32 %v1678_v36, %v687_v19  ;;  %v656_v30 = vmul.f32 %v1673_v34, %v408_v26  ;;  %v688_v31 = vmul.f32 %v1673_v34, %v536_v27 }
  0xeb   :  { %v792_v32 = vmax.f32 %v728_v22, 0.0  ;;  %v824_v33 = vmax.f32 %v760_v23, 0.0  ;;  %v729_v35 = vadd.f32 %v1678_v36, %v658_v24  ;;  %v761_v37 = vadd.f32 %v1678_v36, %v690_v25 }
  0xec   :  { %v790_v38 = vmax.f32 %v726_v28, 0.0  ;;  %v822_v39 = vmax.f32 %v758_v29, 0.0  ;;  %v727_v40 = vadd.f32 %v1678_v36, %v656_v30  ;;  %v759_v41 = vadd.f32 %v1678_v36, %v688_v31 }
  0xed   :  { %v1313_v42 = vpack.c.bf16 %v792_v32, %v792_v32  ;;  %v1345_v43 = vpack.c.bf16 %v824_v33, %v824_v33  ;;  %v793_v44 = vmax.f32 %v729_v35, 0.0  ;;  %v825_v45 = vmax.f32 %v761_v37, 0.0  ;;  %v1419_v50 = vpop.f32.mrb[8].mxu0  ;;  %v1451_v51 = vpop.f32.mrb[8].mxu1 }
  0xee   :  { %v1311_v46 = vpack.c.bf16 %v790_v38, %v790_v38  ;;  %v1343_v47 = vpack.c.bf16 %v822_v39, %v822_v39  ;;  %v791_v48 = vmax.f32 %v727_v40, 0.0  ;;  %v823_v49 = vmax.f32 %v759_v41, 0.0  ;;  %v421_v56 = vpop.f32.mrb[9].mxu0  ;;  %v549_v57 = vpop.f32.mrb[9].mxu1 }
  0xef   :  { %1113 = vst.msk [vmem:[%s2068_s4 + $0x18] sm:$0xf] %vm1106_vm1, %v1313_v42  ;;  %1145 = vst.msk [vmem:[%s2068_s4 + $0x98] sm:$0xf] %vm1106_vm1, %v1345_v43  ;;  %v1314_v52 = vpack.c.bf16 %v793_v44, %v793_v44  ;;  %v1346_v53 = vpack.c.bf16 %v825_v45, %v825_v45  ;;  %v661_v54 = vmul.f32 %v1419_v50, %v1673_v34  ;;  %v1420_v62 = vpop.f32.mrb[10].mxu0  ;;  %v1452_v63 = vpop.f32.mrb[10].mxu1 }
  0xf0   :  { %v693_v55 = vmul.f32 %v1451_v51, %v1673_v34  ;;  %1111 = vst.msk [vmem:[%s2068_s4 + $0x10] sm:$0xf] %vm1106_vm1, %v1311_v46  ;;  %1143 = vst.msk [vmem:[%s2068_s4 + $0x90] sm:$0xf] %vm1106_vm1, %v1343_v47  ;;  %v1312_v58 = vpack.c.bf16 %v791_v48, %v791_v48  ;;  %v1344_v59 = vpack.c.bf16 %v823_v49, %v823_v49  ;;  %v424_v4 = vpop.f32.mrb[11].mxu0  ;;  %v552_v5 = vpop.f32.mrb[11].mxu1 }
  0xf1   :  { %v659_v60 = vmul.f32 %v1673_v34, %v421_v56  ;;  %v691_v61 = vmul.f32 %v1673_v34, %v549_v57  ;;  %1114 = vst.msk [vmem:[%s2068_s4 + $0x1c] sm:$0xf] %vm1106_vm1, %v1314_v52  ;;  %1146 = vst.msk [vmem:[%s2068_s4 + $0x9c] sm:$0xf] %vm1106_vm1, %v1346_v53  ;;  %v732_v0 = vadd.f32 %v1678_v36, %v661_v54 }
  0xf2   :  { %v764_v1 = vadd.f32 %v1678_v36, %v693_v55  ;;  %v662_v2 = vmul.f32 %v1420_v62, %v1673_v34  ;;  %v694_v3 = vmul.f32 %v1452_v63, %v1673_v34  ;;  %1112 = vst.msk [vmem:[%s2068_s4 + $0x14] sm:$0xf] %vm1106_vm1, %v1312_v58  ;;  %1144 = vst.msk [vmem:[%s2068_s4 + $0x94] sm:$0xf] %vm1106_vm1, %v1344_v59 }
  0xf3   :  { %v730_v6 = vadd.f32 %v1678_v36, %v659_v60  ;;  %v762_v7 = vadd.f32 %v1678_v36, %v691_v61  ;;  %v660_v8 = vmul.f32 %v1673_v34, %v424_v4  ;;  %v692_v9 = vmul.f32 %v1673_v34, %v552_v5 }
  0xf4   :  { %v796_v10 = vmax.f32 %v732_v0, 0.0  ;;  %v828_v11 = vmax.f32 %v764_v1, 0.0  ;;  %v733_v12 = vadd.f32 %v1678_v36, %v662_v2  ;;  %v765_v13 = vadd.f32 %v1678_v36, %v694_v3 }
  0xf5   :  { %v794_v14 = vmax.f32 %v730_v6, 0.0  ;;  %v826_v15 = vmax.f32 %v762_v7, 0.0  ;;  %v731_v16 = vadd.f32 %v1678_v36, %v660_v8  ;;  %v763_v17 = vadd.f32 %v1678_v36, %v692_v9  ;;  %v1423_v26 = vpop.f32.mrb[12].mxu0  ;;  %v1455_v27 = vpop.f32.mrb[12].mxu1 }
  0xf6   :  { %v1317_v18 = vpack.c.bf16 %v796_v10, %v796_v10  ;;  %v1349_v19 = vpack.c.bf16 %v828_v11, %v828_v11  ;;  %v797_v20 = vmax.f32 %v733_v12, 0.0  ;;  %v829_v21 = vmax.f32 %v765_v13, 0.0  ;;  %v437_v32 = vpop.f32.mrb[13].mxu0  ;;  %v565_v33 = vpop.f32.mrb[13].mxu1 }
  0xf7   :  { %v1315_v22 = vpack.c.bf16 %v794_v14, %v794_v14  ;;  %v1347_v23 = vpack.c.bf16 %v826_v15, %v826_v15  ;;  %v795_v24 = vmax.f32 %v731_v16, 0.0  ;;  %v827_v25 = vmax.f32 %v763_v17, 0.0  ;;  %v1424_v40 = vpop.f32.mrb[14].mxu0  ;;  %v1456_v41 = vpop.f32.mrb[14].mxu1 }
  0xf8   :  { %1117 = vst.msk [vmem:[%s2068_s4 + $0x28] sm:$0xf] %vm1106_vm1, %v1317_v18  ;;  %1149 = vst.msk [vmem:[%s2068_s4 + $0xa8] sm:$0xf] %vm1106_vm1, %v1349_v19  ;;  %v1318_v28 = vpack.c.bf16 %v797_v20, %v797_v20  ;;  %v1350_v29 = vpack.c.bf16 %v829_v21, %v829_v21  ;;  %v665_v30 = vmul.f32 %v1423_v26, %v1673_v34  ;;  %v440_v46 = vpop.f32.mrb[15].mxu0  ;;  %v568_v47 = vpop.f32.mrb[15].mxu1 }
  0xf9   :  { %v697_v31 = vmul.f32 %v1455_v27, %v1673_v34  ;;  %1115 = vst.msk [vmem:[%s2068_s4 + $0x20] sm:$0xf] %vm1106_vm1, %v1315_v22  ;;  %1147 = vst.msk [vmem:[%s2068_s4 + $0xa0] sm:$0xf] %vm1106_vm1, %v1347_v23  ;;  %v1316_v35 = vpack.c.bf16 %v795_v24, %v795_v24  ;;  %v1348_v37 = vpack.c.bf16 %v827_v25, %v827_v25 }
  0xfa   :  { %v663_v38 = vmul.f32 %v1673_v34, %v437_v32  ;;  %v695_v39 = vmul.f32 %v1673_v34, %v565_v33  ;;  %1118 = vst.msk [vmem:[%s2068_s4 + $0x2c] sm:$0xf] %vm1106_vm1, %v1318_v28  ;;  %1150 = vst.msk [vmem:[%s2068_s4 + $0xac] sm:$0xf] %vm1106_vm1, %v1350_v29  ;;  %v736_v42 = vadd.f32 %v1678_v36, %v665_v30 }
  0xfb   :  { %v768_v43 = vadd.f32 %v1678_v36, %v697_v31  ;;  %v666_v44 = vmul.f32 %v1424_v40, %v1673_v34  ;;  %v698_v45 = vmul.f32 %v1456_v41, %v1673_v34  ;;  %1116 = vst.msk [vmem:[%s2068_s4 + $0x24] sm:$0xf] %vm1106_vm1, %v1316_v35  ;;  %1148 = vst.msk [vmem:[%s2068_s4 + $0xa4] sm:$0xf] %vm1106_vm1, %v1348_v37 }
  0xfc   :  { %v734_v48 = vadd.f32 %v1678_v36, %v663_v38  ;;  %v766_v49 = vadd.f32 %v1678_v36, %v695_v39  ;;  %v664_v50 = vmul.f32 %v1673_v34, %v440_v46  ;;  %v696_v51 = vmul.f32 %v1673_v34, %v568_v47 }
  0xfd   :  { %v800_v52 = vmax.f32 %v736_v42, 0.0  ;;  %v832_v53 = vmax.f32 %v768_v43, 0.0  ;;  %v737_v54 = vadd.f32 %v1678_v36, %v666_v44  ;;  %v769_v55 = vadd.f32 %v1678_v36, %v698_v45  ;;  %v1427_v4 = vpop.f32.mrb[16].mxu0  ;;  %v1459_v5 = vpop.f32.mrb[16].mxu1 }
  0xfe   :  { %v798_v56 = vmax.f32 %v734_v48, 0.0  ;;  %v830_v57 = vmax.f32 %v766_v49, 0.0  ;;  %v735_v58 = vadd.f32 %v1678_v36, %v664_v50  ;;  %v767_v59 = vadd.f32 %v1678_v36, %v696_v51  ;;  %v453_v10 = vpop.f32.mrb[17].mxu0  ;;  %v581_v11 = vpop.f32.mrb[17].mxu1 }
  0xff   :  { %v1321_v60 = vpack.c.bf16 %v800_v52, %v800_v52  ;;  %v1353_v61 = vpack.c.bf16 %v832_v53, %v832_v53  ;;  %v801_v62 = vmax.f32 %v737_v54, 0.0  ;;  %v833_v63 = vmax.f32 %v769_v55, 0.0  ;;  %v1428_v16 = vpop.f32.mrb[18].mxu0  ;;  %v1460_v17 = vpop.f32.mrb[18].mxu1 }
 0x100   :  { %v1319_v0 = vpack.c.bf16 %v798_v56, %v798_v56  ;;  %v1351_v1 = vpack.c.bf16 %v830_v57, %v830_v57  ;;  %v799_v2 = vmax.f32 %v735_v58, 0.0  ;;  %v831_v3 = vmax.f32 %v767_v59, 0.0  ;;  %v456_v22 = vpop.f32.mrb[19].mxu0  ;;  %v584_v23 = vpop.f32.mrb[19].mxu1 }
 0x101   :  { %1121 = vst.msk [vmem:[%s2068_s4 + $0x38] sm:$0xf] %vm1106_vm1, %v1321_v60  ;;  %1153 = vst.msk [vmem:[%s2068_s4 + $0xb8] sm:$0xf] %vm1106_vm1, %v1353_v61  ;;  %v1322_v6 = vpack.c.bf16 %v801_v62, %v801_v62  ;;  %v1354_v7 = vpack.c.bf16 %v833_v63, %v833_v63  ;;  %v669_v8 = vmul.f32 %v1427_v4, %v1673_v34 }
 0x102   :  { %v701_v9 = vmul.f32 %v1459_v5, %v1673_v34  ;;  %1119 = vst.msk [vmem:[%s2068_s4 + $0x30] sm:$0xf] %vm1106_vm1, %v1319_v0  ;;  %1151 = vst.msk [vmem:[%s2068_s4 + $0xb0] sm:$0xf] %vm1106_vm1, %v1351_v1  ;;  %v1320_v12 = vpack.c.bf16 %v799_v2, %v799_v2  ;;  %v1352_v13 = vpack.c.bf16 %v831_v3, %v831_v3 }
 0x103   :  { %v667_v14 = vmul.f32 %v1673_v34, %v453_v10  ;;  %v699_v15 = vmul.f32 %v1673_v34, %v581_v11  ;;  %1122 = vst.msk [vmem:[%s2068_s4 + $0x3c] sm:$0xf] %vm1106_vm1, %v1322_v6  ;;  %1154 = vst.msk [vmem:[%s2068_s4 + $0xbc] sm:$0xf] %vm1106_vm1, %v1354_v7  ;;  %v740_v18 = vadd.f32 %v1678_v36, %v669_v8 }
 0x104   :  { %v772_v19 = vadd.f32 %v1678_v36, %v701_v9  ;;  %v670_v20 = vmul.f32 %v1428_v16, %v1673_v34  ;;  %v702_v21 = vmul.f32 %v1460_v17, %v1673_v34  ;;  %1120 = vst.msk [vmem:[%s2068_s4 + $0x34] sm:$0xf] %vm1106_vm1, %v1320_v12  ;;  %1152 = vst.msk [vmem:[%s2068_s4 + $0xb4] sm:$0xf] %vm1106_vm1, %v1352_v13 }
 0x105   :  { %v738_v24 = vadd.f32 %v1678_v36, %v667_v14  ;;  %v770_v25 = vadd.f32 %v1678_v36, %v699_v15  ;;  %v668_v26 = vmul.f32 %v1673_v34, %v456_v22  ;;  %v700_v27 = vmul.f32 %v1673_v34, %v584_v23  ;;  %v1431_v46 = vpop.f32.mrb[20].mxu0  ;;  %v1463_v47 = vpop.f32.mrb[20].mxu1 }
 0x106   :  { %v804_v28 = vmax.f32 %v740_v18, 0.0  ;;  %v836_v29 = vmax.f32 %v772_v19, 0.0  ;;  %v741_v30 = vadd.f32 %v1678_v36, %v670_v20  ;;  %v773_v31 = vadd.f32 %v1678_v36, %v702_v21  ;;  %v469_v52 = vpop.f32.mrb[21].mxu0  ;;  %v597_v53 = vpop.f32.mrb[21].mxu1 }
 0x107   :  { %v802_v32 = vmax.f32 %v738_v24, 0.0  ;;  %v834_v33 = vmax.f32 %v770_v25, 0.0  ;;  %v739_v35 = vadd.f32 %v1678_v36, %v668_v26  ;;  %v771_v37 = vadd.f32 %v1678_v36, %v700_v27  ;;  %v1432_v58 = vpop.f32.mrb[22].mxu0  ;;  %v1464_v59 = vpop.f32.mrb[22].mxu1 }
 0x108   :  { %v1325_v38 = vpack.c.bf16 %v804_v28, %v804_v28  ;;  %v1357_v39 = vpack.c.bf16 %v836_v29, %v836_v29  ;;  %v805_v40 = vmax.f32 %v741_v30, 0.0  ;;  %v837_v41 = vmax.f32 %v773_v31, 0.0  ;;  %v472_v0 = vpop.f32.mrb[23].mxu0  ;;  %v600_v1 = vpop.f32.mrb[23].mxu1 }
 0x109   :  { %v1323_v42 = vpack.c.bf16 %v802_v32, %v802_v32  ;;  %v1355_v43 = vpack.c.bf16 %v834_v33, %v834_v33  ;;  %v803_v44 = vmax.f32 %v739_v35, 0.0  ;;  %v835_v45 = vmax.f32 %v771_v37, 0.0 }
 0x10a   :  { %1125 = vst.msk [vmem:[%s2068_s4 + $0x48] sm:$0xf] %vm1106_vm1, %v1325_v38  ;;  %1157 = vst.msk [vmem:[%s2068_s4 + $0xc8] sm:$0xf] %vm1106_vm1, %v1357_v39  ;;  %v1326_v48 = vpack.c.bf16 %v805_v40, %v805_v40  ;;  %v1358_v49 = vpack.c.bf16 %v837_v41, %v837_v41  ;;  %v673_v50 = vmul.f32 %v1431_v46, %v1673_v34 }
 0x10b   :  { %v705_v51 = vmul.f32 %v1463_v47, %v1673_v34  ;;  %1123 = vst.msk [vmem:[%s2068_s4 + $0x40] sm:$0xf] %vm1106_vm1, %v1323_v42  ;;  %1155 = vst.msk [vmem:[%s2068_s4 + $0xc0] sm:$0xf] %vm1106_vm1, %v1355_v43  ;;  %v1324_v54 = vpack.c.bf16 %v803_v44, %v803_v44  ;;  %v1356_v55 = vpack.c.bf16 %v835_v45, %v835_v45 }
 0x10c   :  { %v671_v56 = vmul.f32 %v1673_v34, %v469_v52  ;;  %v703_v57 = vmul.f32 %v1673_v34, %v597_v53  ;;  %1126 = vst.msk [vmem:[%s2068_s4 + $0x4c] sm:$0xf] %vm1106_vm1, %v1326_v48  ;;  %1158 = vst.msk [vmem:[%s2068_s4 + $0xcc] sm:$0xf] %vm1106_vm1, %v1358_v49  ;;  %v744_v60 = vadd.f32 %v1678_v36, %v673_v50 }
 0x10d   :  { %v776_v61 = vadd.f32 %v1678_v36, %v705_v51  ;;  %v674_v62 = vmul.f32 %v1432_v58, %v1673_v34  ;;  %v706_v63 = vmul.f32 %v1464_v59, %v1673_v34  ;;  %1124 = vst.msk [vmem:[%s2068_s4 + $0x44] sm:$0xf] %vm1106_vm1, %v1324_v54  ;;  %1156 = vst.msk [vmem:[%s2068_s4 + $0xc4] sm:$0xf] %vm1106_vm1, %v1356_v55  ;;  %v1435_v22 = vpop.f32.mrb[24].mxu0  ;;  %v1467_v23 = vpop.f32.mrb[24].mxu1 }
 0x10e   :  { %v742_v2 = vadd.f32 %v1678_v36, %v671_v56  ;;  %v774_v3 = vadd.f32 %v1678_v36, %v703_v57  ;;  %v672_v4 = vmul.f32 %v1673_v34, %v472_v0  ;;  %v704_v5 = vmul.f32 %v1673_v34, %v600_v1  ;;  %v485_v28 = vpop.f32.mrb[25].mxu0  ;;  %v613_v29 = vpop.f32.mrb[25].mxu1 }
 0x10f   :  { %v808_v6 = vmax.f32 %v744_v60, 0.0  ;;  %v840_v7 = vmax.f32 %v776_v61, 0.0  ;;  %v745_v8 = vadd.f32 %v1678_v36, %v674_v62  ;;  %v777_v9 = vadd.f32 %v1678_v36, %v706_v63  ;;  %v1436_v35 = vpop.f32.mrb[26].mxu0  ;;  %v1468_v37 = vpop.f32.mrb[26].mxu1 }
 0x110   :  { %v806_v10 = vmax.f32 %v742_v2, 0.0  ;;  %v838_v11 = vmax.f32 %v774_v3, 0.0  ;;  %v743_v12 = vadd.f32 %v1678_v36, %v672_v4  ;;  %v775_v13 = vadd.f32 %v1678_v36, %v704_v5  ;;  %v488_v42 = vpop.f32.mrb[27].mxu0  ;;  %v616_v43 = vpop.f32.mrb[27].mxu1 }
 0x111   :  { %v1329_v14 = vpack.c.bf16 %v808_v6, %v808_v6  ;;  %v1361_v15 = vpack.c.bf16 %v840_v7, %v840_v7  ;;  %v809_v16 = vmax.f32 %v745_v8, 0.0  ;;  %v841_v17 = vmax.f32 %v777_v9, 0.0 }
 0x112   :  { %v1327_v18 = vpack.c.bf16 %v806_v10, %v806_v10  ;;  %v1359_v19 = vpack.c.bf16 %v838_v11, %v838_v11  ;;  %v807_v20 = vmax.f32 %v743_v12, 0.0  ;;  %v839_v21 = vmax.f32 %v775_v13, 0.0 }
 0x113   :  { %1129 = vst.msk [vmem:[%s2068_s4 + $0x58] sm:$0xf] %vm1106_vm1, %v1329_v14  ;;  %1161 = vst.msk [vmem:[%s2068_s4 + $0xd8] sm:$0xf] %vm1106_vm1, %v1361_v15  ;;  %v1330_v24 = vpack.c.bf16 %v809_v16, %v809_v16  ;;  %v1362_v25 = vpack.c.bf16 %v841_v17, %v841_v17  ;;  %v677_v26 = vmul.f32 %v1435_v22, %v1673_v34 }
 0x114   :  { %v709_v27 = vmul.f32 %v1467_v23, %v1673_v34  ;;  %1127 = vst.msk [vmem:[%s2068_s4 + $0x50] sm:$0xf] %vm1106_vm1, %v1327_v18  ;;  %1159 = vst.msk [vmem:[%s2068_s4 + $0xd0] sm:$0xf] %vm1106_vm1, %v1359_v19  ;;  %v1328_v30 = vpack.c.bf16 %v807_v20, %v807_v20  ;;  %v1360_v31 = vpack.c.bf16 %v839_v21, %v839_v21 }
 0x115   :  { %v675_v32 = vmul.f32 %v1673_v34, %v485_v28  ;;  %v707_v33 = vmul.f32 %v1673_v34, %v613_v29  ;;  %1130 = vst.msk [vmem:[%s2068_s4 + $0x5c] sm:$0xf] %vm1106_vm1, %v1330_v24  ;;  %1162 = vst.msk [vmem:[%s2068_s4 + $0xdc] sm:$0xf] %vm1106_vm1, %v1362_v25  ;;  %v748_v38 = vadd.f32 %v1678_v36, %v677_v26  ;;  %v1439_v0 = vpop.f32.mrb[28].mxu0  ;;  %v1471_v1 = vpop.f32.mrb[28].mxu1 }
 0x116   :  { %v780_v39 = vadd.f32 %v1678_v36, %v709_v27  ;;  %v678_v40 = vmul.f32 %v1436_v35, %v1673_v34  ;;  %v710_v41 = vmul.f32 %v1468_v37, %v1673_v34  ;;  %1128 = vst.msk [vmem:[%s2068_s4 + $0x54] sm:$0xf] %vm1106_vm1, %v1328_v30  ;;  %1160 = vst.msk [vmem:[%s2068_s4 + $0xd4] sm:$0xf] %vm1106_vm1, %v1360_v31  ;;  %v501_v6 = vpop.f32.mrb[29].mxu0  ;;  %v629_v7 = vpop.f32.mrb[29].mxu1 }
 0x117   :  { %v746_v44 = vadd.f32 %v1678_v36, %v675_v32  ;;  %v778_v45 = vadd.f32 %v1678_v36, %v707_v33  ;;  %v676_v46 = vmul.f32 %v1673_v34, %v488_v42  ;;  %v708_v47 = vmul.f32 %v1673_v34, %v616_v43  ;;  %v1440_v12 = vpop.f32.mrb[30].mxu0  ;;  %v1472_v13 = vpop.f32.mrb[30].mxu1 }
 0x118   :  { %v812_v48 = vmax.f32 %v748_v38, 0.0  ;;  %v844_v49 = vmax.f32 %v780_v39, 0.0  ;;  %v749_v50 = vadd.f32 %v1678_v36, %v678_v40  ;;  %v781_v51 = vadd.f32 %v1678_v36, %v710_v41  ;;  %v504_v18 = vpop.f32.mrb[31].mxu0  ;;  %v632_v19 = vpop.f32.mrb[31].mxu1 }
 0x119   :  { %v810_v52 = vmax.f32 %v746_v44, 0.0  ;;  %v842_v53 = vmax.f32 %v778_v45, 0.0  ;;  %v747_v54 = vadd.f32 %v1678_v36, %v676_v46  ;;  %v779_v55 = vadd.f32 %v1678_v36, %v708_v47 }
 0x11a   :  { %v1333_v56 = vpack.c.bf16 %v812_v48, %v812_v48  ;;  %v1365_v57 = vpack.c.bf16 %v844_v49, %v844_v49  ;;  %v813_v58 = vmax.f32 %v749_v50, 0.0  ;;  %v845_v59 = vmax.f32 %v781_v51, 0.0 }
 0x11b   :  { %v1331_v60 = vpack.c.bf16 %v810_v52, %v810_v52  ;;  %v1363_v61 = vpack.c.bf16 %v842_v53, %v842_v53  ;;  %v811_v62 = vmax.f32 %v747_v54, 0.0  ;;  %v843_v63 = vmax.f32 %v779_v55, 0.0 }
 0x11c   :  { %1133 = vst.msk [vmem:[%s2068_s4 + $0x68] sm:$0xf] %vm1106_vm1, %v1333_v56  ;;  %1165 = vst.msk [vmem:[%s2068_s4 + $0xe8] sm:$0xf] %vm1106_vm1, %v1365_v57  ;;  %v1334_v2 = vpack.c.bf16 %v813_v58, %v813_v58  ;;  %v1366_v3 = vpack.c.bf16 %v845_v59, %v845_v59  ;;  %v681_v4 = vmul.f32 %v1439_v0, %v1673_v34 }
 0x11d   :  { %v713_v5 = vmul.f32 %v1471_v1, %v1673_v34  ;;  %1131 = vst.msk [vmem:[%s2068_s4 + $0x60] sm:$0xf] %vm1106_vm1, %v1331_v60  ;;  %1163 = vst.msk [vmem:[%s2068_s4 + $0xe0] sm:$0xf] %vm1106_vm1, %v1363_v61  ;;  %v1332_v8 = vpack.c.bf16 %v811_v62, %v811_v62  ;;  %v1364_v9 = vpack.c.bf16 %v843_v63, %v843_v63 }
 0x11e   :  { %v679_v10 = vmul.f32 %v1673_v34, %v501_v6  ;;  %v711_v11 = vmul.f32 %v1673_v34, %v629_v7  ;;  %1134 = vst.msk [vmem:[%s2068_s4 + $0x6c] sm:$0xf] %vm1106_vm1, %v1334_v2  ;;  %1166 = vst.msk [vmem:[%s2068_s4 + $0xec] sm:$0xf] %vm1106_vm1, %v1366_v3  ;;  %v752_v14 = vadd.f32 %v1678_v36, %v681_v4 }
 0x11f   :  { %v784_v15 = vadd.f32 %v1678_v36, %v713_v5  ;;  %v682_v16 = vmul.f32 %v1440_v12, %v1673_v34  ;;  %v714_v17 = vmul.f32 %v1472_v13, %v1673_v34  ;;  %1132 = vst.msk [vmem:[%s2068_s4 + $0x64] sm:$0xf] %vm1106_vm1, %v1332_v8  ;;  %1164 = vst.msk [vmem:[%s2068_s4 + $0xe4] sm:$0xf] %vm1106_vm1, %v1364_v9 }
 0x120   :  { %v750_v20 = vadd.f32 %v1678_v36, %v679_v10  ;;  %v782_v21 = vadd.f32 %v1678_v36, %v711_v11  ;;  %v680_v22 = vmul.f32 %v1673_v34, %v504_v18  ;;  %v712_v23 = vmul.f32 %v1673_v34, %v632_v19 }
 0x121   :  { %v816_v24 = vmax.f32 %v752_v14, 0.0  ;;  %v848_v25 = vmax.f32 %v784_v15, 0.0  ;;  %v753_v26 = vadd.f32 %v1678_v36, %v682_v16  ;;  %v785_v27 = vadd.f32 %v1678_v36, %v714_v17 }
 0x122   :  { %v814_v28 = vmax.f32 %v750_v20, 0.0  ;;  %v846_v29 = vmax.f32 %v782_v21, 0.0  ;;  %v751_v30 = vadd.f32 %v1678_v36, %v680_v22  ;;  %v783_v31 = vadd.f32 %v1678_v36, %v712_v23 }
 0x123   :  { %v1337_v32 = vpack.c.bf16 %v816_v24, %v816_v24  ;;  %v1369_v33 = vpack.c.bf16 %v848_v25, %v848_v25  ;;  %v817_v35 = vmax.f32 %v753_v26, 0.0  ;;  %v849_v37 = vmax.f32 %v785_v27, 0.0 }
 0x124   :  { %v1335_v38 = vpack.c.bf16 %v814_v28, %v814_v28  ;;  %v1367_v39 = vpack.c.bf16 %v846_v29, %v846_v29  ;;  %v815_v40 = vmax.f32 %v751_v30, 0.0  ;;  %v847_v34 = vmax.f32 %v783_v31, 0.0 }
 0x125   :  { %1137 = vst.msk [vmem:[%s2068_s4 + $0x78] sm:$0xf] %vm1106_vm1, %v1337_v32  ;;  %1169 = vst.msk [vmem:[%s2068_s4 + $0xf8] sm:$0xf] %vm1106_vm1, %v1369_v33  ;;  %v1338_v41 = vpack.c.bf16 %v817_v35, %v817_v35  ;;  %v1370_v36 = vpack.c.bf16 %v849_v37, %v849_v37 }
 0x126   :  { %1135 = vst.msk [vmem:[%s2068_s4 + $0x70] sm:$0xf] %vm1106_vm1, %v1335_v38  ;;  %1167 = vst.msk [vmem:[%s2068_s4 + $0xf0] sm:$0xf] %vm1106_vm1, %v1367_v39  ;;  %v1336_v42 = vpack.c.bf16 %v815_v40, %v815_v40  ;;  %v1368_v43 = vpack.c.bf16 %v847_v34, %v847_v34 }
 0x127   :  { %1138 = vst.msk [vmem:[%s2068_s4 + $0x7c] sm:$0xf] %vm1106_vm1, %v1338_v41  ;;  %1170 = vst.msk [vmem:[%s2068_s4 + $0xfc] sm:$0xf] %vm1106_vm1, %v1370_v36 }
 0x128   :  { %1136 = vst.msk [vmem:[%s2068_s4 + $0x74] sm:$0xf] %vm1106_vm1, %v1336_v42  ;;  %1168 = vst.msk [vmem:[%s2068_s4 + $0xf4] sm:$0xf] %vm1106_vm1, %v1368_v43 }

// kernel: _lambda_.14
= control target key start
LH: loop header
LB: loop body
LE: loop exit
PB: predicated region body
PF: predicated region fallthrough
CT: control target
= control target key end

     0   :  { %vm287_vm0 = vcmask 588800   ;;  %vm384_vm1 = vcmask 1043456   ;;  %vm916_vm2 = vcmask 64512   ;;  %vm1767_vm3 = vcmask 125952   ;;  %s3072_s1 = inlined_call_operand.vmem [shape: bf16[72,8], index: 1, kind: input, shape index: {}]   ;;  %s3073_s0 = inlined_call_operand.vmem [shape: bf16[512,72], index: 0, kind: input, shape index: {}]   ;;  %s3074_s4 = inlined_call_operand.vmem [shape: bf16[8,16], index: 4, kind: input, shape index: {}]   ;;  %s3075_s2 = inlined_call_operand.vmem [shape: f32[1,8], index: 2, kind: input, shape index: {}]   ;;  %s3076_s3 = inlined_call_operand.vmem [shape: f32[1,8], index: 3, kind: input, shape index: {}]   ;;  %s3077_s5 = inlined_call_operand.vmem [shape: f32[1,16], index: 5, kind: input, shape index: {}]   ;;  %s3078_s6 = inlined_call_operand.vmem [shape: f32[1,16], index: 6, kind: input, shape index: {}]   ;;  %s3079_s7 = inlined_call_operand.vmem [shape: bf16[512,16], index: 7, kind: output, shape index: {}]  }
   0x1   :  { %v2281_v0 = vld [vmem:[%s3072_s1] sm:$0xff]   ;;  %v2282_v1 = vld [vmem:[%s3072_s1 + $0x8] sm:$0xff]   ;;  %v2283_v2 = vld [vmem:[%s3072_s1 + $0x10] sm:$0xff]  }
   0x2   :  { %2139 = vmatprep.subr.bf16.mxu0 %v2281_v0  ;;  %v2286_v3 = vld [vmem:[%s3073_s0] sm:$0xff]   ;;  %v2284_v4 = vld [vmem:[%s3072_s1 + $0x18] sm:$0xff]   ;;  %v2287_v7 = vld [vmem:[%s3073_s0 + $0x8] sm:$0xff]  }
   0x3   :  { %2140 = vmatpush3.bf16.msra.mxu0 %v2281_v0  ;;  %2149 = vmatprep.mubr.msk.bf16.mxu0 %vm287_vm0, %v2286_v3  ;;  %v2285_v5 = vld [vmem:[%s3072_s1 + $0x20] ss:$0 sps:$4 sm:$0xff]   ;;  %v2288_v8 = vld [vmem:[%s3073_s0 + $0x10] sm:$0xff]   ;;  %v2289_v9 = vld [vmem:[%s3073_s0 + $0x18] sm:$0xff]  }
   0x4   :  { %2141 = vmatprep.subr.bf16.mxu0 %v2282_v1  ;;  %v386_v6 = vsel %vm384_vm1, %v2285_v5, 0  ;;  %v2290_v10 = vld [vmem:[%s3073_s0 + $0x20] sm:$0xff]   ;;  %v2291_v11 = vld [vmem:[%s3073_s0 + $0x28] sm:$0xff]   ;;  %v2292_v12 = vld [vmem:[%s3073_s0 + $0x30] sm:$0xff]  }
   0x5   :  { %v2293_v13 = vld [vmem:[%s3073_s0 + $0x38] sm:$0xff]   ;;  %v2294_v14 = vld [vmem:[%s3073_s0 + $0x40] sm:$0xff]   ;;  %v2295_v15 = vld [vmem:[%s3073_s0 + $0x48] sm:$0xff]  }
   0x6   :  { %v2296_v16 = vld [vmem:[%s3073_s0 + $0x50] sm:$0xff]   ;;  %v2297_v17 = vld [vmem:[%s3073_s0 + $0x58] sm:$0xff]   ;;  %v2298_v18 = vld [vmem:[%s3073_s0 + $0x60] sm:$0xff]  }
   0x7   :  { %2142 = vmatpush3.bf16.msra.mxu0 %v2282_v1  ;;  %v2299_v19 = vld [vmem:[%s3073_s0 + $0x68] sm:$0xff]   ;;  %v2300_v20 = vld [vmem:[%s3073_s0 + $0x70] sm:$0xff]   ;;  %v2301_v21 = vld [vmem:[%s3073_s0 + $0x78] sm:$0xff]  }
   0x8   :  { %2143 = vmatprep.subr.bf16.mxu0 %v2283_v2  ;;  %v2302_v22 = vld [vmem:[%s3073_s0 + $0x80] sm:$0xff]   ;;  %v2303_v23 = vld [vmem:[%s3073_s0 + $0x88] sm:$0xff]   ;;  %v2304_v24 = vld [vmem:[%s3073_s0 + $0x90] sm:$0xff]  }
   0x9   :  { %v2305_v25 = vld [vmem:[%s3073_s0 + $0x98] sm:$0xff]   ;;  %v2306_v26 = vld [vmem:[%s3073_s0 + $0xa0] sm:$0xff]   ;;  %v2307_v27 = vld [vmem:[%s3073_s0 + $0xa8] sm:$0xff]  }
   0xa   :  { %v2308_v28 = vld [vmem:[%s3073_s0 + $0xb0] sm:$0xff]   ;;  %v2309_v29 = vld [vmem:[%s3073_s0 + $0xb8] sm:$0xff]   ;;  %v2310_v30 = vld [vmem:[%s3073_s0 + $0xc0] sm:$0xff]  }
   0xb   :  { %2144 = vmatpush3.bf16.msra.mxu0 %v2283_v2  ;;  %v915_v31 = vld [vmem:[%s3074_s4] sm:$0xf]  ;;  %v2311_v32 = vld [vmem:[%s3073_s0 + $0xc8] sm:$0xff]   ;;  %v2312_v34 = vld [vmem:[%s3073_s0 + $0xd0] sm:$0xff]  }
   0xc   :  { %2145 = vmatprep.subr.bf16.mxu0 %v2284_v4  ;;  %2280 = vmatprep.subr.msk.bf16.mxu1 %vm384_vm1, %v915_v31  ;;  %v1014_v33 = vsel %vm384_vm1, %v915_v31, 0  ;;  %v2313_v35 = vld [vmem:[%s3073_s0 + $0xd8] sm:$0xff]   ;;  %v2314_v36 = vld [vmem:[%s3073_s0 + $0xe0] sm:$0xff]   ;;  %v2315_v37 = vld [vmem:[%s3073_s0 + $0xe8] sm:$0xff]  }
   0xd   :  { %2214 = vmatpush3.bf16.msra.mxu1 %v1014_v33  ;;  %v2316_v38 = vld [vmem:[%s3073_s0 + $0xf0] sm:$0xff]   ;;  %v2317_v39 = vld [vmem:[%s3073_s0 + $0xf8] sm:$0xff]   ;;  %v2511_v40 = vld [vmem:[%s3075_s2] ss:$0 sm:$0xff] }
   0xe   :  { %v2516_v42 = vld [vmem:[%s3076_s3] ss:$0 sm:$0xff] }
   0xf   :  { %2146 = vmatpush3.bf16.msra.mxu0 %v2284_v4 }
  0x10   :  { %2279 = vmatprep.subr.msk.bf16.mxu0 %vm384_vm1, %v2285_v5 }
  0x13   :  { %2148 = vmatpush3.bf16.msra.mxu0 %v386_v6 }
  0x16   :  { %2150 = vmatmul.mubr.msk.bf16.vlgmr.msra.gmra.mrb[0].mxu0 %vm287_vm0, %v2287_v7 }
  0x17   :  { %2153 = vmatprep.mubr.msk.bf16.mxu0 %vm287_vm0, %v2288_v8 }
  0x1e   :  { %2154 = vmatmul.mubr.msk.bf16.gmra.mrb[4].mxu0 %vm287_vm0, %v2289_v9 }
  0x1f   :  { %2157 = vmatprep.mubr.msk.bf16.mxu0 %vm287_vm0, %v2290_v10 }
  0x26   :  { %2158 = vmatmul.mubr.msk.bf16.gmra.mrb[8].mxu0 %vm287_vm0, %v2291_v11 }
  0x27   :  { %2161 = vmatprep.mubr.msk.bf16.mxu0 %vm287_vm0, %v2292_v12 }
  0x2e   :  { %2162 = vmatmul.mubr.msk.bf16.gmra.mrb[12].mxu0 %vm287_vm0, %v2293_v13 }
  0x2f   :  { %2165 = vmatprep.mubr.msk.bf16.mxu0 %vm287_vm0, %v2294_v14 }
  0x36   :  { %2166 = vmatmul.mubr.msk.bf16.gmra.mrb[16].mxu0 %vm287_vm0, %v2295_v15 }
  0x37   :  { %2169 = vmatprep.mubr.msk.bf16.mxu0 %vm287_vm0, %v2296_v16 }
  0x3e   :  { %2170 = vmatmul.mubr.msk.bf16.gmra.mrb[20].mxu0 %vm287_vm0, %v2297_v17 }
  0x3f   :  { %2173 = vmatprep.mubr.msk.bf16.mxu0 %vm287_vm0, %v2298_v18 }
  0x46   :  { %2174 = vmatmul.mubr.msk.bf16.gmra.mrb[24].mxu0 %vm287_vm0, %v2299_v19 }
  0x47   :  { %2177 = vmatprep.mubr.msk.bf16.mxu0 %vm287_vm0, %v2300_v20 }
  0x4e   :  { %2178 = vmatmul.mubr.msk.bf16.gmra.mrb[28].mxu0 %vm287_vm0, %v2301_v21 }
  0x4f   :  { %2181 = vmatprep.mubr.msk.bf16.mxu0 %vm287_vm0, %v2302_v22 }
  0x56   :  { %2182 = vmatmul.mubr.msk.bf16.gmra.mrb[32].mxu0 %vm287_vm0, %v2303_v23 }
  0x57   :  { %2185 = vmatprep.mubr.msk.bf16.mxu0 %vm287_vm0, %v2304_v24 }
  0x5e   :  { %2186 = vmatmul.mubr.msk.bf16.gmra.mrb[36].mxu0 %vm287_vm0, %v2305_v25 }
  0x5f   :  { %2189 = vmatprep.mubr.msk.bf16.mxu0 %vm287_vm0, %v2306_v26 }
  0x66   :  { %2190 = vmatmul.mubr.msk.bf16.gmra.mrb[40].mxu0 %vm287_vm0, %v2307_v27 }
  0x67   :  { %2193 = vmatprep.mubr.msk.bf16.mxu0 %vm287_vm0, %v2308_v28 }
  0x6e   :  { %2194 = vmatmul.mubr.msk.bf16.gmra.mrb[44].mxu0 %vm287_vm0, %v2309_v29 }
  0x6f   :  { %2197 = vmatprep.mubr.msk.bf16.mxu0 %vm287_vm0, %v2310_v30 }
  0x76   :  { %2198 = vmatmul.mubr.msk.bf16.gmra.mrb[48].mxu0 %vm287_vm0, %v2311_v32 }
  0x77   :  { %2201 = vmatprep.mubr.msk.bf16.mxu0 %vm287_vm0, %v2312_v34 }
  0x7e   :  { %2202 = vmatmul.mubr.msk.bf16.gmra.mrb[52].mxu0 %vm287_vm0, %v2313_v35 }
  0x7f   :  { %2205 = vmatprep.mubr.msk.bf16.mxu0 %vm287_vm0, %v2314_v36 }
  0x86   :  { %2206 = vmatmul.mubr.msk.bf16.gmra.mrb[56].mxu0 %vm287_vm0, %v2315_v37 }
  0x87   :  { %2209 = vmatprep.mubr.msk.bf16.mxu0 %vm287_vm0, %v2316_v38 }
  0x8e   :  { %2210 = vmatmul.mubr.msk.bf16.gmra.mrb[60].mxu0 %vm287_vm0, %v2317_v39 }
  0xe9   :  { %v2151_v41 = vpop.f32.mrb[0].mxu0 }
  0xea   :  { %v686_v43 = vmul.f32 %v2151_v41, %v2511_v40  ;;  %v422_v44 = vpop.f32.mrb[1].mxu0 }
  0xeb   :  { %v684_v45 = vmul.f32 %v2511_v40, %v422_v44  ;;  %v2152_v46 = vpop.f32.mrb[2].mxu0 }
  0xec   :  { %v757_v47 = vadd.f32 %v2516_v42, %v686_v43  ;;  %v687_v48 = vmul.f32 %v2152_v46, %v2511_v40  ;;  %v425_v49 = vpop.f32.mrb[3].mxu0 }
  0xed   :  { %v755_v50 = vadd.f32 %v2516_v42, %v684_v45  ;;  %v685_v51 = vmul.f32 %v2511_v40, %v425_v49 }
  0xee   :  { %v758_v52 = vadd.f32 %v2516_v42, %v687_v48  ;;  %v821_v54 = vmax.f32 %v757_v47, 0.0 }
  0xef   :  { %v756_v53 = vadd.f32 %v2516_v42, %v685_v51  ;;  %v819_v56 = vmax.f32 %v755_v50, 0.0 }
  0xf0   :  { %v822_v55 = vmax.f32 %v758_v52, 0.0 }
  0xf1   :  { %v820_v57 = vmax.f32 %v756_v53, 0.0  ;;  %v2155_v58 = vpop.f32.mrb[4].mxu0 }
  0xf2   :  { %v884_v59 = vpack.c.bf16 %v822_v55, %v821_v54  ;;  %v690_v60 = vmul.f32 %v2155_v58, %v2511_v40  ;;  %v438_v61 = vpop.f32.mrb[5].mxu0 }
  0xf3   :  { %v688_v62 = vmul.f32 %v2511_v40, %v438_v61  ;;  %v2156_v63 = vpop.f32.mrb[6].mxu0  ;;  %v883_v0 = vpack.c.bf16 %v820_v57, %v819_v56 }
  0xf4   :  { %v761_v1 = vadd.f32 %v2516_v42, %v690_v60  ;;  %v691_v2 = vmul.f32 %v2156_v63, %v2511_v40  ;;  %v441_v3 = vpop.f32.mrb[7].mxu0 }
  0xf5   :  { %v759_v4 = vadd.f32 %v2516_v42, %v688_v62  ;;  %v689_v5 = vmul.f32 %v2511_v40, %v441_v3  ;;  %2215 = vmatprep.mubr.msk.bf16.mxu1 %vm916_vm2, %v883_v0 }
  0xf6   :  { %v762_v6 = vadd.f32 %v2516_v42, %v691_v2  ;;  %2216 = vmatmul.mubr.msk.bf16.vlgmr.msra.gmra.mrb[0].mxu1 %vm916_vm2, %v884_v59  ;;  %v825_v8 = vmax.f32 %v761_v1, 0.0 }
  0xf7   :  { %v760_v7 = vadd.f32 %v2516_v42, %v689_v5  ;;  %v823_v10 = vmax.f32 %v759_v4, 0.0 }
  0xf8   :  { %v826_v9 = vmax.f32 %v762_v6, 0.0 }
  0xf9   :  { %v824_v11 = vmax.f32 %v760_v7, 0.0  ;;  %v2159_v12 = vpop.f32.mrb[8].mxu0 }
  0xfa   :  { %v886_v13 = vpack.c.bf16 %v826_v9, %v825_v8  ;;  %v694_v14 = vmul.f32 %v2159_v12, %v2511_v40  ;;  %v454_v15 = vpop.f32.mrb[9].mxu0 }
  0xfb   :  { %v885_v16 = vpack.c.bf16 %v824_v11, %v823_v10  ;;  %v692_v17 = vmul.f32 %v2511_v40, %v454_v15  ;;  %v2160_v18 = vpop.f32.mrb[10].mxu0 }
  0xfc   :  { %v765_v19 = vadd.f32 %v2516_v42, %v694_v14  ;;  %v695_v20 = vmul.f32 %v2160_v18, %v2511_v40  ;;  %v457_v21 = vpop.f32.mrb[11].mxu0 }
  0xfd   :  { %v763_v22 = vadd.f32 %v2516_v42, %v692_v17  ;;  %v693_v23 = vmul.f32 %v2511_v40, %v457_v21  ;;  %2219 = vmatprep.mubr.msk.bf16.mxu1 %vm916_vm2, %v885_v16 }
  0xfe   :  { %v766_v24 = vadd.f32 %v2516_v42, %v695_v20  ;;  %2220 = vmatmul.mubr.msk.bf16.gmra.mrb[4].mxu1 %vm916_vm2, %v886_v13  ;;  %v829_v26 = vmax.f32 %v765_v19, 0.0 }
  0xff   :  { %v764_v25 = vadd.f32 %v2516_v42, %v693_v23  ;;  %v827_v28 = vmax.f32 %v763_v22, 0.0 }
 0x100   :  { %v830_v27 = vmax.f32 %v766_v24, 0.0 }
 0x101   :  { %v828_v29 = vmax.f32 %v764_v25, 0.0  ;;  %v2163_v30 = vpop.f32.mrb[12].mxu0 }
 0x102   :  { %v888_v31 = vpack.c.bf16 %v830_v27, %v829_v26  ;;  %v698_v32 = vmul.f32 %v2163_v30, %v2511_v40  ;;  %v470_v33 = vpop.f32.mrb[13].mxu0 }
 0x103   :  { %v887_v34 = vpack.c.bf16 %v828_v29, %v827_v28  ;;  %v696_v35 = vmul.f32 %v2511_v40, %v470_v33  ;;  %v2164_v36 = vpop.f32.mrb[14].mxu0 }
 0x104   :  { %v769_v37 = vadd.f32 %v2516_v42, %v698_v32  ;;  %v699_v38 = vmul.f32 %v2164_v36, %v2511_v40  ;;  %v473_v39 = vpop.f32.mrb[15].mxu0 }
 0x105   :  { %v767_v41 = vadd.f32 %v2516_v42, %v696_v35  ;;  %v697_v43 = vmul.f32 %v2511_v40, %v473_v39  ;;  %2223 = vmatprep.mubr.msk.bf16.mxu1 %vm916_vm2, %v887_v34 }
 0x106   :  { %v770_v44 = vadd.f32 %v2516_v42, %v699_v38  ;;  %2224 = vmatmul.mubr.msk.bf16.gmra.mrb[8].mxu1 %vm916_vm2, %v888_v31  ;;  %v833_v46 = vmax.f32 %v769_v37, 0.0 }
 0x107   :  { %v768_v45 = vadd.f32 %v2516_v42, %v697_v43  ;;  %v831_v48 = vmax.f32 %v767_v41, 0.0 }
 0x108   :  { %v834_v47 = vmax.f32 %v770_v44, 0.0 }
 0x109   :  { %v832_v49 = vmax.f32 %v768_v45, 0.0  ;;  %v2167_v50 = vpop.f32.mrb[16].mxu0 }
 0x10a   :  { %v890_v51 = vpack.c.bf16 %v834_v47, %v833_v46  ;;  %v702_v52 = vmul.f32 %v2167_v50, %v2511_v40  ;;  %v486_v53 = vpop.f32.mrb[17].mxu0 }
 0x10b   :  { %v889_v54 = vpack.c.bf16 %v832_v49, %v831_v48  ;;  %v700_v55 = vmul.f32 %v2511_v40, %v486_v53  ;;  %v2168_v56 = vpop.f32.mrb[18].mxu0 }
 0x10c   :  { %v773_v57 = vadd.f32 %v2516_v42, %v702_v52  ;;  %v703_v58 = vmul.f32 %v2168_v56, %v2511_v40  ;;  %v489_v59 = vpop.f32.mrb[19].mxu0 }
 0x10d   :  { %v771_v60 = vadd.f32 %v2516_v42, %v700_v55  ;;  %v701_v61 = vmul.f32 %v2511_v40, %v489_v59  ;;  %2227 = vmatprep.mubr.msk.bf16.mxu1 %vm916_vm2, %v889_v54 }
 0x10e   :  { %v774_v62 = vadd.f32 %v2516_v42, %v703_v58  ;;  %2228 = vmatmul.mubr.msk.bf16.gmra.mrb[12].mxu1 %vm916_vm2, %v890_v51  ;;  %v837_v0 = vmax.f32 %v773_v57, 0.0 }
 0x10f   :  { %v772_v63 = vadd.f32 %v2516_v42, %v701_v61  ;;  %v835_v2 = vmax.f32 %v771_v60, 0.0 }
 0x110   :  { %v838_v1 = vmax.f32 %v774_v62, 0.0 }
 0x111   :  { %v836_v3 = vmax.f32 %v772_v63, 0.0  ;;  %v2171_v4 = vpop.f32.mrb[20].mxu0 }
 0x112   :  { %v892_v5 = vpack.c.bf16 %v838_v1, %v837_v0  ;;  %v706_v6 = vmul.f32 %v2171_v4, %v2511_v40  ;;  %v502_v7 = vpop.f32.mrb[21].mxu0 }
 0x113   :  { %v891_v8 = vpack.c.bf16 %v836_v3, %v835_v2  ;;  %v704_v9 = vmul.f32 %v2511_v40, %v502_v7  ;;  %v2172_v10 = vpop.f32.mrb[22].mxu0 }
 0x114   :  { %v777_v11 = vadd.f32 %v2516_v42, %v706_v6  ;;  %v707_v12 = vmul.f32 %v2172_v10, %v2511_v40  ;;  %v505_v13 = vpop.f32.mrb[23].mxu0 }
 0x115   :  { %v775_v14 = vadd.f32 %v2516_v42, %v704_v9  ;;  %v705_v15 = vmul.f32 %v2511_v40, %v505_v13  ;;  %2231 = vmatprep.mubr.msk.bf16.mxu1 %vm916_vm2, %v891_v8 }
 0x116   :  { %v778_v16 = vadd.f32 %v2516_v42, %v707_v12  ;;  %2232 = vmatmul.mubr.msk.bf16.gmra.mrb[16].mxu1 %vm916_vm2, %v892_v5  ;;  %v841_v18 = vmax.f32 %v777_v11, 0.0 }
 0x117   :  { %v776_v17 = vadd.f32 %v2516_v42, %v705_v15  ;;  %v839_v20 = vmax.f32 %v775_v14, 0.0 }
 0x118   :  { %v842_v19 = vmax.f32 %v778_v16, 0.0 }
 0x119   :  { %v840_v21 = vmax.f32 %v776_v17, 0.0  ;;  %v2175_v22 = vpop.f32.mrb[24].mxu0 }
 0x11a   :  { %v894_v23 = vpack.c.bf16 %v842_v19, %v841_v18  ;;  %v710_v24 = vmul.f32 %v2175_v22, %v2511_v40  ;;  %v518_v25 = vpop.f32.mrb[25].mxu0 }
 0x11b   :  { %v893_v26 = vpack.c.bf16 %v840_v21, %v839_v20  ;;  %v708_v27 = vmul.f32 %v2511_v40, %v518_v25  ;;  %v2176_v28 = vpop.f32.mrb[26].mxu0 }
 0x11c   :  { %v781_v29 = vadd.f32 %v2516_v42, %v710_v24  ;;  %v711_v30 = vmul.f32 %v2176_v28, %v2511_v40  ;;  %v521_v31 = vpop.f32.mrb[27].mxu0 }
 0x11d   :  { %v779_v32 = vadd.f32 %v2516_v42, %v708_v27  ;;  %v709_v33 = vmul.f32 %v2511_v40, %v521_v31  ;;  %2235 = vmatprep.mubr.msk.bf16.mxu1 %vm916_vm2, %v893_v26 }
 0x11e   :  { %v782_v34 = vadd.f32 %v2516_v42, %v711_v30  ;;  %2236 = vmatmul.mubr.msk.bf16.gmra.mrb[20].mxu1 %vm916_vm2, %v894_v23  ;;  %v845_v36 = vmax.f32 %v781_v29, 0.0 }
 0x11f   :  { %v780_v35 = vadd.f32 %v2516_v42, %v709_v33  ;;  %v843_v38 = vmax.f32 %v779_v32, 0.0 }
 0x120   :  { %v846_v37 = vmax.f32 %v782_v34, 0.0 }
 0x121   :  { %v844_v39 = vmax.f32 %v780_v35, 0.0  ;;  %v2179_v41 = vpop.f32.mrb[28].mxu0 }
 0x122   :  { %v896_v43 = vpack.c.bf16 %v846_v37, %v845_v36  ;;  %v714_v44 = vmul.f32 %v2179_v41, %v2511_v40  ;;  %v534_v45 = vpop.f32.mrb[29].mxu0 }
 0x123   :  { %v895_v46 = vpack.c.bf16 %v844_v39, %v843_v38  ;;  %v712_v47 = vmul.f32 %v2511_v40, %v534_v45  ;;  %v2180_v48 = vpop.f32.mrb[30].mxu0 }
 0x124   :  { %v785_v49 = vadd.f32 %v2516_v42, %v714_v44  ;;  %v715_v50 = vmul.f32 %v2180_v48, %v2511_v40  ;;  %v537_v51 = vpop.f32.mrb[31].mxu0 }
 0x125   :  { %v783_v52 = vadd.f32 %v2516_v42, %v712_v47  ;;  %v713_v53 = vmul.f32 %v2511_v40, %v537_v51  ;;  %2239 = vmatprep.mubr.msk.bf16.mxu1 %vm916_vm2, %v895_v46 }
 0x126   :  { %v786_v54 = vadd.f32 %v2516_v42, %v715_v50  ;;  %2240 = vmatmul.mubr.msk.bf16.gmra.mrb[24].mxu1 %vm916_vm2, %v896_v43  ;;  %v849_v56 = vmax.f32 %v785_v49, 0.0 }
 0x127   :  { %v784_v55 = vadd.f32 %v2516_v42, %v713_v53  ;;  %v847_v58 = vmax.f32 %v783_v52, 0.0 }
 0x128   :  { %v850_v57 = vmax.f32 %v786_v54, 0.0 }
 0x129   :  { %v848_v59 = vmax.f32 %v784_v55, 0.0  ;;  %v2183_v60 = vpop.f32.mrb[32].mxu0 }
 0x12a   :  { %v898_v61 = vpack.c.bf16 %v850_v57, %v849_v56  ;;  %v718_v62 = vmul.f32 %v2183_v60, %v2511_v40  ;;  %v550_v63 = vpop.f32.mrb[33].mxu0 }
 0x12b   :  { %v897_v0 = vpack.c.bf16 %v848_v59, %v847_v58  ;;  %v716_v1 = vmul.f32 %v2511_v40, %v550_v63  ;;  %v2184_v2 = vpop.f32.mrb[34].mxu0 }
 0x12c   :  { %v789_v3 = vadd.f32 %v2516_v42, %v718_v62  ;;  %v719_v4 = vmul.f32 %v2184_v2, %v2511_v40  ;;  %v553_v5 = vpop.f32.mrb[35].mxu0 }
 0x12d   :  { %v787_v6 = vadd.f32 %v2516_v42, %v716_v1  ;;  %v717_v7 = vmul.f32 %v2511_v40, %v553_v5  ;;  %2243 = vmatprep.mubr.msk.bf16.mxu1 %vm916_vm2, %v897_v0 }
 0x12e   :  { %v790_v8 = vadd.f32 %v2516_v42, %v719_v4  ;;  %2244 = vmatmul.mubr.msk.bf16.gmra.mrb[28].mxu1 %vm916_vm2, %v898_v61  ;;  %v853_v10 = vmax.f32 %v789_v3, 0.0 }
 0x12f   :  { %v788_v9 = vadd.f32 %v2516_v42, %v717_v7  ;;  %v851_v12 = vmax.f32 %v787_v6, 0.0 }
 0x130   :  { %v854_v11 = vmax.f32 %v790_v8, 0.0 }
 0x131   :  { %v852_v13 = vmax.f32 %v788_v9, 0.0  ;;  %v2187_v14 = vpop.f32.mrb[36].mxu0 }
 0x132   :  { %v900_v15 = vpack.c.bf16 %v854_v11, %v853_v10  ;;  %v722_v16 = vmul.f32 %v2187_v14, %v2511_v40  ;;  %v566_v17 = vpop.f32.mrb[37].mxu0 }
 0x133   :  { %v899_v18 = vpack.c.bf16 %v852_v13, %v851_v12  ;;  %v720_v19 = vmul.f32 %v2511_v40, %v566_v17  ;;  %v2188_v20 = vpop.f32.mrb[38].mxu0 }
 0x134   :  { %v793_v21 = vadd.f32 %v2516_v42, %v722_v16  ;;  %v723_v22 = vmul.f32 %v2188_v20, %v2511_v40  ;;  %v569_v23 = vpop.f32.mrb[39].mxu0 }
 0x135   :  { %v791_v24 = vadd.f32 %v2516_v42, %v720_v19  ;;  %v721_v25 = vmul.f32 %v2511_v40, %v569_v23  ;;  %2247 = vmatprep.mubr.msk.bf16.mxu1 %vm916_vm2, %v899_v18 }
 0x136   :  { %v794_v26 = vadd.f32 %v2516_v42, %v723_v22  ;;  %2248 = vmatmul.mubr.msk.bf16.gmra.mrb[32].mxu1 %vm916_vm2, %v900_v15  ;;  %v857_v28 = vmax.f32 %v793_v21, 0.0 }
 0x137   :  { %v792_v27 = vadd.f32 %v2516_v42, %v721_v25  ;;  %v855_v30 = vmax.f32 %v791_v24, 0.0 }
 0x138   :  { %v858_v29 = vmax.f32 %v794_v26, 0.0 }
 0x139   :  { %v856_v31 = vmax.f32 %v792_v27, 0.0  ;;  %v2191_v32 = vpop.f32.mrb[40].mxu0 }
 0x13a   :  { %v902_v33 = vpack.c.bf16 %v858_v29, %v857_v28  ;;  %v726_v34 = vmul.f32 %v2191_v32, %v2511_v40  ;;  %v582_v35 = vpop.f32.mrb[41].mxu0 }
 0x13b   :  { %v901_v36 = vpack.c.bf16 %v856_v31, %v855_v30  ;;  %v724_v37 = vmul.f32 %v2511_v40, %v582_v35  ;;  %v2192_v38 = vpop.f32.mrb[42].mxu0 }
 0x13c   :  { %v797_v39 = vadd.f32 %v2516_v42, %v726_v34  ;;  %v727_v41 = vmul.f32 %v2192_v38, %v2511_v40  ;;  %v585_v43 = vpop.f32.mrb[43].mxu0 }
 0x13d   :  { %v795_v44 = vadd.f32 %v2516_v42, %v724_v37  ;;  %v725_v45 = vmul.f32 %v2511_v40, %v585_v43  ;;  %2251 = vmatprep.mubr.msk.bf16.mxu1 %vm916_vm2, %v901_v36 }
 0x13e   :  { %v798_v46 = vadd.f32 %v2516_v42, %v727_v41  ;;  %2252 = vmatmul.mubr.msk.bf16.gmra.mrb[36].mxu1 %vm916_vm2, %v902_v33  ;;  %v861_v48 = vmax.f32 %v797_v39, 0.0 }
 0x13f   :  { %v796_v47 = vadd.f32 %v2516_v42, %v725_v45  ;;  %v859_v50 = vmax.f32 %v795_v44, 0.0 }
 0x140   :  { %v862_v49 = vmax.f32 %v798_v46, 0.0 }
 0x141   :  { %v860_v51 = vmax.f32 %v796_v47, 0.0  ;;  %v2195_v52 = vpop.f32.mrb[44].mxu0 }
 0x142   :  { %v904_v53 = vpack.c.bf16 %v862_v49, %v861_v48  ;;  %v730_v54 = vmul.f32 %v2195_v52, %v2511_v40  ;;  %v598_v55 = vpop.f32.mrb[45].mxu0 }
 0x143   :  { %v903_v56 = vpack.c.bf16 %v860_v51, %v859_v50  ;;  %v728_v57 = vmul.f32 %v2511_v40, %v598_v55  ;;  %v2196_v58 = vpop.f32.mrb[46].mxu0 }
 0x144   :  { %v801_v59 = vadd.f32 %v2516_v42, %v730_v54  ;;  %v731_v60 = vmul.f32 %v2196_v58, %v2511_v40  ;;  %v601_v61 = vpop.f32.mrb[47].mxu0 }
 0x145   :  { %v799_v62 = vadd.f32 %v2516_v42, %v728_v57  ;;  %v729_v63 = vmul.f32 %v2511_v40, %v601_v61  ;;  %2255 = vmatprep.mubr.msk.bf16.mxu1 %vm916_vm2, %v903_v56 }
 0x146   :  { %v802_v0 = vadd.f32 %v2516_v42, %v731_v60  ;;  %2256 = vmatmul.mubr.msk.bf16.gmra.mrb[40].mxu1 %vm916_vm2, %v904_v53  ;;  %v865_v2 = vmax.f32 %v801_v59, 0.0 }
 0x147   :  { %v800_v1 = vadd.f32 %v2516_v42, %v729_v63  ;;  %v863_v4 = vmax.f32 %v799_v62, 0.0 }
 0x148   :  { %v866_v3 = vmax.f32 %v802_v0, 0.0 }
 0x149   :  { %v864_v5 = vmax.f32 %v800_v1, 0.0  ;;  %v2199_v6 = vpop.f32.mrb[48].mxu0 }
 0x14a   :  { %v906_v7 = vpack.c.bf16 %v866_v3, %v865_v2  ;;  %v734_v8 = vmul.f32 %v2199_v6, %v2511_v40  ;;  %v614_v9 = vpop.f32.mrb[49].mxu0 }
 0x14b   :  { %v905_v10 = vpack.c.bf16 %v864_v5, %v863_v4  ;;  %v732_v11 = vmul.f32 %v2511_v40, %v614_v9  ;;  %v2200_v12 = vpop.f32.mrb[50].mxu0 }
 0x14c   :  { %v805_v13 = vadd.f32 %v2516_v42, %v734_v8  ;;  %v735_v14 = vmul.f32 %v2200_v12, %v2511_v40  ;;  %v617_v15 = vpop.f32.mrb[51].mxu0 }
 0x14d   :  { %v803_v16 = vadd.f32 %v2516_v42, %v732_v11  ;;  %v733_v17 = vmul.f32 %v2511_v40, %v617_v15  ;;  %2259 = vmatprep.mubr.msk.bf16.mxu1 %vm916_vm2, %v905_v10 }
 0x14e   :  { %v806_v18 = vadd.f32 %v2516_v42, %v735_v14  ;;  %2260 = vmatmul.mubr.msk.bf16.gmra.mrb[44].mxu1 %vm916_vm2, %v906_v7  ;;  %v869_v20 = vmax.f32 %v805_v13, 0.0 }
 0x14f   :  { %v804_v19 = vadd.f32 %v2516_v42, %v733_v17  ;;  %v867_v22 = vmax.f32 %v803_v16, 0.0 }
 0x150   :  { %v870_v21 = vmax.f32 %v806_v18, 0.0 }
 0x151   :  { %v868_v23 = vmax.f32 %v804_v19, 0.0  ;;  %v2203_v24 = vpop.f32.mrb[52].mxu0 }
 0x152   :  { %v908_v25 = vpack.c.bf16 %v870_v21, %v869_v20  ;;  %v738_v26 = vmul.f32 %v2203_v24, %v2511_v40  ;;  %v630_v27 = vpop.f32.mrb[53].mxu0 }
 0x153   :  { %v907_v28 = vpack.c.bf16 %v868_v23, %v867_v22  ;;  %v736_v29 = vmul.f32 %v2511_v40, %v630_v27  ;;  %v2204_v30 = vpop.f32.mrb[54].mxu0 }
 0x154   :  { %v809_v31 = vadd.f32 %v2516_v42, %v738_v26  ;;  %v739_v32 = vmul.f32 %v2204_v30, %v2511_v40  ;;  %v633_v33 = vpop.f32.mrb[55].mxu0 }
 0x155   :  { %v807_v34 = vadd.f32 %v2516_v42, %v736_v29  ;;  %v737_v35 = vmul.f32 %v2511_v40, %v633_v33  ;;  %2263 = vmatprep.mubr.msk.bf16.mxu1 %vm916_vm2, %v907_v28 }
 0x156   :  { %v810_v36 = vadd.f32 %v2516_v42, %v739_v32  ;;  %2264 = vmatmul.mubr.msk.bf16.gmra.mrb[48].mxu1 %vm916_vm2, %v908_v25  ;;  %v873_v38 = vmax.f32 %v809_v31, 0.0 }
 0x157   :  { %v808_v37 = vadd.f32 %v2516_v42, %v737_v35  ;;  %v871_v41 = vmax.f32 %v807_v34, 0.0 }
 0x158   :  { %v874_v39 = vmax.f32 %v810_v36, 0.0 }
 0x159   :  { %v872_v43 = vmax.f32 %v808_v37, 0.0  ;;  %v2207_v44 = vpop.f32.mrb[56].mxu0 }
 0x15a   :  { %v910_v45 = vpack.c.bf16 %v874_v39, %v873_v38  ;;  %v742_v46 = vmul.f32 %v2207_v44, %v2511_v40  ;;  %v646_v47 = vpop.f32.mrb[57].mxu0 }
 0x15b   :  { %v909_v48 = vpack.c.bf16 %v872_v43, %v871_v41  ;;  %v740_v49 = vmul.f32 %v2511_v40, %v646_v47  ;;  %v2208_v50 = vpop.f32.mrb[58].mxu0 }
 0x15c   :  { %v813_v51 = vadd.f32 %v2516_v42, %v742_v46  ;;  %v743_v52 = vmul.f32 %v2208_v50, %v2511_v40  ;;  %v649_v53 = vpop.f32.mrb[59].mxu0 }
 0x15d   :  { %v811_v54 = vadd.f32 %v2516_v42, %v740_v49  ;;  %v741_v55 = vmul.f32 %v2511_v40, %v649_v53  ;;  %2267 = vmatprep.mubr.msk.bf16.mxu1 %vm916_vm2, %v909_v48 }
 0x15e   :  { %v814_v56 = vadd.f32 %v2516_v42, %v743_v52  ;;  %2268 = vmatmul.mubr.msk.bf16.gmra.mrb[52].mxu1 %vm916_vm2, %v910_v45  ;;  %v877_v58 = vmax.f32 %v813_v51, 0.0 }
 0x15f   :  { %v812_v57 = vadd.f32 %v2516_v42, %v741_v55  ;;  %v875_v60 = vmax.f32 %v811_v54, 0.0 }
 0x160   :  { %v878_v59 = vmax.f32 %v814_v56, 0.0 }
 0x161   :  { %v876_v61 = vmax.f32 %v812_v57, 0.0  ;;  %v2211_v62 = vpop.f32.mrb[60].mxu0 }
 0x162   :  { %v912_v63 = vpack.c.bf16 %v878_v59, %v877_v58  ;;  %v746_v0 = vmul.f32 %v2211_v62, %v2511_v40  ;;  %v662_v1 = vpop.f32.mrb[61].mxu0 }
 0x163   :  { %v911_v2 = vpack.c.bf16 %v876_v61, %v875_v60  ;;  %v744_v3 = vmul.f32 %v2511_v40, %v662_v1  ;;  %v2212_v4 = vpop.f32.mrb[62].mxu0 }
 0x164   :  { %v817_v5 = vadd.f32 %v2516_v42, %v746_v0  ;;  %v747_v6 = vmul.f32 %v2212_v4, %v2511_v40  ;;  %v665_v7 = vpop.f32.mrb[63].mxu0 }
 0x165   :  { %v815_v8 = vadd.f32 %v2516_v42, %v744_v3  ;;  %v745_v9 = vmul.f32 %v2511_v40, %v665_v7  ;;  %2271 = vmatprep.mubr.msk.bf16.mxu1 %vm916_vm2, %v911_v2  ;;  %v2681_v40 = vld [vmem:[%s3077_s5] ss:$0 sm:$0xff] }
 0x166   :  { %v818_v10 = vadd.f32 %v2516_v42, %v747_v6  ;;  %2272 = vmatmul.mubr.msk.bf16.gmra.mrb[56].mxu1 %vm916_vm2, %v912_v63  ;;  %v881_v12 = vmax.f32 %v817_v5, 0.0 }
 0x167   :  { %v816_v11 = vadd.f32 %v2516_v42, %v745_v9  ;;  %v879_v14 = vmax.f32 %v815_v8, 0.0  ;;  %v2686_v42 = vld [vmem:[%s3078_s6] ss:$0 sm:$0xff] }
 0x168   :  { %v882_v13 = vmax.f32 %v818_v10, 0.0 }
 0x169   :  { %v880_v15 = vmax.f32 %v816_v11, 0.0 }
 0x16a   :  { %v914_v16 = vpack.c.bf16 %v882_v13, %v881_v12 }
 0x16b   :  { %v913_v17 = vpack.c.bf16 %v880_v15, %v879_v14 }
 0x16d   :  { %2275 = vmatprep.mubr.msk.bf16.mxu1 %vm916_vm2, %v913_v17 }
 0x16e   :  { %2276 = vmatmul.mubr.msk.bf16.gmra.mrb[60].mxu1 %vm916_vm2, %v914_v16 }
 0x1c9   :  { %v2217_v18 = vpop.f32.mrb[0].mxu1 }
 0x1ca   :  { %v1314_v19 = vmul.f32 %v2217_v18, %v2681_v40  ;;  %v1050_v20 = vpop.f32.mrb[1].mxu1 }
 0x1cb   :  { %v1312_v21 = vmul.f32 %v2681_v40, %v1050_v20  ;;  %v2218_v22 = vpop.f32.mrb[2].mxu1 }
 0x1cc   :  { %v1385_v23 = vadd.f32 %v2686_v42, %v1314_v19  ;;  %v1315_v24 = vmul.f32 %v2218_v22, %v2681_v40  ;;  %v1053_v25 = vpop.f32.mrb[3].mxu1 }
 0x1cd   :  { %v1383_v26 = vadd.f32 %v2686_v42, %v1312_v21  ;;  %v1313_v27 = vmul.f32 %v2681_v40, %v1053_v25 }
 0x1ce   :  { %v1449_v28 = vmax.f32 %v1385_v23, 0.0  ;;  %v1386_v29 = vadd.f32 %v2686_v42, %v1315_v24 }
 0x1cf   :  { %v1447_v30 = vmax.f32 %v1383_v26, 0.0  ;;  %v1384_v31 = vadd.f32 %v2686_v42, %v1313_v27 }
 0x1d0   :  { %v2007_v32 = vpack.c.bf16 %v1449_v28, %v1449_v28  ;;  %v1450_v33 = vmax.f32 %v1386_v29, 0.0 }
 0x1d1   :  { %v2005_v34 = vpack.c.bf16 %v1447_v30, %v1447_v30  ;;  %v1448_v35 = vmax.f32 %v1384_v31, 0.0  ;;  %v2221_v36 = vpop.f32.mrb[4].mxu1 }
 0x1d2   :  { %1770 = vst.msk [vmem:[%s3079_s7 + $0x8] sm:$0xf] %vm1767_vm3, %v2007_v32  ;;  %v2008_v37 = vpack.c.bf16 %v1450_v33, %v1450_v33  ;;  %v1318_v38 = vmul.f32 %v2221_v36, %v2681_v40  ;;  %v1066_v39 = vpop.f32.mrb[5].mxu1 }
 0x1d3   :  { %1768 = vst.msk [vmem:[%s3079_s7] sm:$0xf] %vm1767_vm3, %v2005_v34  ;;  %v2006_v41 = vpack.c.bf16 %v1448_v35, %v1448_v35  ;;  %v1316_v43 = vmul.f32 %v2681_v40, %v1066_v39  ;;  %v2222_v44 = vpop.f32.mrb[6].mxu1 }
 0x1d4   :  { %1771 = vst.msk [vmem:[%s3079_s7 + $0xc] sm:$0xf] %vm1767_vm3, %v2008_v37  ;;  %v1389_v45 = vadd.f32 %v2686_v42, %v1318_v38  ;;  %v1319_v46 = vmul.f32 %v2222_v44, %v2681_v40  ;;  %v1069_v47 = vpop.f32.mrb[7].mxu1 }
 0x1d5   :  { %1769 = vst.msk [vmem:[%s3079_s7 + $0x4] sm:$0xf] %vm1767_vm3, %v2006_v41  ;;  %v1387_v48 = vadd.f32 %v2686_v42, %v1316_v43  ;;  %v1317_v49 = vmul.f32 %v2681_v40, %v1069_v47 }
 0x1d6   :  { %v1453_v50 = vmax.f32 %v1389_v45, 0.0  ;;  %v1390_v51 = vadd.f32 %v2686_v42, %v1319_v46 }
 0x1d7   :  { %v1451_v52 = vmax.f32 %v1387_v48, 0.0  ;;  %v1388_v53 = vadd.f32 %v2686_v42, %v1317_v49 }
 0x1d8   :  { %v2011_v54 = vpack.c.bf16 %v1453_v50, %v1453_v50  ;;  %v1454_v55 = vmax.f32 %v1390_v51, 0.0 }
 0x1d9   :  { %v2009_v56 = vpack.c.bf16 %v1451_v52, %v1451_v52  ;;  %v1452_v57 = vmax.f32 %v1388_v53, 0.0  ;;  %v2225_v58 = vpop.f32.mrb[8].mxu1 }
 0x1da   :  { %1774 = vst.msk [vmem:[%s3079_s7 + $0x18] sm:$0xf] %vm1767_vm3, %v2011_v54  ;;  %v2012_v59 = vpack.c.bf16 %v1454_v55, %v1454_v55  ;;  %v1322_v60 = vmul.f32 %v2225_v58, %v2681_v40  ;;  %v1082_v61 = vpop.f32.mrb[9].mxu1 }
 0x1db   :  { %1772 = vst.msk [vmem:[%s3079_s7 + $0x10] sm:$0xf] %vm1767_vm3, %v2009_v56  ;;  %v2010_v62 = vpack.c.bf16 %v1452_v57, %v1452_v57  ;;  %v1320_v63 = vmul.f32 %v2681_v40, %v1082_v61  ;;  %v2226_v0 = vpop.f32.mrb[10].mxu1 }
 0x1dc   :  { %1775 = vst.msk [vmem:[%s3079_s7 + $0x1c] sm:$0xf] %vm1767_vm3, %v2012_v59  ;;  %v1393_v1 = vadd.f32 %v2686_v42, %v1322_v60  ;;  %v1323_v2 = vmul.f32 %v2226_v0, %v2681_v40  ;;  %v1085_v3 = vpop.f32.mrb[11].mxu1 }
 0x1dd   :  { %1773 = vst.msk [vmem:[%s3079_s7 + $0x14] sm:$0xf] %vm1767_vm3, %v2010_v62  ;;  %v1391_v4 = vadd.f32 %v2686_v42, %v1320_v63  ;;  %v1321_v5 = vmul.f32 %v2681_v40, %v1085_v3 }
 0x1de   :  { %v1457_v6 = vmax.f32 %v1393_v1, 0.0  ;;  %v1394_v7 = vadd.f32 %v2686_v42, %v1323_v2 }
 0x1df   :  { %v1455_v8 = vmax.f32 %v1391_v4, 0.0  ;;  %v1392_v9 = vadd.f32 %v2686_v42, %v1321_v5 }
 0x1e0   :  { %v2015_v10 = vpack.c.bf16 %v1457_v6, %v1457_v6  ;;  %v1458_v11 = vmax.f32 %v1394_v7, 0.0 }
 0x1e1   :  { %v2013_v12 = vpack.c.bf16 %v1455_v8, %v1455_v8  ;;  %v1456_v13 = vmax.f32 %v1392_v9, 0.0  ;;  %v2229_v14 = vpop.f32.mrb[12].mxu1 }
 0x1e2   :  { %1778 = vst.msk [vmem:[%s3079_s7 + $0x28] sm:$0xf] %vm1767_vm3, %v2015_v10  ;;  %v2016_v15 = vpack.c.bf16 %v1458_v11, %v1458_v11  ;;  %v1326_v16 = vmul.f32 %v2229_v14, %v2681_v40  ;;  %v1098_v17 = vpop.f32.mrb[13].mxu1 }
 0x1e3   :  { %1776 = vst.msk [vmem:[%s3079_s7 + $0x20] sm:$0xf] %vm1767_vm3, %v2013_v12  ;;  %v2014_v18 = vpack.c.bf16 %v1456_v13, %v1456_v13  ;;  %v1324_v19 = vmul.f32 %v2681_v40, %v1098_v17  ;;  %v2230_v20 = vpop.f32.mrb[14].mxu1 }
 0x1e4   :  { %1779 = vst.msk [vmem:[%s3079_s7 + $0x2c] sm:$0xf] %vm1767_vm3, %v2016_v15  ;;  %v1397_v21 = vadd.f32 %v2686_v42, %v1326_v16  ;;  %v1327_v22 = vmul.f32 %v2230_v20, %v2681_v40  ;;  %v1101_v23 = vpop.f32.mrb[15].mxu1 }
 0x1e5   :  { %1777 = vst.msk [vmem:[%s3079_s7 + $0x24] sm:$0xf] %vm1767_vm3, %v2014_v18  ;;  %v1395_v24 = vadd.f32 %v2686_v42, %v1324_v19  ;;  %v1325_v25 = vmul.f32 %v2681_v40, %v1101_v23 }
 0x1e6   :  { %v1461_v26 = vmax.f32 %v1397_v21, 0.0  ;;  %v1398_v27 = vadd.f32 %v2686_v42, %v1327_v22 }
 0x1e7   :  { %v1459_v28 = vmax.f32 %v1395_v24, 0.0  ;;  %v1396_v29 = vadd.f32 %v2686_v42, %v1325_v25 }
 0x1e8   :  { %v2019_v30 = vpack.c.bf16 %v1461_v26, %v1461_v26  ;;  %v1462_v31 = vmax.f32 %v1398_v27, 0.0 }
 0x1e9   :  { %v2017_v32 = vpack.c.bf16 %v1459_v28, %v1459_v28  ;;  %v1460_v33 = vmax.f32 %v1396_v29, 0.0  ;;  %v2233_v34 = vpop.f32.mrb[16].mxu1 }
 0x1ea   :  { %1782 = vst.msk [vmem:[%s3079_s7 + $0x38] sm:$0xf] %vm1767_vm3, %v2019_v30  ;;  %v2020_v35 = vpack.c.bf16 %v1462_v31, %v1462_v31  ;;  %v1330_v36 = vmul.f32 %v2233_v34, %v2681_v40  ;;  %v1114_v37 = vpop.f32.mrb[17].mxu1 }
 0x1eb   :  { %1780 = vst.msk [vmem:[%s3079_s7 + $0x30] sm:$0xf] %vm1767_vm3, %v2017_v32  ;;  %v2018_v38 = vpack.c.bf16 %v1460_v33, %v1460_v33  ;;  %v1328_v39 = vmul.f32 %v2681_v40, %v1114_v37  ;;  %v2234_v41 = vpop.f32.mrb[18].mxu1 }
 0x1ec   :  { %1783 = vst.msk [vmem:[%s3079_s7 + $0x3c] sm:$0xf] %vm1767_vm3, %v2020_v35  ;;  %v1401_v43 = vadd.f32 %v2686_v42, %v1330_v36  ;;  %v1331_v44 = vmul.f32 %v2234_v41, %v2681_v40  ;;  %v1117_v45 = vpop.f32.mrb[19].mxu1 }
 0x1ed   :  { %1781 = vst.msk [vmem:[%s3079_s7 + $0x34] sm:$0xf] %vm1767_vm3, %v2018_v38  ;;  %v1399_v46 = vadd.f32 %v2686_v42, %v1328_v39  ;;  %v1329_v47 = vmul.f32 %v2681_v40, %v1117_v45 }
 0x1ee   :  { %v1465_v48 = vmax.f32 %v1401_v43, 0.0  ;;  %v1402_v49 = vadd.f32 %v2686_v42, %v1331_v44 }
 0x1ef   :  { %v1463_v50 = vmax.f32 %v1399_v46, 0.0  ;;  %v1400_v51 = vadd.f32 %v2686_v42, %v1329_v47 }
 0x1f0   :  { %v2023_v52 = vpack.c.bf16 %v1465_v48, %v1465_v48  ;;  %v1466_v53 = vmax.f32 %v1402_v49, 0.0 }
 0x1f1   :  { %v2021_v54 = vpack.c.bf16 %v1463_v50, %v1463_v50  ;;  %v1464_v55 = vmax.f32 %v1400_v51, 0.0  ;;  %v2237_v56 = vpop.f32.mrb[20].mxu1 }
 0x1f2   :  { %1786 = vst.msk [vmem:[%s3079_s7 + $0x48] sm:$0xf] %vm1767_vm3, %v2023_v52  ;;  %v2024_v57 = vpack.c.bf16 %v1466_v53, %v1466_v53  ;;  %v1334_v58 = vmul.f32 %v2237_v56, %v2681_v40  ;;  %v1130_v59 = vpop.f32.mrb[21].mxu1 }
 0x1f3   :  { %1784 = vst.msk [vmem:[%s3079_s7 + $0x40] sm:$0xf] %vm1767_vm3, %v2021_v54  ;;  %v2022_v60 = vpack.c.bf16 %v1464_v55, %v1464_v55  ;;  %v1332_v61 = vmul.f32 %v2681_v40, %v1130_v59  ;;  %v2238_v62 = vpop.f32.mrb[22].mxu1 }
 0x1f4   :  { %1787 = vst.msk [vmem:[%s3079_s7 + $0x4c] sm:$0xf] %vm1767_vm3, %v2024_v57  ;;  %v1405_v63 = vadd.f32 %v2686_v42, %v1334_v58  ;;  %v1335_v0 = vmul.f32 %v2238_v62, %v2681_v40  ;;  %v1133_v1 = vpop.f32.mrb[23].mxu1 }
 0x1f5   :  { %1785 = vst.msk [vmem:[%s3079_s7 + $0x44] sm:$0xf] %vm1767_vm3, %v2022_v60  ;;  %v1403_v2 = vadd.f32 %v2686_v42, %v1332_v61  ;;  %v1333_v3 = vmul.f32 %v2681_v40, %v1133_v1 }
 0x1f6   :  { %v1469_v4 = vmax.f32 %v1405_v63, 0.0  ;;  %v1406_v5 = vadd.f32 %v2686_v42, %v1335_v0 }
 0x1f7   :  { %v1467_v6 = vmax.f32 %v1403_v2, 0.0  ;;  %v1404_v7 = vadd.f32 %v2686_v42, %v1333_v3 }
 0x1f8   :  { %v2027_v8 = vpack.c.bf16 %v1469_v4, %v1469_v4  ;;  %v1470_v9 = vmax.f32 %v1406_v5, 0.0 }
 0x1f9   :  { %v2025_v10 = vpack.c.bf16 %v1467_v6, %v1467_v6  ;;  %v1468_v11 = vmax.f32 %v1404_v7, 0.0  ;;  %v2241_v12 = vpop.f32.mrb[24].mxu1 }
 0x1fa   :  { %1790 = vst.msk [vmem:[%s3079_s7 + $0x58] sm:$0xf] %vm1767_vm3, %v2027_v8  ;;  %v2028_v13 = vpack.c.bf16 %v1470_v9, %v1470_v9  ;;  %v1338_v14 = vmul.f32 %v2241_v12, %v2681_v40  ;;  %v1146_v15 = vpop.f32.mrb[25].mxu1 }
 0x1fb   :  { %1788 = vst.msk [vmem:[%s3079_s7 + $0x50] sm:$0xf] %vm1767_vm3, %v2025_v10  ;;  %v2026_v16 = vpack.c.bf16 %v1468_v11, %v1468_v11  ;;  %v1336_v17 = vmul.f32 %v2681_v40, %v1146_v15  ;;  %v2242_v18 = vpop.f32.mrb[26].mxu1 }
 0x1fc   :  { %1791 = vst.msk [vmem:[%s3079_s7 + $0x5c] sm:$0xf] %vm1767_vm3, %v2028_v13  ;;  %v1409_v19 = vadd.f32 %v2686_v42, %v1338_v14  ;;  %v1339_v20 = vmul.f32 %v2242_v18, %v2681_v40  ;;  %v1149_v21 = vpop.f32.mrb[27].mxu1 }
 0x1fd   :  { %1789 = vst.msk [vmem:[%s3079_s7 + $0x54] sm:$0xf] %vm1767_vm3, %v2026_v16  ;;  %v1407_v22 = vadd.f32 %v2686_v42, %v1336_v17  ;;  %v1337_v23 = vmul.f32 %v2681_v40, %v1149_v21 }
 0x1fe   :  { %v1473_v24 = vmax.f32 %v1409_v19, 0.0  ;;  %v1410_v25 = vadd.f32 %v2686_v42, %v1339_v20 }
 0x1ff   :  { %v1471_v26 = vmax.f32 %v1407_v22, 0.0  ;;  %v1408_v27 = vadd.f32 %v2686_v42, %v1337_v23 }
 0x200   :  { %v2031_v28 = vpack.c.bf16 %v1473_v24, %v1473_v24  ;;  %v1474_v29 = vmax.f32 %v1410_v25, 0.0 }
 0x201   :  { %v2029_v30 = vpack.c.bf16 %v1471_v26, %v1471_v26  ;;  %v1472_v31 = vmax.f32 %v1408_v27, 0.0  ;;  %v2245_v32 = vpop.f32.mrb[28].mxu1 }
 0x202   :  { %1794 = vst.msk [vmem:[%s3079_s7 + $0x68] sm:$0xf] %vm1767_vm3, %v2031_v28  ;;  %v2032_v33 = vpack.c.bf16 %v1474_v29, %v1474_v29  ;;  %v1342_v34 = vmul.f32 %v2245_v32, %v2681_v40  ;;  %v1162_v35 = vpop.f32.mrb[29].mxu1 }
 0x203   :  { %1792 = vst.msk [vmem:[%s3079_s7 + $0x60] sm:$0xf] %vm1767_vm3, %v2029_v30  ;;  %v2030_v36 = vpack.c.bf16 %v1472_v31, %v1472_v31  ;;  %v1340_v37 = vmul.f32 %v2681_v40, %v1162_v35  ;;  %v2246_v38 = vpop.f32.mrb[30].mxu1 }
 0x204   :  { %1795 = vst.msk [vmem:[%s3079_s7 + $0x6c] sm:$0xf] %vm1767_vm3, %v2032_v33  ;;  %v1413_v39 = vadd.f32 %v2686_v42, %v1342_v34  ;;  %v1343_v41 = vmul.f32 %v2246_v38, %v2681_v40  ;;  %v1165_v43 = vpop.f32.mrb[31].mxu1 }
 0x205   :  { %1793 = vst.msk [vmem:[%s3079_s7 + $0x64] sm:$0xf] %vm1767_vm3, %v2030_v36  ;;  %v1411_v44 = vadd.f32 %v2686_v42, %v1340_v37  ;;  %v1341_v45 = vmul.f32 %v2681_v40, %v1165_v43 }
 0x206   :  { %v1477_v46 = vmax.f32 %v1413_v39, 0.0  ;;  %v1414_v47 = vadd.f32 %v2686_v42, %v1343_v41 }
 0x207   :  { %v1475_v48 = vmax.f32 %v1411_v44, 0.0  ;;  %v1412_v49 = vadd.f32 %v2686_v42, %v1341_v45 }
 0x208   :  { %v2035_v50 = vpack.c.bf16 %v1477_v46, %v1477_v46  ;;  %v1478_v51 = vmax.f32 %v1414_v47, 0.0 }
 0x209   :  { %v2033_v52 = vpack.c.bf16 %v1475_v48, %v1475_v48  ;;  %v1476_v53 = vmax.f32 %v1412_v49, 0.0  ;;  %v2249_v54 = vpop.f32.mrb[32].mxu1 }
 0x20a   :  { %1798 = vst.msk [vmem:[%s3079_s7 + $0x78] sm:$0xf] %vm1767_vm3, %v2035_v50  ;;  %v2036_v55 = vpack.c.bf16 %v1478_v51, %v1478_v51  ;;  %v1346_v56 = vmul.f32 %v2249_v54, %v2681_v40  ;;  %v1178_v57 = vpop.f32.mrb[33].mxu1 }
 0x20b   :  { %1796 = vst.msk [vmem:[%s3079_s7 + $0x70] sm:$0xf] %vm1767_vm3, %v2033_v52  ;;  %v2034_v58 = vpack.c.bf16 %v1476_v53, %v1476_v53  ;;  %v1344_v59 = vmul.f32 %v2681_v40, %v1178_v57  ;;  %v2250_v60 = vpop.f32.mrb[34].mxu1 }
 0x20c   :  { %1799 = vst.msk [vmem:[%s3079_s7 + $0x7c] sm:$0xf] %vm1767_vm3, %v2036_v55  ;;  %v1417_v61 = vadd.f32 %v2686_v42, %v1346_v56  ;;  %v1347_v62 = vmul.f32 %v2250_v60, %v2681_v40  ;;  %v1181_v63 = vpop.f32.mrb[35].mxu1 }
 0x20d   :  { %1797 = vst.msk [vmem:[%s3079_s7 + $0x74] sm:$0xf] %vm1767_vm3, %v2034_v58  ;;  %v1415_v0 = vadd.f32 %v2686_v42, %v1344_v59  ;;  %v1345_v1 = vmul.f32 %v2681_v40, %v1181_v63 }
 0x20e   :  { %v1481_v2 = vmax.f32 %v1417_v61, 0.0  ;;  %v1418_v3 = vadd.f32 %v2686_v42, %v1347_v62 }
 0x20f   :  { %v1479_v4 = vmax.f32 %v1415_v0, 0.0  ;;  %v1416_v5 = vadd.f32 %v2686_v42, %v1345_v1 }
 0x210   :  { %v2039_v6 = vpack.c.bf16 %v1481_v2, %v1481_v2  ;;  %v1482_v7 = vmax.f32 %v1418_v3, 0.0 }
 0x211   :  { %v2037_v8 = vpack.c.bf16 %v1479_v4, %v1479_v4  ;;  %v1480_v9 = vmax.f32 %v1416_v5, 0.0  ;;  %v2253_v10 = vpop.f32.mrb[36].mxu1 }
 0x212   :  { %1802 = vst.msk [vmem:[%s3079_s7 + $0x88] sm:$0xf] %vm1767_vm3, %v2039_v6  ;;  %v2040_v11 = vpack.c.bf16 %v1482_v7, %v1482_v7  ;;  %v1350_v12 = vmul.f32 %v2253_v10, %v2681_v40  ;;  %v1194_v13 = vpop.f32.mrb[37].mxu1 }
 0x213   :  { %1800 = vst.msk [vmem:[%s3079_s7 + $0x80] sm:$0xf] %vm1767_vm3, %v2037_v8  ;;  %v2038_v14 = vpack.c.bf16 %v1480_v9, %v1480_v9  ;;  %v1348_v15 = vmul.f32 %v2681_v40, %v1194_v13  ;;  %v2254_v16 = vpop.f32.mrb[38].mxu1 }
 0x214   :  { %1803 = vst.msk [vmem:[%s3079_s7 + $0x8c] sm:$0xf] %vm1767_vm3, %v2040_v11  ;;  %v1421_v17 = vadd.f32 %v2686_v42, %v1350_v12  ;;  %v1351_v18 = vmul.f32 %v2254_v16, %v2681_v40  ;;  %v1197_v19 = vpop.f32.mrb[39].mxu1 }
 0x215   :  { %1801 = vst.msk [vmem:[%s3079_s7 + $0x84] sm:$0xf] %vm1767_vm3, %v2038_v14  ;;  %v1419_v20 = vadd.f32 %v2686_v42, %v1348_v15  ;;  %v1349_v21 = vmul.f32 %v2681_v40, %v1197_v19 }
 0x216   :  { %v1485_v22 = vmax.f32 %v1421_v17, 0.0  ;;  %v1422_v23 = vadd.f32 %v2686_v42, %v1351_v18 }
 0x217   :  { %v1483_v24 = vmax.f32 %v1419_v20, 0.0  ;;  %v1420_v25 = vadd.f32 %v2686_v42, %v1349_v21 }
 0x218   :  { %v2043_v26 = vpack.c.bf16 %v1485_v22, %v1485_v22  ;;  %v1486_v27 = vmax.f32 %v1422_v23, 0.0 }
 0x219   :  { %v2041_v28 = vpack.c.bf16 %v1483_v24, %v1483_v24  ;;  %v1484_v29 = vmax.f32 %v1420_v25, 0.0  ;;  %v2257_v30 = vpop.f32.mrb[40].mxu1 }
 0x21a   :  { %1806 = vst.msk [vmem:[%s3079_s7 + $0x98] sm:$0xf] %vm1767_vm3, %v2043_v26  ;;  %v2044_v31 = vpack.c.bf16 %v1486_v27, %v1486_v27  ;;  %v1354_v32 = vmul.f32 %v2257_v30, %v2681_v40  ;;  %v1210_v33 = vpop.f32.mrb[41].mxu1 }
 0x21b   :  { %1804 = vst.msk [vmem:[%s3079_s7 + $0x90] sm:$0xf] %vm1767_vm3, %v2041_v28  ;;  %v2042_v34 = vpack.c.bf16 %v1484_v29, %v1484_v29  ;;  %v1352_v35 = vmul.f32 %v2681_v40, %v1210_v33  ;;  %v2258_v36 = vpop.f32.mrb[42].mxu1 }
 0x21c   :  { %1807 = vst.msk [vmem:[%s3079_s7 + $0x9c] sm:$0xf] %vm1767_vm3, %v2044_v31  ;;  %v1425_v37 = vadd.f32 %v2686_v42, %v1354_v32  ;;  %v1355_v38 = vmul.f32 %v2258_v36, %v2681_v40  ;;  %v1213_v39 = vpop.f32.mrb[43].mxu1 }
 0x21d   :  { %1805 = vst.msk [vmem:[%s3079_s7 + $0x94] sm:$0xf] %vm1767_vm3, %v2042_v34  ;;  %v1423_v41 = vadd.f32 %v2686_v42, %v1352_v35  ;;  %v1353_v43 = vmul.f32 %v2681_v40, %v1213_v39 }
 0x21e   :  { %v1489_v44 = vmax.f32 %v1425_v37, 0.0  ;;  %v1426_v45 = vadd.f32 %v2686_v42, %v1355_v38 }
 0x21f   :  { %v1487_v46 = vmax.f32 %v1423_v41, 0.0  ;;  %v1424_v47 = vadd.f32 %v2686_v42, %v1353_v43 }
 0x220   :  { %v2047_v48 = vpack.c.bf16 %v1489_v44, %v1489_v44  ;;  %v1490_v49 = vmax.f32 %v1426_v45, 0.0 }
 0x221   :  { %v2045_v50 = vpack.c.bf16 %v1487_v46, %v1487_v46  ;;  %v1488_v51 = vmax.f32 %v1424_v47, 0.0  ;;  %v2261_v52 = vpop.f32.mrb[44].mxu1 }
 0x222   :  { %1810 = vst.msk [vmem:[%s3079_s7 + $0xa8] sm:$0xf] %vm1767_vm3, %v2047_v48  ;;  %v2048_v53 = vpack.c.bf16 %v1490_v49, %v1490_v49  ;;  %v1358_v54 = vmul.f32 %v2261_v52, %v2681_v40  ;;  %v1226_v55 = vpop.f32.mrb[45].mxu1 }
 0x223   :  { %1808 = vst.msk [vmem:[%s3079_s7 + $0xa0] sm:$0xf] %vm1767_vm3, %v2045_v50  ;;  %v2046_v56 = vpack.c.bf16 %v1488_v51, %v1488_v51  ;;  %v1356_v57 = vmul.f32 %v2681_v40, %v1226_v55  ;;  %v2262_v58 = vpop.f32.mrb[46].mxu1 }
 0x224   :  { %1811 = vst.msk [vmem:[%s3079_s7 + $0xac] sm:$0xf] %vm1767_vm3, %v2048_v53  ;;  %v1429_v59 = vadd.f32 %v2686_v42, %v1358_v54  ;;  %v1359_v60 = vmul.f32 %v2262_v58, %v2681_v40  ;;  %v1229_v61 = vpop.f32.mrb[47].mxu1 }
 0x225   :  { %1809 = vst.msk [vmem:[%s3079_s7 + $0xa4] sm:$0xf] %vm1767_vm3, %v2046_v56  ;;  %v1427_v62 = vadd.f32 %v2686_v42, %v1356_v57  ;;  %v1357_v63 = vmul.f32 %v2681_v40, %v1229_v61 }
 0x226   :  { %v1493_v0 = vmax.f32 %v1429_v59, 0.0  ;;  %v1430_v1 = vadd.f32 %v2686_v42, %v1359_v60 }
 0x227   :  { %v1491_v2 = vmax.f32 %v1427_v62, 0.0  ;;  %v1428_v3 = vadd.f32 %v2686_v42, %v1357_v63 }
 0x228   :  { %v2051_v4 = vpack.c.bf16 %v1493_v0, %v1493_v0  ;;  %v1494_v5 = vmax.f32 %v1430_v1, 0.0 }
 0x229   :  { %v2049_v6 = vpack.c.bf16 %v1491_v2, %v1491_v2  ;;  %v1492_v7 = vmax.f32 %v1428_v3, 0.0  ;;  %v2265_v8 = vpop.f32.mrb[48].mxu1 }
 0x22a   :  { %1814 = vst.msk [vmem:[%s3079_s7 + $0xb8] sm:$0xf] %vm1767_vm3, %v2051_v4  ;;  %v2052_v9 = vpack.c.bf16 %v1494_v5, %v1494_v5  ;;  %v1362_v10 = vmul.f32 %v2265_v8, %v2681_v40  ;;  %v1242_v11 = vpop.f32.mrb[49].mxu1 }
 0x22b   :  { %1812 = vst.msk [vmem:[%s3079_s7 + $0xb0] sm:$0xf] %vm1767_vm3, %v2049_v6  ;;  %v2050_v12 = vpack.c.bf16 %v1492_v7, %v1492_v7  ;;  %v1360_v13 = vmul.f32 %v2681_v40, %v1242_v11  ;;  %v2266_v14 = vpop.f32.mrb[50].mxu1 }
 0x22c   :  { %1815 = vst.msk [vmem:[%s3079_s7 + $0xbc] sm:$0xf] %vm1767_vm3, %v2052_v9  ;;  %v1433_v15 = vadd.f32 %v2686_v42, %v1362_v10  ;;  %v1363_v16 = vmul.f32 %v2266_v14, %v2681_v40  ;;  %v1245_v17 = vpop.f32.mrb[51].mxu1 }
 0x22d   :  { %1813 = vst.msk [vmem:[%s3079_s7 + $0xb4] sm:$0xf] %vm1767_vm3, %v2050_v12  ;;  %v1431_v18 = vadd.f32 %v2686_v42, %v1360_v13  ;;  %v1361_v19 = vmul.f32 %v2681_v40, %v1245_v17 }
 0x22e   :  { %v1497_v20 = vmax.f32 %v1433_v15, 0.0  ;;  %v1434_v21 = vadd.f32 %v2686_v42, %v1363_v16 }
 0x22f   :  { %v1495_v22 = vmax.f32 %v1431_v18, 0.0  ;;  %v1432_v23 = vadd.f32 %v2686_v42, %v1361_v19 }
 0x230   :  { %v2055_v24 = vpack.c.bf16 %v1497_v20, %v1497_v20  ;;  %v1498_v25 = vmax.f32 %v1434_v21, 0.0 }
 0x231   :  { %v2053_v26 = vpack.c.bf16 %v1495_v22, %v1495_v22  ;;  %v1496_v27 = vmax.f32 %v1432_v23, 0.0  ;;  %v2269_v28 = vpop.f32.mrb[52].mxu1 }
 0x232   :  { %1818 = vst.msk [vmem:[%s3079_s7 + $0xc8] sm:$0xf] %vm1767_vm3, %v2055_v24  ;;  %v2056_v29 = vpack.c.bf16 %v1498_v25, %v1498_v25  ;;  %v1366_v30 = vmul.f32 %v2269_v28, %v2681_v40  ;;  %v1258_v31 = vpop.f32.mrb[53].mxu1 }
 0x233   :  { %1816 = vst.msk [vmem:[%s3079_s7 + $0xc0] sm:$0xf] %vm1767_vm3, %v2053_v26  ;;  %v2054_v32 = vpack.c.bf16 %v1496_v27, %v1496_v27  ;;  %v1364_v33 = vmul.f32 %v2681_v40, %v1258_v31  ;;  %v2270_v34 = vpop.f32.mrb[54].mxu1 }
 0x234   :  { %1819 = vst.msk [vmem:[%s3079_s7 + $0xcc] sm:$0xf] %vm1767_vm3, %v2056_v29  ;;  %v1437_v35 = vadd.f32 %v2686_v42, %v1366_v30  ;;  %v1367_v36 = vmul.f32 %v2270_v34, %v2681_v40  ;;  %v1261_v37 = vpop.f32.mrb[55].mxu1 }
 0x235   :  { %1817 = vst.msk [vmem:[%s3079_s7 + $0xc4] sm:$0xf] %vm1767_vm3, %v2054_v32  ;;  %v1435_v38 = vadd.f32 %v2686_v42, %v1364_v33  ;;  %v1365_v39 = vmul.f32 %v2681_v40, %v1261_v37 }
 0x236   :  { %v1501_v41 = vmax.f32 %v1437_v35, 0.0  ;;  %v1438_v43 = vadd.f32 %v2686_v42, %v1367_v36 }
 0x237   :  { %v1499_v44 = vmax.f32 %v1435_v38, 0.0  ;;  %v1436_v45 = vadd.f32 %v2686_v42, %v1365_v39 }
 0x238   :  { %v2059_v46 = vpack.c.bf16 %v1501_v41, %v1501_v41  ;;  %v1502_v47 = vmax.f32 %v1438_v43, 0.0 }
 0x239   :  { %v2057_v48 = vpack.c.bf16 %v1499_v44, %v1499_v44  ;;  %v1500_v49 = vmax.f32 %v1436_v45, 0.0  ;;  %v2273_v50 = vpop.f32.mrb[56].mxu1 }
 0x23a   :  { %1822 = vst.msk [vmem:[%s3079_s7 + $0xd8] sm:$0xf] %vm1767_vm3, %v2059_v46  ;;  %v2060_v51 = vpack.c.bf16 %v1502_v47, %v1502_v47  ;;  %v1370_v52 = vmul.f32 %v2273_v50, %v2681_v40  ;;  %v1274_v53 = vpop.f32.mrb[57].mxu1 }
 0x23b   :  { %1820 = vst.msk [vmem:[%s3079_s7 + $0xd0] sm:$0xf] %vm1767_vm3, %v2057_v48  ;;  %v2058_v54 = vpack.c.bf16 %v1500_v49, %v1500_v49  ;;  %v1368_v55 = vmul.f32 %v2681_v40, %v1274_v53  ;;  %v2274_v56 = vpop.f32.mrb[58].mxu1 }
 0x23c   :  { %1823 = vst.msk [vmem:[%s3079_s7 + $0xdc] sm:$0xf] %vm1767_vm3, %v2060_v51  ;;  %v1441_v57 = vadd.f32 %v2686_v42, %v1370_v52  ;;  %v1371_v58 = vmul.f32 %v2274_v56, %v2681_v40  ;;  %v1277_v59 = vpop.f32.mrb[59].mxu1 }
 0x23d   :  { %1821 = vst.msk [vmem:[%s3079_s7 + $0xd4] sm:$0xf] %vm1767_vm3, %v2058_v54  ;;  %v1439_v60 = vadd.f32 %v2686_v42, %v1368_v55  ;;  %v1369_v61 = vmul.f32 %v2681_v40, %v1277_v59 }
 0x23e   :  { %v1505_v62 = vmax.f32 %v1441_v57, 0.0  ;;  %v1442_v63 = vadd.f32 %v2686_v42, %v1371_v58 }
 0x23f   :  { %v1503_v0 = vmax.f32 %v1439_v60, 0.0  ;;  %v1440_v1 = vadd.f32 %v2686_v42, %v1369_v61 }
 0x240   :  { %v2063_v2 = vpack.c.bf16 %v1505_v62, %v1505_v62  ;;  %v1506_v3 = vmax.f32 %v1442_v63, 0.0 }
 0x241   :  { %v2061_v4 = vpack.c.bf16 %v1503_v0, %v1503_v0  ;;  %v1504_v5 = vmax.f32 %v1440_v1, 0.0  ;;  %v2277_v6 = vpop.f32.mrb[60].mxu1 }
 0x242   :  { %1826 = vst.msk [vmem:[%s3079_s7 + $0xe8] sm:$0xf] %vm1767_vm3, %v2063_v2  ;;  %v2064_v7 = vpack.c.bf16 %v1506_v3, %v1506_v3  ;;  %v1374_v8 = vmul.f32 %v2277_v6, %v2681_v40  ;;  %v1290_v9 = vpop.f32.mrb[61].mxu1 }
 0x243   :  { %1824 = vst.msk [vmem:[%s3079_s7 + $0xe0] sm:$0xf] %vm1767_vm3, %v2061_v4  ;;  %v2062_v10 = vpack.c.bf16 %v1504_v5, %v1504_v5  ;;  %v1372_v11 = vmul.f32 %v2681_v40, %v1290_v9  ;;  %v2278_v12 = vpop.f32.mrb[62].mxu1 }
 0x244   :  { %1827 = vst.msk [vmem:[%s3079_s7 + $0xec] sm:$0xf] %vm1767_vm3, %v2064_v7  ;;  %v1445_v13 = vadd.f32 %v2686_v42, %v1374_v8  ;;  %v1375_v14 = vmul.f32 %v2278_v12, %v2681_v40  ;;  %v1293_v15 = vpop.f32.mrb[63].mxu1 }
 0x245   :  { %1825 = vst.msk [vmem:[%s3079_s7 + $0xe4] sm:$0xf] %vm1767_vm3, %v2062_v10  ;;  %v1443_v16 = vadd.f32 %v2686_v42, %v1372_v11  ;;  %v1373_v17 = vmul.f32 %v2681_v40, %v1293_v15 }
 0x246   :  { %v1509_v18 = vmax.f32 %v1445_v13, 0.0  ;;  %v1446_v19 = vadd.f32 %v2686_v42, %v1375_v14 }
 0x247   :  { %v1507_v20 = vmax.f32 %v1443_v16, 0.0  ;;  %v1444_v21 = vadd.f32 %v2686_v42, %v1373_v17 }
 0x248   :  { %v2067_v22 = vpack.c.bf16 %v1509_v18, %v1509_v18  ;;  %v1510_v23 = vmax.f32 %v1446_v19, 0.0 }
 0x249   :  { %v2065_v24 = vpack.c.bf16 %v1507_v20, %v1507_v20  ;;  %v1508_v25 = vmax.f32 %v1444_v21, 0.0 }
 0x24a   :  { %1830 = vst.msk [vmem:[%s3079_s7 + $0xf8] sm:$0xf] %vm1767_vm3, %v2067_v22  ;;  %v2068_v26 = vpack.c.bf16 %v1510_v23, %v1510_v23 }
 0x24b   :  { %1828 = vst.msk [vmem:[%s3079_s7 + $0xf0] sm:$0xf] %vm1767_vm3, %v2065_v24  ;;  %v2066_v40 = vpack.c.bf16 %v1508_v25, %v1508_v25 }
 0x24c   :  { %1831 = vst.msk [vmem:[%s3079_s7 + $0xfc] sm:$0xf] %vm1767_vm3, %v2068_v26 }
 0x24d   :  { %1829 = vst.msk [vmem:[%s3079_s7 + $0xf4] sm:$0xf] %vm1767_vm3, %v2066_v40 }

// kernel: _lambda_.15
= control target key start
LH: loop header
LB: loop body
LE: loop exit
PB: predicated region body
PF: predicated region fallthrough
CT: control target
= control target key end

     0   :  { %v813_v0 = vmov 0   ;;  %vm187_vm0 = vcmask 130048   ;;  %vm634_vm1 = vcmask 125952   ;;  %s1099_s1 = inlined_call_operand.vmem [shape: bf16[144,16], index: 1, kind: input, shape index: {}]   ;;  %s1100_s0 = inlined_call_operand.vmem [shape: bf16[128,144], index: 0, kind: input, shape index: {}]   ;;  %s1101_s4 = inlined_call_operand.vmem [shape: bf16[16,16], index: 4, kind: input, shape index: {}]   ;;  %s1102_s2 = inlined_call_operand.vmem [shape: f32[1,16], index: 2, kind: input, shape index: {}]   ;;  %s1103_s3 = inlined_call_operand.vmem [shape: f32[1,16], index: 3, kind: input, shape index: {}]   ;;  %s1104_s5 = inlined_call_operand.vmem [shape: f32[1,16], index: 5, kind: input, shape index: {}]   ;;  %s1105_s6 = inlined_call_operand.vmem [shape: f32[1,16], index: 6, kind: input, shape index: {}]   ;;  %s1106_s7 = inlined_call_operand.vmem [shape: bf16[128,16], index: 7, kind: output, shape index: {}]  }
   0x1   :  { %212 = vmatprep.subr.bf16.mxu0 %v813_v0  ;;  %v779_v1 = vld [vmem:[%s1099_s1] sm:$0xff]   ;;  %760 = vmatprep.subr.bf16.mxu1 %v813_v0  ;;  %v780_v2 = vld [vmem:[%s1099_s1 + $0x8] sm:$0xff]   ;;  %v781_v3 = vld [vmem:[%s1099_s1 + $0x10] sm:$0xff]  }
   0x2   :  { %213 = vmatpush1.bf16.msra.mxu0 %v779_v1  ;;  %769 = vmatpush1.bf16.msra.mxu1 %v779_v1  ;;  %v782_v4 = vld [vmem:[%s1099_s1 + $0x18] sm:$0xff]   ;;  %v790_v5 = vld [vmem:[%s1100_s0 + $0x4] ss:$8 sps:$4 sm:$0xff]   ;;  %v785_v9 = vld [vmem:[%s1099_s1 + $0x30] sm:$0xff]  }
   0x3   :  { %214 = vmatprep.subr.bf16.mxu0 %v813_v0  ;;  %761 = vmatprep.subr.bf16.mxu1 %v813_v0  ;;  %v783_v6 = vld [vmem:[%s1099_s1 + $0x20] sm:$0xff]   ;;  %v784_v8 = vld [vmem:[%s1099_s1 + $0x28] sm:$0xff]   ;;  %v786_v10 = vld [vmem:[%s1099_s1 + $0x38] sm:$0xff]  }
   0x4   :  { %680 = vmatprep.mubr.msk.bf16.mxu0 %vm187_vm0, %v790_v5  ;;  %v805_v7 = vld [vmem:[%s1100_s0 + $0x64] ss:$8 sps:$4 sm:$0xff]   ;;  %v788_v12 = vld [vmem:[%s1100_s0] ss:$8 sps:$4 sm:$0xff]   ;;  %v791_v14 = vld [vmem:[%s1100_s0 + $0x14] ss:$8 sps:$4 sm:$0xff]  }
   0x5   :  { %686 = vmatprep.mubr.msk.bf16.mxu1 %vm187_vm0, %v805_v7  ;;  %v787_v11 = vld [vmem:[%s1099_s1 + $0x40] sm:$0xff]   ;;  %v809_v15 = vld [vmem:[%s1100_s0 + $0x74] ss:$8 sps:$4 sm:$0xff]   ;;  %v793_v16 = vld [vmem:[%s1100_s0 + $0x10] ss:$8 sps:$4 sm:$0xff]  }
   0x6   :  { %215 = vmatpush1.bf16.msra.mxu0 %v780_v2  ;;  %770 = vmatpush1.bf16.msra.mxu1 %v780_v2  ;;  %v803_v13 = vld [vmem:[%s1100_s0 + $0x60] ss:$8 sps:$4 sm:$0xff]   ;;  %v811_v17 = vld [vmem:[%s1100_s0 + $0x70] ss:$8 sps:$4 sm:$0xff]   ;;  %v794_v18 = vld [vmem:[%s1100_s0 + $0x24] ss:$8 sps:$4 sm:$0xff]  }
   0x7   :  { %216 = vmatprep.subr.bf16.mxu0 %v813_v0  ;;  %762 = vmatprep.subr.bf16.mxu1 %v813_v0  ;;  %v796_v19 = vld [vmem:[%s1100_s0 + $0x20] ss:$8 sps:$4 sm:$0xff]   ;;  %v797_v20 = vld [vmem:[%s1100_s0 + $0x34] ss:$8 sps:$4 sm:$0xff]   ;;  %v799_v21 = vld [vmem:[%s1100_s0 + $0x30] ss:$8 sps:$4 sm:$0xff]  }
   0x8   :  { %v800_v22 = vld [vmem:[%s1100_s0 + $0x44] ss:$8 sps:$4 sm:$0xff]   ;;  %v802_v23 = vld [vmem:[%s1100_s0 + $0x40] ss:$8 sps:$4 sm:$0xff]   ;;  %v806_v24 = vld [vmem:[%s1100_s0 + $0x54] ss:$8 sps:$4 sm:$0xff]  }
   0x9   :  { %v808_v25 = vld [vmem:[%s1100_s0 + $0x50] ss:$8 sps:$4 sm:$0xff]   ;;  %v812_v26 = vld [vmem:[%s1101_s4] sm:$0xff]  }
   0xa   :  { %217 = vmatpush1.bf16.msra.mxu0 %v781_v3  ;;  %771 = vmatpush1.bf16.msra.mxu1 %v781_v3  ;;  %v943_v27 = vld [vmem:[%s1102_s2] ss:$0 sm:$0xff] }
   0xb   :  { %218 = vmatprep.subr.bf16.mxu0 %v813_v0  ;;  %763 = vmatprep.subr.bf16.mxu1 %v813_v0  ;;  %v948_v29 = vld [vmem:[%s1103_s3] ss:$0 sm:$0xff] }
   0xe   :  { %219 = vmatpush1.bf16.msra.mxu0 %v782_v4  ;;  %772 = vmatpush1.bf16.msra.mxu1 %v782_v4 }
   0xf   :  { %220 = vmatprep.subr.bf16.mxu0 %v813_v0  ;;  %764 = vmatprep.subr.bf16.mxu1 %v813_v0 }
  0x12   :  { %221 = vmatpush1.bf16.msra.mxu0 %v783_v6  ;;  %773 = vmatpush1.bf16.msra.mxu1 %v783_v6 }
  0x13   :  { %222 = vmatprep.subr.bf16.mxu0 %v813_v0  ;;  %765 = vmatprep.subr.bf16.mxu1 %v813_v0 }
  0x16   :  { %223 = vmatpush1.bf16.msra.mxu0 %v784_v8  ;;  %774 = vmatpush1.bf16.msra.mxu1 %v784_v8 }
  0x17   :  { %224 = vmatprep.subr.bf16.mxu0 %v813_v0  ;;  %766 = vmatprep.subr.bf16.mxu1 %v813_v0 }
  0x1a   :  { %225 = vmatpush1.bf16.msra.mxu0 %v785_v9  ;;  %775 = vmatpush1.bf16.msra.mxu1 %v785_v9 }
  0x1b   :  { %226 = vmatprep.subr.bf16.mxu0 %v813_v0  ;;  %767 = vmatprep.subr.bf16.mxu1 %v813_v0 }
  0x1e   :  { %227 = vmatpush1.bf16.msra.mxu0 %v786_v10  ;;  %776 = vmatpush1.bf16.msra.mxu1 %v786_v10 }
  0x1f   :  { %228 = vmatprep.subr.bf16.mxu0 %v813_v0  ;;  %768 = vmatprep.subr.bf16.mxu1 %v813_v0 }
  0x22   :  { %229 = vmatpush1.bf16.msra.mxu0 %v787_v11  ;;  %777 = vmatpush1.bf16.msra.mxu1 %v787_v11 }
  0x23   :  { %742 = vmatprep.subr.bf16.mxu1 %v812_v26 }
  0x25   :  { %245 = vmatmul.mubr.bf16.vlgmr.msra.gmra.mrb[0].mxu0 %v788_v12  ;;  %293 = vmatmul.mubr.bf16.vlgmr.msra.gmra.mrb[0].mxu1 %v803_v13 }
  0x26   :  { %681 = vmatprep.mubr.msk.bf16.mxu0 %vm187_vm0, %v791_v14  ;;  %687 = vmatprep.mubr.msk.bf16.mxu1 %vm187_vm0, %v809_v15 }
  0x27   :  { %743 = vmatpush3.bf16.msra.mxu1 %v812_v26 }
  0x2d   :  { %253 = vmatmul.mubr.bf16.gmra.mrb[4].mxu0 %v793_v16  ;;  %301 = vmatmul.mubr.bf16.gmra.mrb[4].mxu1 %v811_v17 }
  0x2e   :  { %682 = vmatprep.mubr.msk.bf16.mxu0 %vm187_vm0, %v794_v18 }
  0x35   :  { %261 = vmatmul.mubr.bf16.gmra.mrb[8].mxu0 %v796_v19 }
  0x36   :  { %683 = vmatprep.mubr.msk.bf16.mxu0 %vm187_vm0, %v797_v20 }
  0x3d   :  { %269 = vmatmul.mubr.bf16.gmra.mrb[12].mxu0 %v799_v21 }
  0x3e   :  { %684 = vmatprep.mubr.msk.bf16.mxu0 %vm187_vm0, %v800_v22 }
  0x45   :  { %277 = vmatmul.mubr.bf16.gmra.mrb[16].mxu0 %v802_v23 }
  0x46   :  { %685 = vmatprep.mubr.msk.bf16.mxu0 %vm187_vm0, %v806_v24 }
  0x4d   :  { %285 = vmatmul.mubr.bf16.gmra.mrb[20].mxu0 %v808_v25 }
  0xf8   :  { %v246_v28 = vpop.f32.mrb[0].mxu0  ;;  %v294_v30 = vpop.f32.mrb[0].mxu1 }
  0xf9   :  { %v316_v31 = vmul.f32 %v943_v27, %v246_v28  ;;  %v248_v32 = vpop.f32.mrb[1].mxu0  ;;  %v328_v33 = vmul.f32 %v943_v27, %v294_v30  ;;  %v296_v34 = vpop.f32.mrb[1].mxu1 }
  0xfa   :  { %v249_v35 = vpop.f32.mrb[2].mxu0  ;;  %v297_v36 = vpop.f32.mrb[2].mxu1 }
  0xfb   :  { %v339_v37 = vadd.f32 %v948_v29, %v316_v31  ;;  %v317_v38 = vmul.f32 %v943_v27, %v249_v35  ;;  %v251_v39 = vpop.f32.mrb[3].mxu0  ;;  %v351_v40 = vadd.f32 %v948_v29, %v328_v33  ;;  %v329_v41 = vmul.f32 %v943_v27, %v297_v36  ;;  %v299_v42 = vpop.f32.mrb[3].mxu1 }
  0xfd   :  { %v340_v43 = vadd.f32 %v948_v29, %v317_v38  ;;  %v367_v44 = vmax.f32 %v351_v40, 0.0  ;;  %v352_v45 = vadd.f32 %v948_v29, %v329_v41  ;;  %v355_v46 = vmax.f32 %v339_v37, 0.0 }
  0xff   :  { %v356_v47 = vmax.f32 %v340_v43, 0.0  ;;  %v368_v48 = vmax.f32 %v352_v45, 0.0 }
 0x100   :  { %v254_v49 = vpop.f32.mrb[4].mxu0  ;;  %v302_v50 = vpop.f32.mrb[4].mxu1 }
 0x101   :  { %v371_v51 = vpack.c.bf16 %v356_v47, %v355_v46  ;;  %v318_v52 = vmul.f32 %v943_v27, %v254_v49  ;;  %v256_v53 = vpop.f32.mrb[5].mxu0  ;;  %v959_v54 = vpack.c.bf16 %v368_v48, %v367_v44  ;;  %v330_v55 = vmul.f32 %v943_v27, %v302_v50  ;;  %v304_v56 = vpop.f32.mrb[5].mxu1 }
 0x102   :  { %v257_v57 = vpop.f32.mrb[6].mxu0  ;;  %v305_v58 = vpop.f32.mrb[6].mxu1  ;;  %v996_v56 = vld [vmem:[%s1104_s5] ss:$0 sm:$0xff] }
 0x103   :  { %v341_v59 = vadd.f32 %v948_v29, %v318_v52  ;;  %v319_v60 = vmul.f32 %v943_v27, %v257_v57  ;;  %v259_v61 = vpop.f32.mrb[7].mxu0  ;;  %744 = vmatprep.mubr.msk.bf16.mxu1 %vm187_vm0, %v371_v51  ;;  %v353_v62 = vadd.f32 %v948_v29, %v330_v55  ;;  %v331_v63 = vmul.f32 %v943_v27, %v305_v58  ;;  %v307_v0 = vpop.f32.mrb[7].mxu1 }
 0x105   :  { %v342_v1 = vadd.f32 %v948_v29, %v319_v60  ;;  %v369_v2 = vmax.f32 %v353_v62, 0.0  ;;  %v354_v3 = vadd.f32 %v948_v29, %v331_v63  ;;  %v357_v4 = vmax.f32 %v341_v59, 0.0 }
 0x107   :  { %v358_v5 = vmax.f32 %v342_v1, 0.0  ;;  %v370_v6 = vmax.f32 %v354_v3, 0.0 }
 0x108   :  { %v262_v7 = vpop.f32.mrb[8].mxu0 }
 0x109   :  { %v372_v8 = vpack.c.bf16 %v358_v5, %v357_v4  ;;  %v320_v9 = vmul.f32 %v943_v27, %v262_v7  ;;  %v264_v10 = vpop.f32.mrb[9].mxu0  ;;  %v378_v11 = vpack.c.bf16 %v370_v6, %v369_v2 }
 0x10a   :  { %v265_v12 = vpop.f32.mrb[10].mxu0 }
 0x10b   :  { %v343_v13 = vadd.f32 %v948_v29, %v320_v9  ;;  %v321_v14 = vmul.f32 %v943_v27, %v265_v12  ;;  %v267_v15 = vpop.f32.mrb[11].mxu0  ;;  %745 = vmatmul.mubr.msk.bf16.vlgmr.msra.gmra.mrb[8].mxu1 %vm187_vm0, %v372_v8 }
 0x10d   :  { %v344_v16 = vadd.f32 %v948_v29, %v321_v14  ;;  %v359_v17 = vmax.f32 %v343_v13, 0.0 }
 0x10f   :  { %v360_v18 = vmax.f32 %v344_v16, 0.0 }
 0x110   :  { %v270_v19 = vpop.f32.mrb[12].mxu0 }
 0x111   :  { %v373_v20 = vpack.c.bf16 %v360_v18, %v359_v17  ;;  %v322_v21 = vmul.f32 %v943_v27, %v270_v19  ;;  %v272_v22 = vpop.f32.mrb[13].mxu0 }
 0x112   :  { %v273_v23 = vpop.f32.mrb[14].mxu0 }
 0x113   :  { %v345_v24 = vadd.f32 %v948_v29, %v322_v21  ;;  %v323_v25 = vmul.f32 %v943_v27, %v273_v23  ;;  %v275_v26 = vpop.f32.mrb[15].mxu0  ;;  %748 = vmatprep.mubr.msk.bf16.mxu1 %vm187_vm0, %v373_v20 }
 0x115   :  { %v346_v28 = vadd.f32 %v948_v29, %v323_v25  ;;  %v361_v30 = vmax.f32 %v345_v24, 0.0 }
 0x117   :  { %v362_v31 = vmax.f32 %v346_v28, 0.0 }
 0x118   :  { %v278_v32 = vpop.f32.mrb[16].mxu0 }
 0x119   :  { %v374_v33 = vpack.c.bf16 %v362_v31, %v361_v30  ;;  %v324_v34 = vmul.f32 %v943_v27, %v278_v32  ;;  %v280_v35 = vpop.f32.mrb[17].mxu0 }
 0x11a   :  { %v281_v36 = vpop.f32.mrb[18].mxu0 }
 0x11b   :  { %v347_v37 = vadd.f32 %v948_v29, %v324_v34  ;;  %v325_v38 = vmul.f32 %v943_v27, %v281_v36  ;;  %v283_v39 = vpop.f32.mrb[19].mxu0  ;;  %749 = vmatmul.mubr.msk.bf16.gmra.mrb[12].mxu1 %vm187_vm0, %v374_v33 }
 0x11d   :  { %v348_v40 = vadd.f32 %v948_v29, %v325_v38  ;;  %v363_v41 = vmax.f32 %v347_v37, 0.0 }
 0x11f   :  { %v364_v42 = vmax.f32 %v348_v40, 0.0 }
 0x120   :  { %v286_v43 = vpop.f32.mrb[20].mxu0 }
 0x121   :  { %v375_v44 = vpack.c.bf16 %v364_v42, %v363_v41  ;;  %v326_v45 = vmul.f32 %v943_v27, %v286_v43  ;;  %v288_v46 = vpop.f32.mrb[21].mxu0 }
 0x122   :  { %v289_v47 = vpop.f32.mrb[22].mxu0 }
 0x123   :  { %v349_v48 = vadd.f32 %v948_v29, %v326_v45  ;;  %v327_v49 = vmul.f32 %v943_v27, %v289_v47  ;;  %v291_v50 = vpop.f32.mrb[23].mxu0  ;;  %752 = vmatprep.mubr.msk.bf16.mxu1 %vm187_vm0, %v375_v44 }
 0x125   :  { %v350_v51 = vadd.f32 %v948_v29, %v327_v49  ;;  %v365_v52 = vmax.f32 %v349_v48, 0.0  ;;  %v1001_v29 = vld [vmem:[%s1105_s6] ss:$0 sm:$0xff] }
 0x127   :  { %v366_v53 = vmax.f32 %v350_v51, 0.0 }
 0x129   :  { %v376_v55 = vpack.c.bf16 %v366_v53, %v365_v52 }
 0x12b   :  { %753 = vmatmul.mubr.msk.bf16.gmra.mrb[16].mxu1 %vm187_vm0, %v376_v55 }
 0x12c   :  { %756 = vmatprep.mubr.msk.bf16.mxu1 %vm187_vm0, %v959_v54 }
 0x133   :  { %757 = vmatmul.mubr.msk.bf16.gmra.mrb[20].mxu1 %vm187_vm0, %v378_v11 }
 0x1de   :  { %v746_v27 = vpop.f32.mrb[8].mxu1 }
 0x1df   :  { %v517_v57 = vmul.f32 %v746_v27, %v996_v56  ;;  %v445_v58 = vpop.f32.mrb[9].mxu1 }
 0x1e0   :  { %v515_v59 = vmul.f32 %v996_v56, %v445_v58  ;;  %v747_v60 = vpop.f32.mrb[10].mxu1 }
 0x1e1   :  { %v540_v54 = vadd.f32 %v1001_v29, %v517_v57  ;;  %v518_v61 = vmul.f32 %v747_v60, %v996_v56  ;;  %v448_v62 = vpop.f32.mrb[11].mxu1 }
 0x1e2   :  { %v538_v63 = vadd.f32 %v1001_v29, %v515_v59  ;;  %v516_v0 = vmul.f32 %v996_v56, %v448_v62 }
 0x1e3   :  { %v556_v1 = vmax.f32 %v540_v54, 0.0  ;;  %v541_v2 = vadd.f32 %v1001_v29, %v518_v61 }
 0x1e4   :  { %v554_v3 = vmax.f32 %v538_v63, 0.0  ;;  %v539_v4 = vadd.f32 %v1001_v29, %v516_v0 }
 0x1e5   :  { %v719_v5 = vpack.c.bf16 %v556_v1, %v556_v1  ;;  %v557_v6 = vmax.f32 %v541_v2, 0.0 }
 0x1e6   :  { %v717_v7 = vpack.c.bf16 %v554_v3, %v554_v3  ;;  %v555_v8 = vmax.f32 %v539_v4, 0.0 }
 0x1e7   :  { %637 = vst.msk [vmem:[%s1106_s7 + $0x8] sm:$0xf] %vm634_vm1, %v719_v5  ;;  %v720_v9 = vpack.c.bf16 %v557_v6, %v557_v6 }
 0x1e8   :  { %635 = vst.msk [vmem:[%s1106_s7] sm:$0xf] %vm634_vm1, %v717_v7  ;;  %v718_v10 = vpack.c.bf16 %v555_v8, %v555_v8 }
 0x1e9   :  { %638 = vst.msk [vmem:[%s1106_s7 + $0xc] sm:$0xf] %vm634_vm1, %v720_v9 }
 0x1ea   :  { %636 = vst.msk [vmem:[%s1106_s7 + $0x4] sm:$0xf] %vm634_vm1, %v718_v10 }
 0x1ee   :  { %v750_v11 = vpop.f32.mrb[12].mxu1 }
 0x1ef   :  { %v521_v12 = vmul.f32 %v750_v11, %v996_v56  ;;  %v461_v13 = vpop.f32.mrb[13].mxu1 }
 0x1f0   :  { %v519_v14 = vmul.f32 %v996_v56, %v461_v13  ;;  %v751_v15 = vpop.f32.mrb[14].mxu1 }
 0x1f1   :  { %v544_v16 = vadd.f32 %v1001_v29, %v521_v12  ;;  %v522_v17 = vmul.f32 %v751_v15, %v996_v56  ;;  %v464_v18 = vpop.f32.mrb[15].mxu1 }
 0x1f2   :  { %v542_v19 = vadd.f32 %v1001_v29, %v519_v14  ;;  %v520_v20 = vmul.f32 %v996_v56, %v464_v18 }
 0x1f3   :  { %v560_v21 = vmax.f32 %v544_v16, 0.0  ;;  %v545_v22 = vadd.f32 %v1001_v29, %v522_v17 }
 0x1f4   :  { %v558_v23 = vmax.f32 %v542_v19, 0.0  ;;  %v543_v24 = vadd.f32 %v1001_v29, %v520_v20 }
 0x1f5   :  { %v723_v25 = vpack.c.bf16 %v560_v21, %v560_v21  ;;  %v561_v26 = vmax.f32 %v545_v22, 0.0 }
 0x1f6   :  { %v721_v28 = vpack.c.bf16 %v558_v23, %v558_v23  ;;  %v559_v30 = vmax.f32 %v543_v24, 0.0 }
 0x1f7   :  { %641 = vst.msk [vmem:[%s1106_s7 + $0x18] sm:$0xf] %vm634_vm1, %v723_v25  ;;  %v724_v31 = vpack.c.bf16 %v561_v26, %v561_v26 }
 0x1f8   :  { %639 = vst.msk [vmem:[%s1106_s7 + $0x10] sm:$0xf] %vm634_vm1, %v721_v28  ;;  %v722_v32 = vpack.c.bf16 %v559_v30, %v559_v30 }
 0x1f9   :  { %642 = vst.msk [vmem:[%s1106_s7 + $0x1c] sm:$0xf] %vm634_vm1, %v724_v31 }
 0x1fa   :  { %640 = vst.msk [vmem:[%s1106_s7 + $0x14] sm:$0xf] %vm634_vm1, %v722_v32 }
 0x1fe   :  { %v754_v33 = vpop.f32.mrb[16].mxu1 }
 0x1ff   :  { %v525_v34 = vmul.f32 %v754_v33, %v996_v56  ;;  %v477_v35 = vpop.f32.mrb[17].mxu1 }
 0x200   :  { %v523_v36 = vmul.f32 %v996_v56, %v477_v35  ;;  %v755_v37 = vpop.f32.mrb[18].mxu1 }
 0x201   :  { %v548_v38 = vadd.f32 %v1001_v29, %v525_v34  ;;  %v526_v39 = vmul.f32 %v755_v37, %v996_v56  ;;  %v480_v40 = vpop.f32.mrb[19].mxu1 }
 0x202   :  { %v546_v41 = vadd.f32 %v1001_v29, %v523_v36  ;;  %v524_v42 = vmul.f32 %v996_v56, %v480_v40 }
 0x203   :  { %v564_v43 = vmax.f32 %v548_v38, 0.0  ;;  %v549_v44 = vadd.f32 %v1001_v29, %v526_v39 }
 0x204   :  { %v562_v45 = vmax.f32 %v546_v41, 0.0  ;;  %v547_v46 = vadd.f32 %v1001_v29, %v524_v42 }
 0x205   :  { %v727_v47 = vpack.c.bf16 %v564_v43, %v564_v43  ;;  %v565_v48 = vmax.f32 %v549_v44, 0.0 }
 0x206   :  { %v725_v49 = vpack.c.bf16 %v562_v45, %v562_v45  ;;  %v563_v50 = vmax.f32 %v547_v46, 0.0  ;;  %v758_v51 = vpop.f32.mrb[20].mxu1 }
 0x207   :  { %645 = vst.msk [vmem:[%s1106_s7 + $0x28] sm:$0xf] %vm634_vm1, %v727_v47  ;;  %v728_v52 = vpack.c.bf16 %v565_v48, %v565_v48  ;;  %v529_v53 = vmul.f32 %v758_v51, %v996_v56  ;;  %v493_v55 = vpop.f32.mrb[21].mxu1 }
 0x208   :  { %643 = vst.msk [vmem:[%s1106_s7 + $0x20] sm:$0xf] %vm634_vm1, %v725_v49  ;;  %v726_v27 = vpack.c.bf16 %v563_v50, %v563_v50  ;;  %v527_v57 = vmul.f32 %v996_v56, %v493_v55  ;;  %v759_v58 = vpop.f32.mrb[22].mxu1 }
 0x209   :  { %646 = vst.msk [vmem:[%s1106_s7 + $0x2c] sm:$0xf] %vm634_vm1, %v728_v52  ;;  %v552_v59 = vadd.f32 %v1001_v29, %v529_v53  ;;  %v530_v60 = vmul.f32 %v759_v58, %v996_v56  ;;  %v496_v54 = vpop.f32.mrb[23].mxu1 }
 0x20a   :  { %644 = vst.msk [vmem:[%s1106_s7 + $0x24] sm:$0xf] %vm634_vm1, %v726_v27  ;;  %v550_v61 = vadd.f32 %v1001_v29, %v527_v57  ;;  %v528_v62 = vmul.f32 %v996_v56, %v496_v54 }
 0x20b   :  { %v568_v63 = vmax.f32 %v552_v59, 0.0  ;;  %v553_v0 = vadd.f32 %v1001_v29, %v530_v60 }
 0x20c   :  { %v566_v1 = vmax.f32 %v550_v61, 0.0  ;;  %v551_v2 = vadd.f32 %v1001_v29, %v528_v62 }
 0x20d   :  { %v731_v3 = vpack.c.bf16 %v568_v63, %v568_v63  ;;  %v569_v4 = vmax.f32 %v553_v0, 0.0 }
 0x20e   :  { %v729_v5 = vpack.c.bf16 %v566_v1, %v566_v1  ;;  %v567_v6 = vmax.f32 %v551_v2, 0.0 }
 0x20f   :  { %649 = vst.msk [vmem:[%s1106_s7 + $0x38] sm:$0xf] %vm634_vm1, %v731_v3  ;;  %v732_v7 = vpack.c.bf16 %v569_v4, %v569_v4 }
 0x210   :  { %647 = vst.msk [vmem:[%s1106_s7 + $0x30] sm:$0xf] %vm634_vm1, %v729_v5  ;;  %v730_v56 = vpack.c.bf16 %v567_v6, %v567_v6 }
 0x211   :  { %650 = vst.msk [vmem:[%s1106_s7 + $0x3c] sm:$0xf] %vm634_vm1, %v732_v7 }
 0x212   :  { %648 = vst.msk [vmem:[%s1106_s7 + $0x34] sm:$0xf] %vm634_vm1, %v730_v56 }

// kernel: _lambda_.17
= control target key start
LH: loop header
LB: loop body
LE: loop exit
PB: predicated region body
PF: predicated region fallthrough
CT: control target
= control target key end

     0   :  { %v375_v0 = vmov 0   ;;  %vm121_vm0 = vcmask 130048   ;;  %vm310_vm1 = vcmask 257024   ;;  %s486_s1 = inlined_call_operand.vmem [shape: bf16[144,16], index: 1, kind: input, shape index: {}]   ;;  %s487_s0 = inlined_call_operand.vmem [shape: bf16[32,144], index: 0, kind: input, shape index: {}]   ;;  %s488_s4 = inlined_call_operand.vmem [shape: bf16[16,32], index: 4, kind: input, shape index: {}]   ;;  %s489_s2 = inlined_call_operand.vmem [shape: f32[1,16], index: 2, kind: input, shape index: {}]   ;;  %s490_s3 = inlined_call_operand.vmem [shape: f32[1,16], index: 3, kind: input, shape index: {}]   ;;  %s491_s5 = inlined_call_operand.vmem [shape: f32[1,32], index: 5, kind: input, shape index: {}]   ;;  %s492_s6 = inlined_call_operand.vmem [shape: f32[1,32], index: 6, kind: input, shape index: {}]   ;;  %s493_s7 = inlined_call_operand.vmem [shape: bf16[32,32], index: 7, kind: output, shape index: {}]  }
   0x1   :  { %128 = vmatprep.subr.bf16.mxu0 %v375_v0  ;;  %v359_v1 = vld [vmem:[%s486_s1] sm:$0xff]   ;;  %v360_v2 = vld [vmem:[%s486_s1 + $0x8] sm:$0xff]   ;;  %v361_v3 = vld [vmem:[%s486_s1 + $0x10] sm:$0xff]  }
   0x2   :  { %129 = vmatpush1.bf16.msra.mxu0 %v359_v1  ;;  %v362_v4 = vld [vmem:[%s486_s1 + $0x18] sm:$0xff]   ;;  %v370_v5 = vld [vmem:[%s487_s0 + $0x4] ss:$8 sps:$4 sm:$0xff]   ;;  %v365_v8 = vld [vmem:[%s486_s1 + $0x30] sm:$0xff]  }
   0x3   :  { %130 = vmatprep.subr.bf16.mxu0 %v375_v0  ;;  %332 = vmatprep.mubr.msk.bf16.mxu0 %vm121_vm0, %v370_v5  ;;  %v363_v6 = vld [vmem:[%s486_s1 + $0x20] sm:$0xff]   ;;  %v364_v7 = vld [vmem:[%s486_s1 + $0x28] sm:$0xff]   ;;  %v366_v9 = vld [vmem:[%s486_s1 + $0x38] sm:$0xff]  }
   0x4   :  { %v367_v10 = vld [vmem:[%s486_s1 + $0x40] sm:$0xff]   ;;  %v371_v12 = vld [vmem:[%s487_s0 + $0x14] ss:$8 sps:$4 sm:$0xff]   ;;  %v373_v13 = vld [vmem:[%s487_s0 + $0x10] ss:$8 sps:$4 sm:$0xff]  }
   0x5   :  { %v368_v11 = vld [vmem:[%s487_s0] ss:$8 sps:$4 sm:$0xff]  }
   0x6   :  { %131 = vmatpush1.bf16.msra.mxu0 %v360_v2  ;;  %v374_v14 = vld [vmem:[%s488_s4] sm:$0xff]  }
   0x7   :  { %132 = vmatprep.subr.bf16.mxu0 %v375_v0  ;;  %352 = vmatprep.subr.bf16.mxu1 %v374_v14  ;;  %v334_v15 = vld [vmem:[%s489_s2] ss:$0 sm:$0xff] }
   0x8   :  { %353 = vmatpush3.bf16.msra.mxu1 %v374_v14  ;;  %v335_v17 = vld [vmem:[%s490_s3] ss:$0 sm:$0xff] }
   0x9   :  { %v339_v39 = vld [vmem:[%s491_s5] ss:$0 sm:$0xff] }
   0xa   :  { %133 = vmatpush1.bf16.msra.mxu0 %v361_v3  ;;  %v340_v41 = vld [vmem:[%s492_s6] ss:$0 sm:$0xff] }
   0xb   :  { %134 = vmatprep.subr.bf16.mxu0 %v375_v0 }
   0xe   :  { %135 = vmatpush1.bf16.msra.mxu0 %v362_v4 }
   0xf   :  { %136 = vmatprep.subr.bf16.mxu0 %v375_v0 }
  0x12   :  { %137 = vmatpush1.bf16.msra.mxu0 %v363_v6 }
  0x13   :  { %138 = vmatprep.subr.bf16.mxu0 %v375_v0 }
  0x16   :  { %139 = vmatpush1.bf16.msra.mxu0 %v364_v7 }
  0x17   :  { %140 = vmatprep.subr.bf16.mxu0 %v375_v0 }
  0x1a   :  { %141 = vmatpush1.bf16.msra.mxu0 %v365_v8 }
  0x1b   :  { %142 = vmatprep.subr.bf16.mxu0 %v375_v0 }
  0x1e   :  { %143 = vmatpush1.bf16.msra.mxu0 %v366_v9 }
  0x1f   :  { %144 = vmatprep.subr.bf16.mxu0 %v375_v0 }
  0x22   :  { %145 = vmatpush1.bf16.msra.mxu0 %v367_v10 }
  0x25   :  { %161 = vmatmul.mubr.bf16.vlgmr.msra.gmra.mrb[0].mxu0 %v368_v11 }
  0x26   :  { %333 = vmatprep.mubr.msk.bf16.mxu0 %vm121_vm0, %v371_v12 }
  0x2d   :  { %169 = vmatmul.mubr.bf16.gmra.mrb[4].mxu0 %v373_v13 }
  0xf8   :  { %v162_v16 = vpop.f32.mrb[0].mxu0 }
  0xf9   :  { %v184_v18 = vmul.f32 %v334_v15, %v162_v16  ;;  %v164_v19 = vpop.f32.mrb[1].mxu0 }
  0xfa   :  { %v165_v20 = vpop.f32.mrb[2].mxu0 }
  0xfb   :  { %v195_v21 = vadd.f32 %v335_v17, %v184_v18  ;;  %v185_v22 = vmul.f32 %v334_v15, %v165_v20  ;;  %v167_v23 = vpop.f32.mrb[3].mxu0 }
  0xfd   :  { %v196_v24 = vadd.f32 %v335_v17, %v185_v22  ;;  %v199_v25 = vmax.f32 %v195_v21, 0.0 }
  0xff   :  { %v200_v26 = vmax.f32 %v196_v24, 0.0 }
 0x100   :  { %v170_v27 = vpop.f32.mrb[4].mxu0 }
 0x101   :  { %v186_v28 = vmul.f32 %v334_v15, %v170_v27  ;;  %v172_v29 = vpop.f32.mrb[5].mxu0  ;;  %v203_v30 = vpack.c.bf16 %v200_v26, %v199_v25 }
 0x102   :  { %v173_v31 = vpop.f32.mrb[6].mxu0 }
 0x103   :  { %v197_v32 = vadd.f32 %v335_v17, %v186_v28  ;;  %v187_v33 = vmul.f32 %v334_v15, %v173_v31  ;;  %v175_v34 = vpop.f32.mrb[7].mxu0  ;;  %354 = vmatprep.mubr.msk.bf16.mxu1 %vm121_vm0, %v203_v30 }
 0x105   :  { %v198_v35 = vadd.f32 %v335_v17, %v187_v33  ;;  %v201_v36 = vmax.f32 %v197_v32, 0.0 }
 0x107   :  { %v202_v37 = vmax.f32 %v198_v35, 0.0 }
 0x109   :  { %v204_v38 = vpack.c.bf16 %v202_v37, %v201_v36 }
 0x10b   :  { %355 = vmatmul.mubr.msk.bf16.vlgmr.msra.gmra.mrb[0].mxu1 %vm121_vm0, %v204_v38 }
 0x1de   :  { %v356_v40 = vpop.f32.mrb[0].mxu1 }
 0x1df   :  { %v277_v42 = vmul.f32 %v356_v40, %v339_v39  ;;  %v253_v43 = vpop.f32.mrb[1].mxu1 }
 0x1e0   :  { %v275_v44 = vmul.f32 %v339_v39, %v253_v43  ;;  %v357_v45 = vpop.f32.mrb[2].mxu1 }
 0x1e1   :  { %v288_v46 = vadd.f32 %v340_v41, %v277_v42  ;;  %v278_v47 = vmul.f32 %v357_v45, %v339_v39  ;;  %v256_v48 = vpop.f32.mrb[3].mxu1 }
 0x1e2   :  { %v286_v49 = vadd.f32 %v340_v41, %v275_v44  ;;  %v276_v50 = vmul.f32 %v339_v39, %v256_v48 }
 0x1e3   :  { %v292_v51 = vmax.f32 %v288_v46, 0.0  ;;  %v289_v52 = vadd.f32 %v340_v41, %v278_v47 }
 0x1e4   :  { %v290_v53 = vmax.f32 %v286_v49, 0.0  ;;  %v287_v54 = vadd.f32 %v340_v41, %v276_v50 }
 0x1e5   :  { %v347_v55 = vpack.c.bf16 %v292_v51, %v292_v51  ;;  %v293_v56 = vmax.f32 %v289_v52, 0.0 }
 0x1e6   :  { %v345_v57 = vpack.c.bf16 %v290_v53, %v290_v53  ;;  %v291_v58 = vmax.f32 %v287_v54, 0.0 }
 0x1e7   :  { %313 = vst.msk [vmem:[%s493_s7 + $0x8] sm:$0xf] %vm310_vm1, %v347_v55  ;;  %v348_v59 = vpack.c.bf16 %v293_v56, %v293_v56 }
 0x1e8   :  { %311 = vst.msk [vmem:[%s493_s7] sm:$0xf] %vm310_vm1, %v345_v57  ;;  %v346_v60 = vpack.c.bf16 %v291_v58, %v291_v58 }
 0x1e9   :  { %314 = vst.msk [vmem:[%s493_s7 + $0xc] sm:$0xf] %vm310_vm1, %v348_v59 }
 0x1ea   :  { %312 = vst.msk [vmem:[%s493_s7 + $0x4] sm:$0xf] %vm310_vm1, %v346_v60 }

// kernel: _lambda_.18
= control target key start
LH: loop header
LB: loop body
LE: loop exit
PB: predicated region body
PF: predicated region fallthrough
CT: control target
= control target key end

     0   :  { %vm209_vm0 = vcmask 261120   ;;  %vm455_vm1 = vcmask 257024   ;;  %s732_s1 = inlined_call_operand.vmem [shape: bf16[288,32], index: 1, kind: input, shape index: {}]   ;;  %s733_s0 = inlined_call_operand.vmem [shape: bf16[32,288], index: 0, kind: input, shape index: {}]   ;;  %s734_s4 = inlined_call_operand.vmem [shape: bf16[32,32], index: 4, kind: input, shape index: {}]   ;;  %s735_s2 = inlined_call_operand.vmem [shape: f32[1,32], index: 2, kind: input, shape index: {}]   ;;  %s736_s3 = inlined_call_operand.vmem [shape: f32[1,32], index: 3, kind: input, shape index: {}]   ;;  %s737_s5 = inlined_call_operand.vmem [shape: f32[1,32], index: 5, kind: input, shape index: {}]   ;;  %s738_s6 = inlined_call_operand.vmem [shape: f32[1,32], index: 6, kind: input, shape index: {}]   ;;  %s739_s7 = inlined_call_operand.vmem [shape: bf16[32,32], index: 7, kind: output, shape index: {}]  }
   0x1   :  { %v558_v0 = vld [vmem:[%s732_s1 + $0x40] sm:$0xff]   ;;  %v560_v2 = vld [vmem:[%s732_s1 + $0x48] sm:$0xff]   ;;  %v562_v4 = vld [vmem:[%s732_s1 + $0x50] sm:$0xff]  }
   0x2   :  { %v559_v1 = vld [vmem:[%s732_s1] sm:$0xff]   ;;  %506 = vmatprep.subr.bf16.mxu0 %v558_v0  ;;  %v561_v3 = vld [vmem:[%s732_s1 + $0x8] sm:$0xff]   ;;  %v563_v5 = vld [vmem:[%s732_s1 + $0x10] sm:$0xff]  }
   0x3   :  { %507 = vmatpush3.bf16.msra.mxu0 %v559_v1  ;;  %v564_v6 = vld [vmem:[%s732_s1 + $0x58] sm:$0xff]   ;;  %v566_v8 = vld [vmem:[%s732_s1 + $0x60] sm:$0xff]   ;;  %v568_v11 = vld [vmem:[%s732_s1 + $0x68] sm:$0xff]  }
   0x4   :  { %508 = vmatprep.subr.bf16.mxu0 %v560_v2  ;;  %v565_v7 = vld [vmem:[%s732_s1 + $0x18] sm:$0xff]   ;;  %v572_v9 = vld [vmem:[%s732_s1 + $0x80] sm:$0xff]   ;;  %v569_v12 = vld [vmem:[%s732_s1 + $0x28] sm:$0xff]  }
   0x5   :  { %v567_v10 = vld [vmem:[%s732_s1 + $0x20] sm:$0xff]   ;;  %542 = vmatprep.subr.bf16.mxu1 %v572_v9  ;;  %v575_v13 = vld [vmem:[%s732_s1 + $0x88] sm:$0xff]   ;;  %v570_v14 = vld [vmem:[%s732_s1 + $0x70] sm:$0xff]  }
   0x6   :  { %543 = vmatpush3.bf16.msra.mxu1 %v572_v9  ;;  %v578_v15 = vld [vmem:[%s733_s0 + $0x4] ss:$12 sps:$4 sm:$0xff]   ;;  %v579_v16 = vld [vmem:[%s733_s0 + $0x8] ss:$12 sps:$4 sm:$0xff]   ;;  %v580_v17 = vld [vmem:[%s733_s0 + $0x20] ss:$12 sps:$4 sm:$0xff]  }
   0x7   :  { %509 = vmatpush3.bf16.msra.mxu0 %v561_v3  ;;  %544 = vmatprep.subr.bf16.mxu1 %v575_v13  ;;  %v571_v18 = vld [vmem:[%s732_s1 + $0x30] sm:$0xff]   ;;  %v573_v19 = vld [vmem:[%s732_s1 + $0x78] sm:$0xff]   ;;  %v576_v21 = vld [vmem:[%s733_s0] ss:$12 sps:$4 sm:$0xff]  }
   0x8   :  { %510 = vmatprep.subr.bf16.mxu0 %v562_v4  ;;  %248 = vmatprep.mubr.bf16.mxu0 %v578_v15  ;;  %v574_v20 = vld [vmem:[%s732_s1 + $0x38] sm:$0xff]   ;;  %v584_v24 = vld [vmem:[%s734_s4] sm:$0xff]   ;;  %v585_v25 = vld [vmem:[%s734_s4 + $0x8] sm:$0xff]  }
   0x9   :  { %546 = vmatprep.mubr.msk.bf16.mxu1 %vm209_vm0, %v579_v16  ;;  %v581_v22 = vld [vmem:[%s733_s0 + $0x1c] ss:$12 sps:$4 sm:$0xff]   ;;  %v583_v23 = vld [vmem:[%s733_s0 + $0x18] ss:$12 sps:$4 sm:$0xff]   ;;  %v490_v35 = vld [vmem:[%s735_s2] ss:$0 sm:$0xff] }
   0xa   :  { %545 = vmatpush3.bf16.msra.mxu1 %v575_v13  ;;  %v491_v38 = vld [vmem:[%s736_s3] ss:$0 sm:$0xff] }
   0xb   :  { %511 = vmatpush3.bf16.msra.mxu0 %v563_v5  ;;  %550 = vmatprep.subr.bf16.mxu1 %v584_v24  ;;  %v496_v62 = vld [vmem:[%s737_s5] ss:$0 sm:$0xff] }
   0xc   :  { %512 = vmatprep.subr.bf16.mxu0 %v564_v6  ;;  %v497_v0 = vld [vmem:[%s738_s6] ss:$0 sm:$0xff] }
   0xd   :  { %547 = vmatmul.mubr.msk.bf16.vlgmr.msra.gmra.mrb[0].mxu1 %vm209_vm0, %v580_v17 }
   0xe   :  { %551 = vmatpush3.bf16.msra.mxu1 %v584_v24 }
   0xf   :  { %513 = vmatpush3.bf16.msra.mxu0 %v565_v7  ;;  %552 = vmatprep.subr.bf16.mxu1 %v585_v25 }
  0x10   :  { %514 = vmatprep.subr.bf16.mxu0 %v566_v8 }
  0x12   :  { %553 = vmatpush3.bf16.msra.mxu1 %v585_v25 }
  0x13   :  { %515 = vmatpush3.bf16.msra.mxu0 %v567_v10 }
  0x14   :  { %516 = vmatprep.subr.bf16.mxu0 %v568_v11 }
  0x17   :  { %517 = vmatpush3.bf16.msra.mxu0 %v569_v12 }
  0x18   :  { %518 = vmatprep.subr.bf16.mxu0 %v570_v14 }
  0x1b   :  { %519 = vmatpush3.bf16.msra.mxu0 %v571_v18 }
  0x1c   :  { %520 = vmatprep.subr.bf16.mxu0 %v573_v19 }
  0x1f   :  { %521 = vmatpush3.bf16.msra.mxu0 %v574_v20 }
  0x22   :  { %249 = vmatmul.mubr.bf16.vlgmr.msra.gmra.mrb[0].mxu0 %v576_v21 }
  0x23   :  { %256 = vmatprep.mubr.bf16.mxu0 %v581_v22 }
  0x2a   :  { %257 = vmatmul.mubr.bf16.gmra.mrb[4].mxu0 %v583_v23 }
  0xe0   :  { %v548_v26 = vpop.f32.mrb[0].mxu1 }
  0xe1   :  { %v299_v27 = vpop.f32.mrb[1].mxu1 }
  0xe2   :  { %v549_v28 = vpop.f32.mrb[2].mxu1 }
  0xe3   :  { %v302_v29 = vpop.f32.mrb[3].mxu1 }
  0xf5   :  { %v522_v30 = vpop.f32.mrb[0].mxu0 }
  0xf6   :  { %v523_v31 = vpop.f32.mrb[1].mxu0 }
  0xf7   :  { %v524_v32 = vadd.f32 %v523_v31, %v522_v30  ;;  %v525_v33 = vpop.f32.mrb[2].mxu0 }
  0xf8   :  { %v526_v34 = vpop.f32.mrb[3].mxu0 }
  0xf9   :  { %v527_v36 = vadd.f32 %v526_v34, %v525_v33  ;;  %v300_v37 = vadd.f32 %v524_v32, %v299_v27 }
  0xfb   :  { %v321_v39 = vmul.f32 %v490_v35, %v300_v37  ;;  %v303_v40 = vadd.f32 %v527_v36, %v302_v29 }
  0xfd   :  { %v332_v41 = vadd.f32 %v491_v38, %v321_v39  ;;  %v322_v42 = vmul.f32 %v490_v35, %v303_v40  ;;  %v528_v43 = vpop.f32.mrb[4].mxu0 }
  0xfe   :  { %v529_v44 = vpop.f32.mrb[5].mxu0 }
  0xff   :  { %v333_v45 = vadd.f32 %v491_v38, %v322_v42  ;;  %v530_v46 = vadd.f32 %v529_v44, %v528_v43  ;;  %v531_v47 = vpop.f32.mrb[6].mxu0  ;;  %v336_v49 = vmax.f32 %v332_v41, 0.0 }
 0x100   :  { %v532_v48 = vpop.f32.mrb[7].mxu0 }
 0x101   :  { %v337_v50 = vmax.f32 %v333_v45, 0.0  ;;  %v308_v51 = vadd.f32 %v548_v26, %v530_v46  ;;  %v533_v52 = vadd.f32 %v532_v48, %v531_v47 }
 0x103   :  { %v340_v53 = vpack.c.bf16 %v337_v50, %v336_v49  ;;  %v323_v54 = vmul.f32 %v490_v35, %v308_v51  ;;  %v311_v55 = vadd.f32 %v549_v28, %v533_v52 }
 0x105   :  { %v334_v56 = vadd.f32 %v491_v38, %v323_v54  ;;  %v324_v57 = vmul.f32 %v490_v35, %v311_v55  ;;  %554 = vmatprep.mubr.msk.bf16.mxu1 %vm209_vm0, %v340_v53 }
 0x107   :  { %v335_v58 = vadd.f32 %v491_v38, %v324_v57  ;;  %v338_v59 = vmax.f32 %v334_v56, 0.0 }
 0x109   :  { %v339_v60 = vmax.f32 %v335_v58, 0.0 }
 0x10b   :  { %v341_v61 = vpack.c.bf16 %v339_v60, %v338_v59 }
 0x10d   :  { %555 = vmatmul.mubr.msk.bf16.vlgmr.msra.gmra.mrb[4].mxu1 %vm209_vm0, %v341_v61 }
 0x1e0   :  { %v556_v63 = vpop.f32.mrb[4].mxu1 }
 0x1e1   :  { %v422_v1 = vmul.f32 %v556_v63, %v496_v62  ;;  %v398_v2 = vpop.f32.mrb[5].mxu1 }
 0x1e2   :  { %v420_v3 = vmul.f32 %v496_v62, %v398_v2  ;;  %v557_v4 = vpop.f32.mrb[6].mxu1 }
 0x1e3   :  { %v433_v5 = vadd.f32 %v497_v0, %v422_v1  ;;  %v423_v6 = vmul.f32 %v557_v4, %v496_v62  ;;  %v401_v7 = vpop.f32.mrb[7].mxu1 }
 0x1e4   :  { %v431_v8 = vadd.f32 %v497_v0, %v420_v3  ;;  %v421_v9 = vmul.f32 %v496_v62, %v401_v7 }
 0x1e5   :  { %v437_v10 = vmax.f32 %v433_v5, 0.0  ;;  %v434_v11 = vadd.f32 %v497_v0, %v423_v6 }
 0x1e6   :  { %v435_v12 = vmax.f32 %v431_v8, 0.0  ;;  %v432_v13 = vadd.f32 %v497_v0, %v421_v9 }
 0x1e7   :  { %v504_v14 = vpack.c.bf16 %v437_v10, %v437_v10  ;;  %v438_v15 = vmax.f32 %v434_v11, 0.0 }
 0x1e8   :  { %v502_v16 = vpack.c.bf16 %v435_v12, %v435_v12  ;;  %v436_v17 = vmax.f32 %v432_v13, 0.0 }
 0x1e9   :  { %458 = vst.msk [vmem:[%s739_s7 + $0x8] sm:$0xf] %vm455_vm1, %v504_v14  ;;  %v505_v18 = vpack.c.bf16 %v438_v15, %v438_v15 }
 0x1ea   :  { %456 = vst.msk [vmem:[%s739_s7] sm:$0xf] %vm455_vm1, %v502_v16  ;;  %v503_v19 = vpack.c.bf16 %v436_v17, %v436_v17 }
 0x1eb   :  { %459 = vst.msk [vmem:[%s739_s7 + $0xc] sm:$0xf] %vm455_vm1, %v505_v18 }
 0x1ec   :  { %457 = vst.msk [vmem:[%s739_s7 + $0x4] sm:$0xf] %vm455_vm1, %v503_v19 }

// kernel: _lambda_.19
= control target key start
LH: loop header
LB: loop body
LE: loop exit
PB: predicated region body
PF: predicated region fallthrough
CT: control target
= control target key end

     0   :  { %v466_v1 = vmov 0.0   ;;  %vm467_vm0 = vmmov 0   ;;  %vm183_vm1 = vcmask 261120   ;;  %vm362_vm2 = vcmask 257024   ;;  %s593_s1 = inlined_call_operand.vmem [shape: bf16[288,32], index: 1, kind: input, shape index: {}]   ;;  %s594_s0 = inlined_call_operand.vmem [shape: bf16[8,288], index: 0, kind: input, shape index: {}]   ;;  %s595_s4 = inlined_call_operand.vmem [shape: bf16[32,32], index: 4, kind: input, shape index: {}]   ;;  %s596_s2 = inlined_call_operand.vmem [shape: f32[1,32], index: 2, kind: input, shape index: {}]   ;;  %s597_s3 = inlined_call_operand.vmem [shape: f32[1,32], index: 3, kind: input, shape index: {}]   ;;  %s598_s5 = inlined_call_operand.vmem [shape: f32[1,32], index: 5, kind: input, shape index: {}]   ;;  %s599_s6 = inlined_call_operand.vmem [shape: f32[1,32], index: 6, kind: input, shape index: {}]   ;;  %s600_s7 = inlined_call_operand.vmem [shape: bf16[8,32], index: 7, kind: output, shape index: {}]  }
   0x1   :  { %v443_v0 = vld [vmem:[%s593_s1 + $0x40] sm:$0xff]   ;;  %425 = vmatprep.subr.bf16.mxu1 %v466_v1  ;;  %429 = vmatprep.mubr.msk.bf16.mxu1 %vm467_vm0, %v466_v1  ;;  %v445_v3 = vld [vmem:[%s593_s1 + $0x48] sm:$0xff]   ;;  %v447_v5 = vld [vmem:[%s593_s1 + $0x50] sm:$0xff]  }
   0x2   :  { %v444_v2 = vld [vmem:[%s593_s1] sm:$0xff]   ;;  %397 = vmatprep.subr.bf16.mxu0 %v443_v0  ;;  %v446_v4 = vld [vmem:[%s593_s1 + $0x8] sm:$0xff]   ;;  %v448_v6 = vld [vmem:[%s593_s1 + $0x10] sm:$0xff]  }
   0x3   :  { %398 = vmatpush3.bf16.msra.mxu0 %v444_v2  ;;  %v449_v7 = vld [vmem:[%s593_s1 + $0x58] sm:$0xff]   ;;  %v451_v9 = vld [vmem:[%s593_s1 + $0x60] sm:$0xff]   ;;  %v453_v12 = vld [vmem:[%s593_s1 + $0x68] sm:$0xff]  }
   0x4   :  { %399 = vmatprep.subr.bf16.mxu0 %v445_v3  ;;  %v450_v8 = vld [vmem:[%s593_s1 + $0x18] sm:$0xff]   ;;  %v457_v10 = vld [vmem:[%s593_s1 + $0x80] sm:$0xff]   ;;  %v460_v13 = vld [vmem:[%s593_s1 + $0x88] sm:$0xff]  }
   0x5   :  { %v452_v11 = vld [vmem:[%s593_s1 + $0x20] sm:$0xff]   ;;  %426 = vmatpush3.bf16.msra.mxu1 %v457_v10  ;;  %v454_v15 = vld [vmem:[%s593_s1 + $0x28] sm:$0xff]   ;;  %v455_v18 = vld [vmem:[%s593_s1 + $0x70] sm:$0xff]  }
   0x6   :  { %427 = vmatprep.subr.bf16.mxu1 %v466_v1  ;;  %v27_v14 = vld [vmem:[%s594_s0] sm:$0xff]  ;;  %v463_v17 = vld [vmem:[%s594_s0 + $0x8] ss:$0 sps:$4 sm:$0xff]   ;;  %v456_v19 = vld [vmem:[%s593_s1 + $0x30] sm:$0xff]  }
   0x7   :  { %400 = vmatpush3.bf16.msra.mxu0 %v446_v4  ;;  %v369_v16 = vcombine.high %v27_v14, %v27_v14  ;;  %v458_v20 = vld [vmem:[%s593_s1 + $0x78] sm:$0xff]   ;;  %v368_v22 = vcombine.low %v27_v14, %v27_v14  ;;  %v464_v23 = vld [vmem:[%s595_s4] sm:$0xff]   ;;  %v465_v24 = vld [vmem:[%s595_s4 + $0x8] sm:$0xff]  }
   0x8   :  { %401 = vmatprep.subr.bf16.mxu0 %v447_v5  ;;  %v459_v21 = vld [vmem:[%s593_s1 + $0x38] sm:$0xff]   ;;  %v390_v33 = vld [vmem:[%s596_s2] ss:$0 sm:$0xff] }
   0x9   :  { %428 = vmatpush3.bf16.msra.mxu1 %v460_v13  ;;  %219 = vmatprep.mubr.bf16.mxu0 %v369_v16  ;;  %v391_v36 = vld [vmem:[%s597_s3] ss:$0 sm:$0xff] }
   0xa   :  { %433 = vmatprep.subr.bf16.mxu1 %v466_v1  ;;  %v395_v41 = vld [vmem:[%s598_s5] ss:$0 sm:$0xff] }
   0xb   :  { %402 = vmatpush3.bf16.msra.mxu0 %v448_v6  ;;  %v396_v43 = vld [vmem:[%s599_s6] ss:$0 sm:$0xff] }
   0xc   :  { %403 = vmatprep.subr.bf16.mxu0 %v449_v7  ;;  %430 = vmatmul.mubr.msk.bf16.vlgmr.msra.gmra.mrb[0].mxu1 %vm183_vm1, %v463_v17 }
   0xd   :  { %437 = vmatprep.mubr.msk.bf16.mxu1 %vm467_vm0, %v466_v1  ;;  %434 = vmatpush3.bf16.msra.mxu1 %v464_v23 }
   0xe   :  { %435 = vmatprep.subr.bf16.mxu1 %v466_v1 }
   0xf   :  { %404 = vmatpush3.bf16.msra.mxu0 %v450_v8 }
  0x10   :  { %405 = vmatprep.subr.bf16.mxu0 %v451_v9 }
  0x11   :  { %436 = vmatpush3.bf16.msra.mxu1 %v465_v24 }
  0x13   :  { %406 = vmatpush3.bf16.msra.mxu0 %v452_v11 }
  0x14   :  { %407 = vmatprep.subr.bf16.mxu0 %v453_v12 }
  0x17   :  { %408 = vmatpush3.bf16.msra.mxu0 %v454_v15 }
  0x18   :  { %409 = vmatprep.subr.bf16.mxu0 %v455_v18 }
  0x1b   :  { %410 = vmatpush3.bf16.msra.mxu0 %v456_v19 }
  0x1c   :  { %411 = vmatprep.subr.bf16.mxu0 %v458_v20 }
  0x1f   :  { %412 = vmatpush3.bf16.msra.mxu0 %v459_v21 }
  0x22   :  { %220 = vmatmul.mubr.bf16.vlgmr.msra.gmra.mrb[0].mxu0 %v368_v22 }
  0xdf   :  { %v261_v25 = vpop.f32.mrb[0].mxu1 }
  0xe0   :  { %v431_v26 = vpop.f32.mrb[1].mxu1 }
  0xe1   :  { %v264_v27 = vpop.f32.mrb[2].mxu1 }
  0xe2   :  { %v432_v28 = vpop.f32.mrb[3].mxu1 }
  0xf5   :  { %v413_v29 = vpop.f32.mrb[0].mxu0 }
  0xf6   :  { %v414_v30 = vpop.f32.mrb[1].mxu0 }
  0xf7   :  { %v415_v31 = vadd.f32 %v414_v30, %v413_v29  ;;  %v416_v32 = vpop.f32.mrb[2].mxu0 }
  0xf8   :  { %v417_v34 = vpop.f32.mrb[3].mxu0 }
  0xf9   :  { %v262_v35 = vadd.f32 %v415_v31, %v261_v25 }
  0xfb   :  { %v274_v37 = vmul.f32 %v390_v33, %v262_v35 }
  0xfd   :  { %v282_v38 = vadd.f32 %v391_v36, %v274_v37 }
  0xff   :  { %v283_v39 = vmax.f32 %v282_v38, 0.0 }
 0x101   :  { %v284_v40 = vpack.c.bf16 %v283_v39, %v283_v39 }
 0x103   :  { %438 = vmatmul.mubr.msk.bf16.vlgmr.msra.gmra.mrb[4].mxu1 %vm183_vm1, %v284_v40 }
 0x1d6   :  { %v338_v42 = vpop.f32.mrb[4].mxu1 }
 0x1d7   :  { %v351_v44 = vmul.f32 %v395_v41, %v338_v42  ;;  %v439_v45 = vpop.f32.mrb[5].mxu1 }
 0x1d8   :  { %v341_v46 = vpop.f32.mrb[6].mxu1 }
 0x1d9   :  { %v359_v47 = vadd.f32 %v396_v43, %v351_v44  ;;  %v440_v48 = vpop.f32.mrb[7].mxu1 }
 0x1db   :  { %v360_v49 = vmax.f32 %v359_v47, 0.0 }
 0x1dd   :  { %v361_v50 = vpack.c.bf16 %v360_v49, %v360_v49 }
 0x1df   :  { %363 = vst.msk [vmem:[%s600_s7] sm:$0xf] %vm362_vm2, %v361_v50 }

// kernel: _lambda_.24
= control target key start
LH: loop header
LB: loop body
LE: loop exit
PB: predicated region body
PF: predicated region fallthrough
CT: control target
= control target key end

     0   :  { %v477_v1 = vmov 0.0   ;;  %vm478_vm0 = vmmov 0   ;;  %v479_v7 = vmov 1966171168   ;;  %v76_v9 = vlaneseq  ;;  %s602_s1 = inlined_call_operand.vmem [shape: bf16[288,32], index: 1, kind: input, shape index: {}]   ;;  %s603_s0 = inlined_call_operand.vmem [shape: bf16[2,288], index: 0, kind: input, shape index: {}]   ;;  %s604_s4 = inlined_call_operand.vmem [shape: bf16[32,32], index: 4, kind: input, shape index: {}]   ;;  %s605_s2 = inlined_call_operand.vmem [shape: f32[1,32], index: 2, kind: input, shape index: {}]   ;;  %s606_s3 = inlined_call_operand.vmem [shape: f32[1,32], index: 3, kind: input, shape index: {}]   ;;  %s607_s5 = inlined_call_operand.vmem [shape: f32[1,32], index: 5, kind: input, shape index: {}]   ;;  %s608_s6 = inlined_call_operand.vmem [shape: f32[1,32], index: 6, kind: input, shape index: {}]   ;;  %s609_s7 = inlined_call_operand.vmem [shape: bf16[2,32], index: 7, kind: output, shape index: {}]  }
   0x1   :  { %v457_v0 = vld [vmem:[%s602_s1 + $0x40] sm:$0xff]   ;;  %438 = vmatprep.subr.bf16.mxu1 %v477_v1  ;;  %442 = vmatprep.mubr.msk.bf16.mxu1 %vm478_vm0, %v477_v1  ;;  %v459_v3 = vld [vmem:[%s602_s1 + $0x48] sm:$0xff]   ;;  %v461_v5 = vld [vmem:[%s602_s1 + $0x50] sm:$0xff]   ;;  %v74_v8 = vunpack.c.l.s4 %v479_v7  ;;  %vm198_vm1 = vcmask 261120   ;;  %vm377_vm2 = vcmask 253952  }
   0x2   :  { %v458_v2 = vld [vmem:[%s602_s1] sm:$0xff]   ;;  %410 = vmatprep.subr.bf16.mxu0 %v457_v0  ;;  %v460_v4 = vld [vmem:[%s602_s1 + $0x8] sm:$0xff]   ;;  %v462_v6 = vld [vmem:[%s602_s1 + $0x10] sm:$0xff]   ;;  %v77_v13 = vshrl.u32 %v76_v9, 7 }
   0x3   :  { %411 = vmatpush3.bf16.msra.mxu0 %v458_v2  ;;  %v463_v10 = vld [vmem:[%s602_s1 + $0x58] sm:$0xff]   ;;  %v75_v12 = vunpack.c.0.s8 %v74_v8  ;;  %v465_v14 = vld [vmem:[%s602_s1 + $0x60] sm:$0xff]   ;;  %v467_v18 = vld [vmem:[%s602_s1 + $0x68] sm:$0xff]  }
   0x4   :  { %412 = vmatprep.subr.bf16.mxu0 %v459_v3  ;;  %v464_v11 = vld [vmem:[%s602_s1 + $0x18] sm:$0xff]   ;;  %v471_v15 = vld [vmem:[%s602_s1 + $0x80] sm:$0xff]   ;;  %v474_v19 = vld [vmem:[%s602_s1 + $0x88] sm:$0xff]  }
   0x5   :  { %v466_v16 = vld [vmem:[%s602_s1 + $0x20] sm:$0xff]   ;;  %v78_v17 = vsub.s32 %v75_v12, %v77_v13  ;;  %439 = vmatpush3.bf16.msra.mxu1 %v471_v15  ;;  %v468_v21 = vld [vmem:[%s602_s1 + $0x28] sm:$0xff]   ;;  %v469_v24 = vld [vmem:[%s602_s1 + $0x70] sm:$0xff]  }
   0x6   :  { %440 = vmatprep.subr.bf16.mxu1 %v477_v1  ;;  %v383_v20 = vld.sshfl [vmem:[%s603_s0] sm:$0x13 pattern:$0x75316420]  ;;  %v470_v27 = vld [vmem:[%s602_s1 + $0x30] sm:$0xff]   ;;  %v472_v28 = vld [vmem:[%s602_s1 + $0x78] sm:$0xff]  }
   0x7   :  { %413 = vmatpush3.bf16.msra.mxu0 %v460_v4  ;;  %v72_v22 = vcombine.high %v383_v20, %v383_v20  ;;  %v79_v23 = vrot.slane %v383_v20, %v78_v17  ;;  %v473_v29 = vld [vmem:[%s602_s1 + $0x38] sm:$0xff]   ;;  %v475_v30 = vld [vmem:[%s604_s4] sm:$0xff]   ;;  %v476_v31 = vld [vmem:[%s604_s4 + $0x8] sm:$0xff]  }
   0x8   :  { %414 = vmatprep.subr.bf16.mxu0 %v461_v5  ;;  %v403_v40 = vld [vmem:[%s605_s2] ss:$0 sm:$0xff] }
   0x9   :  { %441 = vmatpush3.bf16.msra.mxu1 %v474_v19  ;;  %v86_v25 = vrot.slane %v72_v22, %v78_v17  ;;  %v87_v26 = vcombine.high %v79_v23, %v79_v23  ;;  %v404_v43 = vld [vmem:[%s606_s3] ss:$0 sm:$0xff] }
   0xa   :  { %446 = vmatprep.subr.bf16.mxu1 %v477_v1  ;;  %v408_v48 = vld [vmem:[%s607_s5] ss:$0 sm:$0xff] }
   0xb   :  { %415 = vmatpush3.bf16.msra.mxu0 %v462_v6  ;;  %234 = vmatprep.mubr.bf16.mxu0 %v86_v25  ;;  %v409_v50 = vld [vmem:[%s608_s6] ss:$0 sm:$0xff] }
   0xc   :  { %416 = vmatprep.subr.bf16.mxu0 %v463_v10  ;;  %443 = vmatmul.mubr.msk.bf16.vlgmr.msra.gmra.mrb[0].mxu1 %vm198_vm1, %v87_v26 }
   0xd   :  { %450 = vmatprep.mubr.msk.bf16.mxu1 %vm478_vm0, %v477_v1  ;;  %447 = vmatpush3.bf16.msra.mxu1 %v475_v30 }
   0xe   :  { %448 = vmatprep.subr.bf16.mxu1 %v477_v1 }
   0xf   :  { %417 = vmatpush3.bf16.msra.mxu0 %v464_v11 }
  0x10   :  { %418 = vmatprep.subr.bf16.mxu0 %v465_v14 }
  0x11   :  { %449 = vmatpush3.bf16.msra.mxu1 %v476_v31 }
  0x13   :  { %419 = vmatpush3.bf16.msra.mxu0 %v466_v16 }
  0x14   :  { %420 = vmatprep.subr.bf16.mxu0 %v467_v18 }
  0x17   :  { %421 = vmatpush3.bf16.msra.mxu0 %v468_v21 }
  0x18   :  { %422 = vmatprep.subr.bf16.mxu0 %v469_v24 }
  0x1b   :  { %423 = vmatpush3.bf16.msra.mxu0 %v470_v27 }
  0x1c   :  { %424 = vmatprep.subr.bf16.mxu0 %v472_v28 }
  0x1f   :  { %425 = vmatpush3.bf16.msra.mxu0 %v473_v29 }
  0x22   :  { %235 = vmatmul.mubr.bf16.vlgmr.msra.gmra.mrb[0].mxu0 %v79_v23 }
  0xdf   :  { %v276_v32 = vpop.f32.mrb[0].mxu1 }
  0xe0   :  { %v444_v33 = vpop.f32.mrb[1].mxu1 }
  0xe1   :  { %v279_v34 = vpop.f32.mrb[2].mxu1 }
  0xe2   :  { %v445_v35 = vpop.f32.mrb[3].mxu1 }
  0xf5   :  { %v426_v36 = vpop.f32.mrb[0].mxu0 }
  0xf6   :  { %v427_v37 = vpop.f32.mrb[1].mxu0 }
  0xf7   :  { %v428_v38 = vadd.f32 %v427_v37, %v426_v36  ;;  %v429_v39 = vpop.f32.mrb[2].mxu0 }
  0xf8   :  { %v430_v41 = vpop.f32.mrb[3].mxu0 }
  0xf9   :  { %v277_v42 = vadd.f32 %v428_v38, %v276_v32 }
  0xfb   :  { %v289_v44 = vmul.f32 %v403_v40, %v277_v42 }
  0xfd   :  { %v297_v45 = vadd.f32 %v404_v43, %v289_v44 }
  0xff   :  { %v298_v46 = vmax.f32 %v297_v45, 0.0 }
 0x101   :  { %v299_v47 = vpack.c.bf16 %v298_v46, %v298_v46 }
 0x103   :  { %451 = vmatmul.mubr.msk.bf16.vlgmr.msra.gmra.mrb[4].mxu1 %vm198_vm1, %v299_v47 }
 0x1d6   :  { %v353_v49 = vpop.f32.mrb[4].mxu1 }
 0x1d7   :  { %v366_v51 = vmul.f32 %v408_v48, %v353_v49  ;;  %v452_v52 = vpop.f32.mrb[5].mxu1 }
 0x1d8   :  { %v356_v53 = vpop.f32.mrb[6].mxu1 }
 0x1d9   :  { %v374_v54 = vadd.f32 %v409_v50, %v366_v51  ;;  %v453_v55 = vpop.f32.mrb[7].mxu1 }
 0x1db   :  { %v375_v56 = vmax.f32 %v374_v54, 0.0 }
 0x1dd   :  { %v376_v57 = vpack.c.bf16 %v375_v56, %v375_v56 }
 0x1df   :  { %378 = vst.msk [vmem:[%s609_s7] sm:$0x1] %vm377_vm2, %v376_v57 }

// kernel: _lambda_.25
= control target key start
LH: loop header
LB: loop body
LE: loop exit
PB: predicated region body
PF: predicated region fallthrough
CT: control target
= control target key end

     0   :  { %v616_v1 = vmov 0.0   ;;  %vm617_vm0 = vmmov 0   ;;  %v618_v7 = vmov 1966171168   ;;  %v76_v9 = vlaneseq  ;;  %s768_s1 = inlined_call_operand.vmem [shape: bf16[288,32], index: 1, kind: input, shape index: {}]   ;;  %s769_s0 = inlined_call_operand.vmem [shape: bf16[2,288], index: 0, kind: input, shape index: {}]   ;;  %s770_s4 = inlined_call_operand.vmem [shape: bf16[32,512], index: 4, kind: input, shape index: {}]   ;;  %s771_s2 = inlined_call_operand.vmem [shape: f32[1,32], index: 2, kind: input, shape index: {}]   ;;  %s772_s3 = inlined_call_operand.vmem [shape: f32[1,32], index: 3, kind: input, shape index: {}]   ;;  %s773_s5 = inlined_call_operand.vmem [shape: f32[1,512], index: 5, kind: input, shape index: {}]   ;;  %s774_s6 = inlined_call_operand.vmem [shape: f32[1,512], index: 6, kind: input, shape index: {}]   ;;  %s775_s7 = inlined_call_operand.vmem [shape: f32[2,512], index: 7, kind: output, shape index: {}]  }
   0x1   :  { %v586_v0 = vld [vmem:[%s768_s1 + $0x40] sm:$0xff]   ;;  %573 = vmatprep.subr.bf16.mxu1 %v616_v1  ;;  %577 = vmatprep.mubr.msk.bf16.mxu1 %vm617_vm0, %v616_v1  ;;  %v588_v3 = vld [vmem:[%s768_s1 + $0x48] sm:$0xff]   ;;  %v590_v5 = vld [vmem:[%s768_s1 + $0x50] sm:$0xff]   ;;  %v74_v8 = vunpack.c.l.s4 %v618_v7  ;;  %vm198_vm1 = vcmask 261120   ;;  %v619_v35 = vmov 0  }
   0x2   :  { %v587_v2 = vld [vmem:[%s768_s1] sm:$0xff]   ;;  %548 = vmatprep.subr.bf16.mxu0 %v586_v0  ;;  %v589_v4 = vld [vmem:[%s768_s1 + $0x8] sm:$0xff]   ;;  %v591_v6 = vld [vmem:[%s768_s1 + $0x10] sm:$0xff]   ;;  %v685_v13 = vshrl.u32 %v76_v9, 7 }
   0x3   :  { %549 = vmatpush3.bf16.msra.mxu0 %v587_v2  ;;  %v592_v10 = vld [vmem:[%s768_s1 + $0x58] sm:$0xff]   ;;  %v75_v12 = vunpack.c.0.s8 %v74_v8  ;;  %v594_v14 = vld [vmem:[%s768_s1 + $0x60] sm:$0xff]   ;;  %v596_v18 = vld [vmem:[%s768_s1 + $0x68] sm:$0xff]  }
   0x4   :  { %550 = vmatprep.subr.bf16.mxu0 %v588_v3  ;;  %v593_v11 = vld [vmem:[%s768_s1 + $0x18] sm:$0xff]   ;;  %v600_v15 = vld [vmem:[%s768_s1 + $0x80] sm:$0xff]   ;;  %v603_v19 = vld [vmem:[%s768_s1 + $0x88] sm:$0xff]   ;;  %v437_v55 = vsub.s32 0, %v685_v13  ;;  %v441_v57 = vsub.s32 1, %v685_v13  ;;  %v445_v2 = vsub.s32 2, %v685_v13 }
   0x5   :  { %v595_v16 = vld [vmem:[%s768_s1 + $0x20] sm:$0xff]   ;;  %v78_v17 = vsub.s32 %v75_v12, %v685_v13  ;;  %574 = vmatpush3.bf16.msra.mxu1 %v600_v15  ;;  %v597_v21 = vld [vmem:[%s768_s1 + $0x28] sm:$0xff]   ;;  %v598_v24 = vld [vmem:[%s768_s1 + $0x70] sm:$0xff]   ;;  %v620_v12 = vmov 1983009808  }
   0x6   :  { %575 = vmatprep.subr.bf16.mxu1 %v616_v1  ;;  %v516_v20 = vld.sshfl [vmem:[%s769_s0] sm:$0x13 pattern:$0x75316420]  ;;  %v599_v27 = vld [vmem:[%s768_s1 + $0x30] sm:$0xff]   ;;  %v601_v28 = vld [vmem:[%s768_s1 + $0x78] sm:$0xff]  }
   0x7   :  { %551 = vmatpush3.bf16.msra.mxu0 %v589_v4  ;;  %v72_v22 = vcombine.high %v516_v20, %v516_v20  ;;  %v79_v23 = vrot.slane %v516_v20, %v78_v17  ;;  %v602_v29 = vld [vmem:[%s768_s1 + $0x38] sm:$0xff]   ;;  %v604_v30 = vld [vmem:[%s770_s4] ss:$16 sps:$4 sm:$0xff]   ;;  %v606_v31 = vld [vmem:[%s770_s4 + $0x4] ss:$16 sps:$4 sm:$0xff]  }
   0x8   :  { %552 = vmatprep.subr.bf16.mxu0 %v590_v5  ;;  %v609_v32 = vld [vmem:[%s770_s4 + $0x24] ss:$16 sps:$4 sm:$0xff]   ;;  %v607_v33 = vld [vmem:[%s770_s4 + $0x20] ss:$16 sps:$4 sm:$0xff]   ;;  %v612_v34 = vld [vmem:[%s770_s4 + $0xc] ss:$16 sps:$4 sm:$0xff]  }
   0x9   :  { %576 = vmatpush3.bf16.msra.mxu1 %v603_v19  ;;  %v86_v25 = vrot.slane %v72_v22, %v78_v17  ;;  %v87_v26 = vcombine.high %v79_v23, %v79_v23  ;;  %v536_v44 = vld [vmem:[%s771_s2] ss:$0 sm:$0xff]  ;;  %v610_v51 = vld [vmem:[%s770_s4 + $0x8] ss:$16 sps:$4 sm:$0xff]   ;;  %v615_v53 = vld [vmem:[%s770_s4 + $0x2c] ss:$16 sps:$4 sm:$0xff]  }
   0xa   :  { %351 = vmatprep.subr.bf16.mxu1 %v606_v31  ;;  %v537_v47 = vld [vmem:[%s772_s3] ss:$0 sm:$0xff]  ;;  %v613_v54 = vld [vmem:[%s770_s4 + $0x28] ss:$16 sps:$4 sm:$0xff]   ;;  %v449_v5 = vsub.s32 3, %v685_v13 }
   0xb   :  { %553 = vmatpush3.bf16.msra.mxu0 %v591_v6  ;;  %234 = vmatprep.mubr.bf16.mxu0 %v86_v25  ;;  %v433_v56 = vld [vmem:[%s773_s5] sm:$0xf] }
   0xc   :  { %554 = vmatprep.subr.bf16.mxu0 %v592_v10  ;;  %578 = vmatmul.mubr.msk.bf16.vlgmr.msra.gmra.mrb[0].mxu1 %vm198_vm1, %v87_v26  ;;  %v459_v58 = vld [vmem:[%s774_s6] sm:$0xf]  ;;  %v438_v59 = vrot.slane %v433_v56, %v437_v55  ;;  %v442_v60 = vrot.slane %v433_v56, %v441_v57  ;;  %v446_v10 = vrot.slane %v433_v56, %v445_v2 }
   0xd   :  { %352 = vmatpush1.bf16.msra.mxu1 %v604_v30  ;;  %383 = vmatprep.mubr.bf16.mxu1 %v619_v35  ;;  %v464_v61 = vrot.slane %v459_v58, %v437_v55  ;;  %v468_v63 = vrot.slane %v459_v58, %v441_v57  ;;  %v450_v15 = vrot.slane %v433_v56, %v449_v5 }
   0xe   :  { %353 = vmatprep.subr.bf16.mxu1 %v609_v32  ;;  %v476_v19 = vrot.slane %v459_v58, %v449_v5 }
   0xf   :  { %555 = vmatpush3.bf16.msra.mxu0 %v593_v11 }
  0x10   :  { %556 = vmatprep.subr.bf16.mxu0 %v594_v14  ;;  %v496_v14 = vunpack.c.l.s4 %v620_v12 }
  0x11   :  { %354 = vmatpush1.bf16.msra.mxu1 %v607_v33 }
  0x12   :  { %392 = vmatprep.subr.bf16.mxu1 %v612_v34  ;;  %v497_v22 = vunpack.c.0.s8 %v496_v14 }
  0x13   :  { %557 = vmatpush3.bf16.msra.mxu0 %v595_v16  ;;  %v472_v16 = vrot.slane %v459_v58, %v445_v2 }
  0x14   :  { %558 = vmatprep.subr.bf16.mxu0 %v596_v18 }
  0x17   :  { %559 = vmatpush3.bf16.msra.mxu0 %v597_v21 }
  0x18   :  { %560 = vmatprep.subr.bf16.mxu0 %v598_v24 }
  0x1b   :  { %561 = vmatpush3.bf16.msra.mxu0 %v599_v27 }
  0x1c   :  { %562 = vmatprep.subr.bf16.mxu0 %v601_v28 }
  0x1f   :  { %563 = vmatpush3.bf16.msra.mxu0 %v602_v29  ;;  %v500_v29 = vsub.s32 %v497_v22, %v685_v13 }
  0x22   :  { %235 = vmatmul.mubr.bf16.vlgmr.msra.gmra.mrb[0].mxu0 %v79_v23 }
  0xdf   :  { %v276_v36 = vpop.f32.mrb[0].mxu1 }
  0xe0   :  { %v579_v37 = vpop.f32.mrb[1].mxu1 }
  0xe1   :  { %v279_v38 = vpop.f32.mrb[2].mxu1 }
  0xe2   :  { %v580_v39 = vpop.f32.mrb[3].mxu1 }
  0xf5   :  { %v564_v40 = vpop.f32.mrb[0].mxu0 }
  0xf6   :  { %v565_v41 = vpop.f32.mrb[1].mxu0 }
  0xf7   :  { %v566_v42 = vadd.f32 %v565_v41, %v564_v40  ;;  %v567_v43 = vpop.f32.mrb[2].mxu0 }
  0xf8   :  { %v568_v45 = vpop.f32.mrb[3].mxu0 }
  0xf9   :  { %v277_v46 = vadd.f32 %v566_v42, %v276_v36 }
  0xfb   :  { %v289_v48 = vmul.f32 %v536_v44, %v277_v46 }
  0xfd   :  { %v297_v49 = vadd.f32 %v537_v47, %v289_v48 }
  0xff   :  { %v298_v50 = vmax.f32 %v297_v49, 0.0 }
 0x101   :  { %v299_v52 = vpack.c.bf16 %v298_v50, %v298_v50 }
 0x103   :  { %546 = vmatmul.mubr.msk.bf16.vlgmr.msra.gmra.mrb[4].mxu1 %vm198_vm1, %v299_v52 }
 0x104   :  { %393 = vmatpush1.bf16.msra.mxu1 %v610_v51  ;;  %424 = vmatprep.mubr.bf16.mxu1 %v619_v35 }
 0x105   :  { %394 = vmatprep.subr.bf16.mxu1 %v615_v53 }
 0x108   :  { %395 = vmatpush1.bf16.msra.mxu1 %v613_v54 }
 0x10b   :  { %547 = vmatmul.mubr.msk.bf16.vlgmr.msra.gmra.mrb[8].mxu1 %vm198_vm1, %v299_v52 }
 0x1d6   :  { %v385_v62 = vpop.f32.mrb[4].mxu1 }
 0x1d7   :  { %v455_v0 = vmul.f32 %v438_v59, %v385_v62  ;;  %v387_v1 = vpop.f32.mrb[5].mxu1 }
 0x1d8   :  { %v456_v3 = vmul.f32 %v442_v60, %v387_v1  ;;  %v389_v4 = vpop.f32.mrb[6].mxu1 }
 0x1d9   :  { %v481_v6 = vadd.f32 %v464_v61, %v455_v0  ;;  %v390_v7 = vpop.f32.mrb[7].mxu1 }
 0x1da   :  { %v482_v8 = vadd.f32 %v468_v63, %v456_v3 }
 0x1db   :  { %v485_v9 = vmax.f32 %v481_v6, 0.0 }
 0x1dc   :  { %v486_v11 = vmax.f32 %v482_v8, 0.0 }
 0x1de   :  { %v493_v17 = vcombine.low %v485_v9, %v486_v11  ;;  %v426_v18 = vpop.f32.mrb[8].mxu1 }
 0x1df   :  { %v457_v20 = vmul.f32 %v446_v10, %v426_v18  ;;  %v428_v21 = vpop.f32.mrb[9].mxu1 }
 0x1e0   :  { %v458_v23 = vmul.f32 %v450_v15, %v428_v21  ;;  %v430_v24 = vpop.f32.mrb[10].mxu1  ;;  %v501_v32 = vrot.slane %v493_v17, %v500_v29 }
 0x1e1   :  { %v483_v25 = vadd.f32 %v472_v16, %v457_v20  ;;  %v431_v26 = vpop.f32.mrb[11].mxu1 }
 0x1e2   :  { %v484_v27 = vadd.f32 %v476_v19, %v458_v23 }
 0x1e3   :  { %v487_v28 = vmax.f32 %v483_v25, 0.0 }
 0x1e4   :  { %v488_v30 = vmax.f32 %v484_v27, 0.0 }
 0x1e6   :  { %v494_v31 = vcombine.low %v487_v28, %v488_v30 }
 0x1e8   :  { %v508_v33 = vrot.slane %v494_v31, %v500_v29 }
 0x1ea   :  { %v509_v34 = vcombine.low %v501_v32, %v508_v33 }
 0x1ec   :  { %511 = vst [vmem:[%s775_s7] sm:$0xff] %v509_v34 }

</bundles_post_ra>
